<compile_context>
chip_gen: v7x
topology: tpu7x:2x2x1
jax: 0.10.0
libtpu: 0.0.40
codegen_flags: <defaults>
</compile_context>

<pallas_src>
import functools

import jax
import jax.numpy as jnp
from jax import lax
from jax.experimental import pallas as pl
from jax.experimental.pallas import tpu as pltpu

EPS = 1e-5


# ----------------------------------------------------------------------------
# Fused Pallas kernel
# ----------------------------------------------------------------------------
def _instance_norm_rows(y, *, relu):
    """Per-channel InstanceNorm over the row (spatial) axis of a (S, C) f32 array.

    Single pass: sum and sum-of-squares in one sweep (var = E[y^2] - mean^2),
    biased variance, eps=1e-5, no affine -- matches nn.InstanceNorm2d defaults.
    """
    inv_n = 1.0 / y.shape[0]
    s = jnp.sum(y, axis=0, keepdims=True)
    sq = jnp.sum(y * y, axis=0, keepdims=True)
    mean = s * inv_n
    var = jnp.maximum(sq * inv_n - mean * mean, 0.0)   # guard tiny cancellation
    out = (y - mean) * lax.rsqrt(var + EPS)
    if relu:
        out = jnp.maximum(out, 0.0)
    return out


def _bottleneck_kernel(x_ref, w1_ref, w2_ref, w3_ref, *rest,
                       H, W, Ho, Wo, stride, has_shortcut):
    """Fully fused Bottleneck for one batch sample (everything stays in VMEM).

      x_ref  : (1, H, W, Cin)    activation block (compute dtype, e.g. bf16)
      w1_ref : (Cin, P)          1x1 conv1
      w2_ref : (9, P, P)         3x3 conv2, tap t = kh*3 + kw, each tap (in, out)
      w3_ref : (P, Cout)         1x1 conv3
      w_sc   : (Cin, Cout)       1x1 projection shortcut (only if has_shortcut)
      o_ref  : (1, Ho*Wo, Cout)  output block
      pad_ref: (H+2, W+2, P) f32 zero-padded conv2 input scratch (VMEM)
    """
    if has_shortcut:
        wsc_ref, o_ref, pad_ref = rest
    else:
        o_ref, pad_ref = rest

    f32 = jnp.float32
    cdt = o_ref.dtype

    x = x_ref[0]                                    # (H, W, Cin)
    cin = x.shape[-1]
    xf = x.reshape(H * W, cin)

    # ---- conv1 (1x1) + InstanceNorm + ReLU (MXU matmul, f32 accumulation) ----
    y1 = jnp.dot(xf, w1_ref[...], preferred_element_type=f32)      # (HW, P)
    out1 = _instance_norm_rows(y1, relu=True)
    planes = out1.shape[-1]

    # ---- stage conv2 input zero-padded in VMEM (replaces HBM im2col) ----
    pad_ref[...] = jnp.zeros_like(pad_ref)
    pad_ref[1:H + 1, 1:W + 1, :] = out1.reshape(H, W, planes)

    # ---- conv2 (3x3, stride, pad=1) + InstanceNorm + ReLU: 9 shifted matmuls ----
    acc = jnp.zeros((Ho * Wo, planes), f32)
    for t in range(9):
        dh, dw = t // 3, t % 3
        if stride == 1:
            tap = pad_ref[dh:dh + Ho, dw:dw + Wo, :]
        else:
            # stride > 1: strided window read straight from the VMEM scratch.
            tap = pad_ref[pl.ds(dh, Ho, stride=stride),
                          pl.ds(dw, Wo, stride=stride), :]
        lhs = tap.reshape(Ho * Wo, planes).astype(cdt)
        acc = acc + jnp.dot(lhs, w2_ref[t], preferred_element_type=f32)
    out2 = _instance_norm_rows(acc, relu=True).astype(cdt)          # (HoWo, P)

    # ---- conv3 (1x1) + InstanceNorm ----
    y3 = _instance_norm_rows(
        jnp.dot(out2, w3_ref[...], preferred_element_type=f32), relu=False)

    # ---- shortcut (identity, or strided 1x1 projection + InstanceNorm) ----
    if has_shortcut:
        if stride == 1:
            xs = xf
        else:
            xs = x_ref[0, pl.ds(0, Ho, stride=stride),
                       pl.ds(0, Wo, stride=stride), :].reshape(Ho * Wo, cin)
        res = _instance_norm_rows(
            jnp.dot(xs, wsc_ref[...], preferred_element_type=f32), relu=False)
    else:
        res = xf.astype(f32)          # identity: Cin == Cout and stride == 1

    o_ref[0] = jnp.maximum(y3 + res, 0.0).astype(cdt)


# ----------------------------------------------------------------------------
# Wrappers
# ----------------------------------------------------------------------------
def pack_bottleneck_params(params, compute_dtype=jnp.bfloat16):
    """One-time repack of PyTorch OIHW weights into kernel layouts (do outside jit)."""
    planes = params["w1"].shape[0]
    packed = {
        "w1": params["w1"].reshape(planes, -1).T.astype(compute_dtype),        # (Cin, P)
        "w2": jnp.transpose(params["w2"], (2, 3, 1, 0))                         # (kh,kw,in,out)
                 .reshape(9, planes, planes).astype(compute_dtype),             # (9, P, P)
        "w3": params["w3"].reshape(-1, planes).T.astype(compute_dtype),         # (P, Cout)
    }
    if "w_sc" in params:
        cout, cin = params["w_sc"].shape[:2]
        packed["w_sc"] = params["w_sc"].reshape(cout, cin).T.astype(compute_dtype)  # (Cin, Cout)
    return packed


def bottleneck_forward_nhwc(x_nhwc, packed, stride=1, *, vmem_limit_bytes=None):
    """Fused Bottleneck. x: (N, H, W, Cin) -> (N, Ho, Wo, Cout), compute dtype = weight dtype."""
    cdt = packed["w1"].dtype
    N, H, W, Cin = x_nhwc.shape
    planes = packed["w1"].shape[1]
    Cout = packed["w3"].shape[1]
    Ho = (H - 1) // stride + 1
    Wo = (W - 1) // stride + 1
    has_sc = "w_sc" in packed

    kernel = functools.partial(
        _bottleneck_kernel, H=H, W=W, Ho=Ho, Wo=Wo, stride=stride,
        has_shortcut=has_sc)

    in_specs = [
        pl.BlockSpec((1, H, W, Cin), lambda b: (b, 0, 0, 0)),
        pl.BlockSpec((Cin, planes), lambda b: (0, 0)),
        pl.BlockSpec((9, planes, planes), lambda b: (0, 0, 0)),
        pl.BlockSpec((planes, Cout), lambda b: (0, 0)),
    ]
    args = [x_nhwc.astype(cdt), packed["w1"], packed["w2"], packed["w3"]]
    if has_sc:
        in_specs.append(pl.BlockSpec((Cin, Cout), lambda b: (0, 0)))
        args.append(packed["w_sc"])

    out = pl.pallas_call(
        kernel,
        out_shape=jax.ShapeDtypeStruct((N, Ho * Wo, Cout), cdt),
        grid=(N,),
        in_specs=in_specs,
        out_specs=pl.BlockSpec((1, Ho * Wo, Cout), lambda b: (b, 0, 0)),
        scratch_shapes=[pltpu.VMEM((H + 2, W + 2, planes), jnp.float32)],
        compiler_params=pltpu.CompilerParams(
            dimension_semantics=("parallel",),       # samples are independent
            vmem_limit_bytes=vmem_limit_bytes),
    )(*args)
    return out.reshape(N, Ho, Wo, Cout)


def bottleneck_forward(x_nchw, params, stride=1, *,
                       compute_dtype=jnp.bfloat16, vmem_limit_bytes=None):
    """PyTorch-convention wrapper: NCHW in/out. For stacked blocks prefer the
    NHWC entry point + pack_bottleneck_params once (avoids per-block transposes)."""
    packed = pack_bottleneck_params(params, compute_dtype)
    x = jnp.transpose(x_nchw, (0, 2, 3, 1))
    y = bottleneck_forward_nhwc(x, packed, stride, vmem_limit_bytes=vmem_limit_bytes)
    return jnp.transpose(y, (0, 3, 1, 2)).astype(x_nchw.dtype)


# ----------------------------------------------------------------------------
# Parameter init (PyTorch OIHW convention) and pure-JAX reference
# ----------------------------------------------------------------------------
def init_bottleneck_params(key, in_planes, planes, stride=1, expansion=4):
    ks = jax.random.split(key, 4)
    scale = 0.1
    p = {
        "w1": scale * jax.random.normal(ks[0], (planes, in_planes, 1, 1), jnp.float32),
        "w2": scale * jax.random.normal(ks[1], (planes, planes, 3, 3), jnp.float32),
        "w3": scale * jax.random.normal(ks[2], (expansion * planes, planes, 1, 1), jnp.float32),
    }
    if stride != 1 or in_planes != expansion * planes:
        p["w_sc"] = scale * jax.random.normal(
            ks[3], (expansion * planes, in_planes, 1, 1), jnp.float32)
    return p


def _ref_conv(x, w, stride=1, pad=0):
    return lax.conv_general_dilated(
        x, w, (stride, stride), [(pad, pad), (pad, pad)],
        dimension_numbers=("NCHW", "OIHW", "NCHW"))


def _ref_inorm(x):
    mean = jnp.mean(x, axis=(2, 3), keepdims=True)
    var = jnp.mean((x - mean) ** 2, axis=(2, 3), keepdims=True)
    return (x - mean) * lax.rsqrt(var + EPS)


def bottleneck_reference(x, params, stride=1):
    out = jax.nn.relu(_ref_inorm(_ref_conv(x, params["w1"])))
    out = jax.nn.relu(_ref_inorm(_ref_conv(out, params["w2"], stride=stride, pad=1)))
    out = _ref_inorm(_ref_conv(out, params["w3"]))
    if "w_sc" in params:
        sc = _ref_inorm(_ref_conv(x, params["w_sc"], stride=stride))
    else:
        sc = x
    return jax.nn.relu(out + sc)


# ----------------------------------------------------------------------------
if __name__ == "__main__":
    key = jax.random.PRNGKey(0)
    N, H, W = 2, 16, 16
    configs = [
        # identity shortcut: in_planes == 4 * planes, stride 1
        dict(name="identity", in_planes=16, planes=4, stride=1),
        # projection shortcut: in_planes != 4 * planes
        dict(name="projection", in_planes=4, planes=4, stride=1),
    ]
    # NOTE: the stride>1 path (strided pl.ds reads from the padded VMEM scratch
    # and the strided shortcut read) is implemented but not exercised here.

    for i, cfg in enumerate(configs):
        k_x, k_p = jax.random.split(jax.random.fold_in(key, i))
        x = jax.random.normal(k_x, (N, cfg["in_planes"], H, W), jnp.float32)
        params = init_bottleneck_params(k_p, cfg["in_planes"], cfg["planes"],
                                        stride=cfg["stride"])
        ref = jax.block_until_ready(bottleneck_reference(x, params, stride=cfg["stride"]))
        assert ref.shape == (N, 4 * cfg["planes"], H, W)

        # f32 compute path: tight check of the fused-kernel math.
        out_f32 = jax.block_until_ready(
            bottleneck_forward(x, params, stride=cfg["stride"],
                               compute_dtype=jnp.float32))
        assert out_f32.shape == ref.shape
        assert jnp.allclose(out_f32, ref, atol=1e-4, rtol=1e-4), \
            f"{cfg['name']}: f32 mismatch"

        # bf16 compute path (default: halves HBM traffic, full-rate MXU); f32
        # stats/accumulation inside, so only input/weight rounding error remains.
        out_bf16 = jax.block_until_ready(
            bottleneck_forward(x, params, stride=cfg["stride"]))
        assert out_bf16.shape == ref.shape
        assert jnp.allclose(out_bf16, ref, atol=1e-1, rtol=1e-1), \
            f"{cfg['name']}: bf16 mismatch"

    print("KERNEL_OK")
</pallas_src>

<mosaic_0001>
module attributes {stable_mosaic.version = 11 : i64} {
  func.func @_bottleneck_kernel(%arg0: i32, %arg1: memref<1x16x16x16xf32, #tpu.memory_space<vmem>>, %arg2: memref<16x4xf32, #tpu.memory_space<vmem>>, %arg3: memref<9x4x4xf32, #tpu.memory_space<vmem>>, %arg4: memref<4x16xf32, #tpu.memory_space<vmem>>, %arg5: memref<1x256x16xf32, #tpu.memory_space<vmem>>, %arg6: memref<18x18x4xf32, #tpu.memory_space<vmem>>) attributes {dimension_semantics = [#tpu.dimension_semantics<parallel>], iteration_bounds = array<i64: 2>, scalar_prefetch = 0 : i64, scratch_operands = 1 : i64, tpu.core_type = #tpu.core_type<tc>, window_params = [{transform_indices = @transform_0, window_bounds = array<i64: 1, 16, 16, 16>}, {pipeline_mode = #tpu.pipeline_mode<synchronous>, transform_indices = @transform_1, window_bounds = array<i64: 16, 4>}, {pipeline_mode = #tpu.pipeline_mode<synchronous>, transform_indices = @transform_2, window_bounds = array<i64: 9, 4, 4>}, {pipeline_mode = #tpu.pipeline_mode<synchronous>, transform_indices = @transform_3, window_bounds = array<i64: 4, 16>}, {transform_indices = @transform_4, window_bounds = array<i64: 1, 256, 16>}]} {
    %c0 = arith.constant 0 : index
    %c0_0 = arith.constant 0 : index
    %c0_1 = arith.constant 0 : index
    %c0_2 = arith.constant 0 : index
    %0 = vector.load %arg1[%c0, %c0_0, %c0_1, %c0_2] : memref<1x16x16x16xf32, #tpu.memory_space<vmem>>, vector<1x16x16x16xf32>
    %1 = vector.shape_cast %0 : vector<1x16x16x16xf32> to vector<16x16x16xf32>
    %2 = vector.shape_cast %1 : vector<16x16x16xf32> to vector<256x16xf32>
    %c0_3 = arith.constant 0 : index
    %c0_4 = arith.constant 0 : index
    %3 = vector.load %arg2[%c0_3, %c0_4] : memref<16x4xf32, #tpu.memory_space<vmem>>, vector<16x4xf32>
    %cst = arith.constant dense<0.000000e+00> : vector<256x4xf32>
    %4 = tpu.matmul %2, %3, %cst {dimension_numbers = #tpu.dot_dimension_numbers<[1], [0], [0], [1], [0, 0, 1, 1], [], []>} : vector<256x16xf32>, vector<16x4xf32>, vector<256x4xf32> -> vector<256x4xf32>
    %cst_5 = arith.constant dense<0.000000e+00> : vector<4xf32>
    %5 = vector.multi_reduction <add>, %4, %cst_5 [0] : vector<256x4xf32> to vector<4xf32>
    %6 = vector.shape_cast %5 : vector<4xf32> to vector<1x4xf32>
    %7 = arith.mulf %4, %4 : vector<256x4xf32>
    %cst_6 = arith.constant dense<0.000000e+00> : vector<4xf32>
    %8 = vector.multi_reduction <add>, %7, %cst_6 [0] : vector<256x4xf32> to vector<4xf32>
    %9 = vector.shape_cast %8 : vector<4xf32> to vector<1x4xf32>
    %cst_7 = arith.constant 3.906250e-03 : f32
    %10 = vector.broadcast %cst_7 : f32 to vector<1x4xf32>
    %11 = arith.mulf %6, %10 : vector<1x4xf32>
    %cst_8 = arith.constant 3.906250e-03 : f32
    %12 = vector.broadcast %cst_8 : f32 to vector<1x4xf32>
    %13 = arith.mulf %9, %12 : vector<1x4xf32>
    %14 = arith.mulf %11, %11 : vector<1x4xf32>
    %15 = arith.subf %13, %14 : vector<1x4xf32>
    %cst_9 = arith.constant 0.000000e+00 : f32
    %16 = vector.broadcast %cst_9 : f32 to vector<1x4xf32>
    %17 = arith.maximumf %15, %16 : vector<1x4xf32>
    %18 = vector.broadcast %11 : vector<1x4xf32> to vector<256x4xf32>
    %19 = arith.subf %4, %18 : vector<256x4xf32>
    %cst_10 = arith.constant 9.99999974E-6 : f32
    %20 = vector.broadcast %cst_10 : f32 to vector<1x4xf32>
    %21 = arith.addf %17, %20 : vector<1x4xf32>
    %22 = math.rsqrt %21 : vector<1x4xf32>
    %23 = vector.broadcast %22 : vector<1x4xf32> to vector<256x4xf32>
    %24 = arith.mulf %19, %23 : vector<256x4xf32>
    %cst_11 = arith.constant 0.000000e+00 : f32
    %25 = vector.broadcast %cst_11 : f32 to vector<256x4xf32>
    %26 = arith.maximumf %24, %25 : vector<256x4xf32>
    %cst_12 = arith.constant 0.000000e+00 : f32
    %27 = vector.broadcast %cst_12 : f32 to vector<18x18x4xf32>
    %c0_13 = arith.constant 0 : index
    %c0_14 = arith.constant 0 : index
    %c0_15 = arith.constant 0 : index
    %28 = vector.load %arg6[%c0_13, %c0_14, %c0_15] : memref<18x18x4xf32, #tpu.memory_space<vmem>>, vector<18x18x4xf32>
    tpu.vector_store %arg6[%c0_13, %c0_14, %c0_15], %27 {strides = array<i32>} : memref<18x18x4xf32, #tpu.memory_space<vmem>>, vector<18x18x4xf32>,
    %29 = vector.shape_cast %26 : vector<256x4xf32> to vector<16x16x4xf32>
    %c1 = arith.constant 1 : index
    %c1_16 = arith.constant 1 : index
    %c0_17 = arith.constant 0 : index
    %30 = vector.load %arg6[%c1, %c1_16, %c0_17] : memref<18x18x4xf32, #tpu.memory_space<vmem>>, vector<16x16x4xf32>
    tpu.vector_store %arg6[%c1, %c1_16, %c0_17], %29 {strides = array<i32>} : memref<18x18x4xf32, #tpu.memory_space<vmem>>, vector<16x16x4xf32>,
    %cst_18 = arith.constant 0.000000e+00 : f32
    %31 = vector.broadcast %cst_18 : f32 to vector<256x4xf32>
    %c0_19 = arith.constant 0 : index
    %c0_20 = arith.constant 0 : index
    %c0_21 = arith.constant 0 : index
    %32 = vector.load %arg6[%c0_19, %c0_20, %c0_21] : memref<18x18x4xf32, #tpu.memory_space<vmem>>, vector<16x16x4xf32>
    %33 = vector.shape_cast %32 : vector<16x16x4xf32> to vector<256x4xf32>
    %c0_22 = arith.constant 0 : index
    %c0_23 = arith.constant 0 : index
    %c0_24 = arith.constant 0 : index
    %34 = vector.load %arg3[%c0_22, %c0_23, %c0_24] : memref<9x4x4xf32, #tpu.memory_space<vmem>>, vector<1x4x4xf32>
    %35 = vector.shape_cast %34 : vector<1x4x4xf32> to vector<4x4xf32>
    %cst_25 = arith.constant dense<0.000000e+00> : vector<256x4xf32>
    %36 = tpu.matmul %33, %35, %cst_25 {dimension_numbers = #tpu.dot_dimension_numbers<[1], [0], [0], [1], [0, 0, 1, 1], [], []>} : vector<256x4xf32>, vector<4x4xf32>, vector<256x4xf32> -> vector<256x4xf32>
    %37 = arith.addf %31, %36 : vector<256x4xf32>
    %c0_26 = arith.constant 0 : index
    %c1_27 = arith.constant 1 : index
    %c0_28 = arith.constant 0 : index
    %38 = vector.load %arg6[%c0_26, %c1_27, %c0_28] : memref<18x18x4xf32, #tpu.memory_space<vmem>>, vector<16x16x4xf32>
    %39 = vector.shape_cast %38 : vector<16x16x4xf32> to vector<256x4xf32>
    %c1_29 = arith.constant 1 : index
    %c0_30 = arith.constant 0 : index
    %c0_31 = arith.constant 0 : index
    %40 = vector.load %arg3[%c1_29, %c0_30, %c0_31] : memref<9x4x4xf32, #tpu.memory_space<vmem>>, vector<1x4x4xf32>
    %41 = vector.shape_cast %40 : vector<1x4x4xf32> to vector<4x4xf32>
    %cst_32 = arith.constant dense<0.000000e+00> : vector<256x4xf32>
    %42 = tpu.matmul %39, %41, %cst_32 {dimension_numbers = #tpu.dot_dimension_numbers<[1], [0], [0], [1], [0, 0, 1, 1], [], []>} : vector<256x4xf32>, vector<4x4xf32>, vector<256x4xf32> -> vector<256x4xf32>
    %43 = arith.addf %37, %42 : vector<256x4xf32>
    %c0_33 = arith.constant 0 : index
    %c2 = arith.constant 2 : index
    %c0_34 = arith.constant 0 : index
    %44 = vector.load %arg6[%c0_33, %c2, %c0_34] : memref<18x18x4xf32, #tpu.memory_space<vmem>>, vector<16x16x4xf32>
    %45 = vector.shape_cast %44 : vector<16x16x4xf32> to vector<256x4xf32>
    %c2_35 = arith.constant 2 : index
    %c0_36 = arith.constant 0 : index
    %c0_37 = arith.constant 0 : index
    %46 = vector.load %arg3[%c2_35, %c0_36, %c0_37] : memref<9x4x4xf32, #tpu.memory_space<vmem>>, vector<1x4x4xf32>
    %47 = vector.shape_cast %46 : vector<1x4x4xf32> to vector<4x4xf32>
    %cst_38 = arith.constant dense<0.000000e+00> : vector<256x4xf32>
    %48 = tpu.matmul %45, %47, %cst_38 {dimension_numbers = #tpu.dot_dimension_numbers<[1], [0], [0], [1], [0, 0, 1, 1], [], []>} : vector<256x4xf32>, vector<4x4xf32>, vector<256x4xf32> -> vector<256x4xf32>
    %49 = arith.addf %43, %48 : vector<256x4xf32>
    %c1_39 = arith.constant 1 : index
    %c0_40 = arith.constant 0 : index
    %c0_41 = arith.constant 0 : index
    %50 = vector.load %arg6[%c1_39, %c0_40, %c0_41] : memref<18x18x4xf32, #tpu.memory_space<vmem>>, vector<16x16x4xf32>
    %51 = vector.shape_cast %50 : vector<16x16x4xf32> to vector<256x4xf32>
    %c3 = arith.constant 3 : index
    %c0_42 = arith.constant 0 : index
    %c0_43 = arith.constant 0 : index
    %52 = vector.load %arg3[%c3, %c0_42, %c0_43] : memref<9x4x4xf32, #tpu.memory_space<vmem>>, vector<1x4x4xf32>
    %53 = vector.shape_cast %52 : vector<1x4x4xf32> to vector<4x4xf32>
    %cst_44 = arith.constant dense<0.000000e+00> : vector<256x4xf32>
    %54 = tpu.matmul %51, %53, %cst_44 {dimension_numbers = #tpu.dot_dimension_numbers<[1], [0], [0], [1], [0, 0, 1, 1], [], []>} : vector<256x4xf32>, vector<4x4xf32>, vector<256x4xf32> -> vector<256x4xf32>
    %55 = arith.addf %49, %54 : vector<256x4xf32>
    %c1_45 = arith.constant 1 : index
    %c1_46 = arith.constant 1 : index
    %c0_47 = arith.constant 0 : index
    %56 = vector.load %arg6[%c1_45, %c1_46, %c0_47] : memref<18x18x4xf32, #tpu.memory_space<vmem>>, vector<16x16x4xf32>
    %57 = vector.shape_cast %56 : vector<16x16x4xf32> to vector<256x4xf32>
    %c4 = arith.constant 4 : index
    %c0_48 = arith.constant 0 : index
    %c0_49 = arith.constant 0 : index
    %58 = vector.load %arg3[%c4, %c0_48, %c0_49] : memref<9x4x4xf32, #tpu.memory_space<vmem>>, vector<1x4x4xf32>
    %59 = vector.shape_cast %58 : vector<1x4x4xf32> to vector<4x4xf32>
    %cst_50 = arith.constant dense<0.000000e+00> : vector<256x4xf32>
    %60 = tpu.matmul %57, %59, %cst_50 {dimension_numbers = #tpu.dot_dimension_numbers<[1], [0], [0], [1], [0, 0, 1, 1], [], []>} : vector<256x4xf32>, vector<4x4xf32>, vector<256x4xf32> -> vector<256x4xf32>
    %61 = arith.addf %55, %60 : vector<256x4xf32>
    %c1_51 = arith.constant 1 : index
    %c2_52 = arith.constant 2 : index
    %c0_53 = arith.constant 0 : index
    %62 = vector.load %arg6[%c1_51, %c2_52, %c0_53] : memref<18x18x4xf32, #tpu.memory_space<vmem>>, vector<16x16x4xf32>
    %63 = vector.shape_cast %62 : vector<16x16x4xf32> to vector<256x4xf32>
    %c5 = arith.constant 5 : index
    %c0_54 = arith.constant 0 : index
    %c0_55 = arith.constant 0 : index
    %64 = vector.load %arg3[%c5, %c0_54, %c0_55] : memref<9x4x4xf32, #tpu.memory_space<vmem>>, vector<1x4x4xf32>
    %65 = vector.shape_cast %64 : vector<1x4x4xf32> to vector<4x4xf32>
    %cst_56 = arith.constant dense<0.000000e+00> : vector<256x4xf32>
    %66 = tpu.matmul %63, %65, %cst_56 {dimension_numbers = #tpu.dot_dimension_numbers<[1], [0], [0], [1], [0, 0, 1, 1], [], []>} : vector<256x4xf32>, vector<4x4xf32>, vector<256x4xf32> -> vector<256x4xf32>
    %67 = arith.addf %61, %66 : vector<256x4xf32>
    %c2_57 = arith.constant 2 : index
    %c0_58 = arith.constant 0 : index
    %c0_59 = arith.constant 0 : index
    %68 = vector.load %arg6[%c2_57, %c0_58, %c0_59] : memref<18x18x4xf32, #tpu.memory_space<vmem>>, vector<16x16x4xf32>
    %69 = vector.shape_cast %68 : vector<16x16x4xf32> to vector<256x4xf32>
    %c6 = arith.constant 6 : index
    %c0_60 = arith.constant 0 : index
    %c0_61 = arith.constant 0 : index
    %70 = vector.load %arg3[%c6, %c0_60, %c0_61] : memref<9x4x4xf32, #tpu.memory_space<vmem>>, vector<1x4x4xf32>
    %71 = vector.shape_cast %70 : vector<1x4x4xf32> to vector<4x4xf32>
    %cst_62 = arith.constant dense<0.000000e+00> : vector<256x4xf32>
    %72 = tpu.matmul %69, %71, %cst_62 {dimension_numbers = #tpu.dot_dimension_numbers<[1], [0], [0], [1], [0, 0, 1, 1], [], []>} : vector<256x4xf32>, vector<4x4xf32>, vector<256x4xf32> -> vector<256x4xf32>
    %73 = arith.addf %67, %72 : vector<256x4xf32>
    %c2_63 = arith.constant 2 : index
    %c1_64 = arith.constant 1 : index
    %c0_65 = arith.constant 0 : index
    %74 = vector.load %arg6[%c2_63, %c1_64, %c0_65] : memref<18x18x4xf32, #tpu.memory_space<vmem>>, vector<16x16x4xf32>
    %75 = vector.shape_cast %74 : vector<16x16x4xf32> to vector<256x4xf32>
    %c7 = arith.constant 7 : index
    %c0_66 = arith.constant 0 : index
    %c0_67 = arith.constant 0 : index
    %76 = vector.load %arg3[%c7, %c0_66, %c0_67] : memref<9x4x4xf32, #tpu.memory_space<vmem>>, vector<1x4x4xf32>
    %77 = vector.shape_cast %76 : vector<1x4x4xf32> to vector<4x4xf32>
    %cst_68 = arith.constant dense<0.000000e+00> : vector<256x4xf32>
    %78 = tpu.matmul %75, %77, %cst_68 {dimension_numbers = #tpu.dot_dimension_numbers<[1], [0], [0], [1], [0, 0, 1, 1], [], []>} : vector<256x4xf32>, vector<4x4xf32>, vector<256x4xf32> -> vector<256x4xf32>
    %79 = arith.addf %73, %78 : vector<256x4xf32>
    %c2_69 = arith.constant 2 : index
    %c2_70 = arith.constant 2 : index
    %c0_71 = arith.constant 0 : index
    %80 = vector.load %arg6[%c2_69, %c2_70, %c0_71] : memref<18x18x4xf32, #tpu.memory_space<vmem>>, vector<16x16x4xf32>
    %81 = vector.shape_cast %80 : vector<16x16x4xf32> to vector<256x4xf32>
    %c8 = arith.constant 8 : index
    %c0_72 = arith.constant 0 : index
    %c0_73 = arith.constant 0 : index
    %82 = vector.load %arg3[%c8, %c0_72, %c0_73] : memref<9x4x4xf32, #tpu.memory_space<vmem>>, vector<1x4x4xf32>
    %83 = vector.shape_cast %82 : vector<1x4x4xf32> to vector<4x4xf32>
    %cst_74 = arith.constant dense<0.000000e+00> : vector<256x4xf32>
    %84 = tpu.matmul %81, %83, %cst_74 {dimension_numbers = #tpu.dot_dimension_numbers<[1], [0], [0], [1], [0, 0, 1, 1], [], []>} : vector<256x4xf32>, vector<4x4xf32>, vector<256x4xf32> -> vector<256x4xf32>
    %85 = arith.addf %79, %84 : vector<256x4xf32>
    %cst_75 = arith.constant dense<0.000000e+00> : vector<4xf32>
    %86 = vector.multi_reduction <add>, %85, %cst_75 [0] : vector<256x4xf32> to vector<4xf32>
    %87 = vector.shape_cast %86 : vector<4xf32> to vector<1x4xf32>
    %88 = arith.mulf %85, %85 : vector<256x4xf32>
    %cst_76 = arith.constant dense<0.000000e+00> : vector<4xf32>
    %89 = vector.multi_reduction <add>, %88, %cst_76 [0] : vector<256x4xf32> to vector<4xf32>
    %90 = vector.shape_cast %89 : vector<4xf32> to vector<1x4xf32>
    %cst_77 = arith.constant 3.906250e-03 : f32
    %91 = vector.broadcast %cst_77 : f32 to vector<1x4xf32>
    %92 = arith.mulf %87, %91 : vector<1x4xf32>
    %cst_78 = arith.constant 3.906250e-03 : f32
    %93 = vector.broadcast %cst_78 : f32 to vector<1x4xf32>
    %94 = arith.mulf %90, %93 : vector<1x4xf32>
    %95 = arith.mulf %92, %92 : vector<1x4xf32>
    %96 = arith.subf %94, %95 : vector<1x4xf32>
    %cst_79 = arith.constant 0.000000e+00 : f32
    %97 = vector.broadcast %cst_79 : f32 to vector<1x4xf32>
    %98 = arith.maximumf %96, %97 : vector<1x4xf32>
    %99 = vector.broadcast %92 : vector<1x4xf32> to vector<256x4xf32>
    %100 = arith.subf %85, %99 : vector<256x4xf32>
    %cst_80 = arith.constant 9.99999974E-6 : f32
    %101 = vector.broadcast %cst_80 : f32 to vector<1x4xf32>
    %102 = arith.addf %98, %101 : vector<1x4xf32>
    %103 = math.rsqrt %102 : vector<1x4xf32>
    %104 = vector.broadcast %103 : vector<1x4xf32> to vector<256x4xf32>
    %105 = arith.mulf %100, %104 : vector<256x4xf32>
    %cst_81 = arith.constant 0.000000e+00 : f32
    %106 = vector.broadcast %cst_81 : f32 to vector<256x4xf32>
    %107 = arith.maximumf %105, %106 : vector<256x4xf32>
    %c0_82 = arith.constant 0 : index
    %c0_83 = arith.constant 0 : index
    %108 = vector.load %arg4[%c0_82, %c0_83] : memref<4x16xf32, #tpu.memory_space<vmem>>, vector<4x16xf32>
    %cst_84 = arith.constant dense<0.000000e+00> : vector<256x16xf32>
    %109 = tpu.matmul %107, %108, %cst_84 {dimension_numbers = #tpu.dot_dimension_numbers<[1], [0], [0], [1], [0, 0, 1, 1], [], []>} : vector<256x4xf32>, vector<4x16xf32>, vector<256x16xf32> -> vector<256x16xf32>
    %cst_85 = arith.constant dense<0.000000e+00> : vector<16xf32>
    %110 = vector.multi_reduction <add>, %109, %cst_85 [0] : vector<256x16xf32> to vector<16xf32>
    %111 = vector.shape_cast %110 : vector<16xf32> to vector<1x16xf32>
    %112 = arith.mulf %109, %109 : vector<256x16xf32>
    %cst_86 = arith.constant dense<0.000000e+00> : vector<16xf32>
    %113 = vector.multi_reduction <add>, %112, %cst_86 [0] : vector<256x16xf32> to vector<16xf32>
    %114 = vector.shape_cast %113 : vector<16xf32> to vector<1x16xf32>
    %cst_87 = arith.constant 3.906250e-03 : f32
    %115 = vector.broadcast %cst_87 : f32 to vector<1x16xf32>
    %116 = arith.mulf %111, %115 : vector<1x16xf32>
    %cst_88 = arith.constant 3.906250e-03 : f32
    %117 = vector.broadcast %cst_88 : f32 to vector<1x16xf32>
    %118 = arith.mulf %114, %117 : vector<1x16xf32>
    %119 = arith.mulf %116, %116 : vector<1x16xf32>
    %120 = arith.subf %118, %119 : vector<1x16xf32>
    %cst_89 = arith.constant 0.000000e+00 : f32
    %121 = vector.broadcast %cst_89 : f32 to vector<1x16xf32>
    %122 = arith.maximumf %120, %121 : vector<1x16xf32>
    %123 = vector.broadcast %116 : vector<1x16xf32> to vector<256x16xf32>
    %124 = arith.subf %109, %123 : vector<256x16xf32>
    %cst_90 = arith.constant 9.99999974E-6 : f32
    %125 = vector.broadcast %cst_90 : f32 to vector<1x16xf32>
    %126 = arith.addf %122, %125 : vector<1x16xf32>
    %127 = math.rsqrt %126 : vector<1x16xf32>
    %128 = vector.broadcast %127 : vector<1x16xf32> to vector<256x16xf32>
    %129 = arith.mulf %124, %128 : vector<256x16xf32>
    %130 = arith.addf %129, %2 : vector<256x16xf32>
    %cst_91 = arith.constant 0.000000e+00 : f32
    %131 = vector.broadcast %cst_91 : f32 to vector<256x16xf32>
    %132 = arith.maximumf %130, %131 : vector<256x16xf32>
    %c0_92 = arith.constant 0 : index
    %c0_93 = arith.constant 0 : index
    %c0_94 = arith.constant 0 : index
    %133 = vector.load %arg5[%c0_92, %c0_93, %c0_94] : memref<1x256x16xf32, #tpu.memory_space<vmem>>, vector<1x256x16xf32>
    %134 = vector.shape_cast %133 : vector<1x256x16xf32> to vector<256x16xf32>
    %135 = vector.shape_cast %132 : vector<256x16xf32> to vector<1x256x16xf32>
    tpu.vector_store %arg5[%c0_92, %c0_93, %c0_94], %135 {strides = array<i32>} : memref<1x256x16xf32, #tpu.memory_space<vmem>>, vector<1x256x16xf32>,
    return
  }
  func.func @transform_0(%arg0: i32) -> (i32, i32, i32, i32) {
    %c0_i32 = arith.constant 0 : i32
    %c0_i32_0 = arith.constant 0 : i32
    %c0_i32_1 = arith.constant 0 : i32
    %c0_i32_2 = arith.constant 0 : i32
    return %arg0, %c0_i32, %c0_i32_0, %c0_i32_1 : i32, i32, i32, i32
  }
  func.func @transform_1(%arg0: i32) -> (i32, i32) {
    %c0_i32 = arith.constant 0 : i32
    %c0_i32_0 = arith.constant 0 : i32
    %c0_i32_1 = arith.constant 0 : i32
    return %c0_i32, %c0_i32_0 : i32, i32
  }
  func.func @transform_2(%arg0: i32) -> (i32, i32, i32) {
    %c0_i32 = arith.constant 0 : i32
    %c0_i32_0 = arith.constant 0 : i32
    %c0_i32_1 = arith.constant 0 : i32
    %c0_i32_2 = arith.constant 0 : i32
    return %c0_i32, %c0_i32_0, %c0_i32_1 : i32, i32, i32
  }
  func.func @transform_3(%arg0: i32) -> (i32, i32) {
    %c0_i32 = arith.constant 0 : i32
    %c0_i32_0 = arith.constant 0 : i32
    %c0_i32_1 = arith.constant 0 : i32
    return %c0_i32, %c0_i32_0 : i32, i32
  }
  func.func @transform_4(%arg0: i32) -> (i32, i32, i32) {
    %c0_i32 = arith.constant 0 : i32
    %c0_i32_0 = arith.constant 0 : i32
    %c0_i32_1 = arith.constant 0 : i32
    return %arg0, %c0_i32, %c0_i32_0 : i32, i32, i32
  }
}

</mosaic_0001>

<bundles_post_ra>
// kernel: tpu_custom_call.1
= control target key start
LH: loop header
LB: loop body
LE: loop exit
PB: predicated region body
PF: predicated region fallthrough
CT: control target
= control target key end

     0   :  { %9 = vsyncpa [#allocation4], 0  ;;  %s9447_s0 = inlined_call_operand.hbm [shape: f32[2,16,16,16], index: 0, kind: input, shape index: {}]   ;;  %s9448_s1 = inlined_call_operand.vmem [shape: f32[16,4], index: 1, kind: input, shape index: {}]   ;;  %s9449_s2 = inlined_call_operand.vmem [shape: f32[9,4,4], index: 2, kind: input, shape index: {}]   ;;  %s9450_s3 = inlined_call_operand.vmem [shape: f32[4,16], index: 3, kind: input, shape index: {}]   ;;  %s9451_s4 = inlined_call_operand.vmem [shape: f32[2,256,16], index: 4, kind: output, shape index: {}]  }
   0x1   :  { %11 = vsyncpa [#allocation4 + $0x1], 0  ;;  %s7123_s15 = smov 0   ;;  %s7125_s16 = smov 0  }
   0x2   :  { %s7127_s17 = smov 0   ;;  %s7129_s18 = smov 0  }
   0x3 LB: > { %s7142_s19 = sadd.s32 4294967295, %s7092_s18   ;;  %s7145_s20 = sadd.s32 1, %s7092_s18   ;;  %s7092_s18 = sphi %s7129_s18, %s9548_s18   ;;  %s7088_s17 = sphi %s7127_s17, %s9547_s17   ;;  %s7084_s16 = sphi %s7125_s16, %s9546_s16   ;;  %s7080_s15 = sphi %s7123_s15, %s9545_s15  }
   0x4   : > { %s21_s21 = ssub.s32 %s7092_s18, %s7145_s20  ;;  %s24_s22 = sadd.s32 1, %s7088_s17 }
   0x5   : > { %p22_p0 = scmp.eq.s32.totalorder %s21_s21, 0  ;;  %p31_p1 = scmp.ne.s32.totalorder %s7088_s17, %s7084_s16 }
   0x6   : > { %p32_p2 = scmp.eq.s32.totalorder %s7092_s18, 0  ;;  %p37_p3 = scmp.ne.s32.totalorder %s7084_s16, %s7080_s15 }
   0x7   : > { %s7155_s23 = scalar_select %p22_p0, %s7088_s17, %s24_s22  }
   0x8   : > { %p33_p4 = por %p32_p2, %p31_p1  ;;  %p38_p5 = scmp.eq.s32.totalorder %s7142_s19, 0 }
   0x9   : > { %p6953_p6 = scmp.lt.s32.totalorder %s7092_s18, 2  ;;  %s159_s25 = sand.u32 1, %s7088_s17  }
   0xa   : > { %p7159_p7 = por %p38_p5, %p37_p3  ;;  %s5388_s26 = sshll.u32 %s159_s25, 8 }
   0xb   : > { %s5767_s27 = sshll.u32 %s7092_s18, 12  ;;  %s163_s5 = scalar_lea.vmem [#allocation3], %s5388_s26 }
   0xc   : > { %s7168_s30 = scalar_lea.hbm %s9447_s0, %s5767_s27  ;;  %s170_s6 = sshll.u32 %s163_s5, 4  ;;  %s7170_s6 = int_to_ptr.vmem [resolvable:$true] %s170_s6 }
   0xd   : > { %p7172_p8 = pnand %p6953_p6, %p33_p4  ;;  %s7177_s8 = scalar_lea.sflag [#allocation4], %s159_s25 }
   0xe   : > { %s7028_s9 = scalar_lea.hbm %s7168_s30, 4096  ;;  %s7033_s12 = scalar_lea.hbm %s9447_s0, 8192 }
   0xf   : > { %p7029_p10 = scmp.ne.s32.totalorder %s7168_s30, %s7028_s9  ;;  %p7030_p11 = pneg %p7172_p8 }
  0x10   : > { %p7034_p0 = scmp.lt.u32.totalorder %s7168_s30, %s9447_s0  ;;  %p7035_p1 = scmp.lt.u32.totalorder %s7033_s12, %s7028_s9 }
  0x11   : > { %p7031_p12 = pnand %p7030_p11, %p7029_p10  ;;  %p7037_p3 = scmp.lt.u32.totalorder %s7028_s9, %s7168_s30 }
  0x12   : > { %p7036_p2 = por %p7035_p1, %p7034_p0 }
  0x13   : > { %p7032_p13 = pneg %p7031_p12 }
  0x14   : > { %p7038_p4 = por %p7037_p3, %p7036_p2 }
  0x16   : > { %p7039_p5 = pnand %p7038_p4, %p7032_p13 }
  0x18   : > { %7042 = shalt.err (!%p7039_p5)
}
  0x19   : > { %s7043_s15 = scalar_lea.vmem %s7170_s6, 4096  ;;  %s7094_s21 = smov [#allocation3]  }
  0x1a   : > { %p7044_p6 = scmp.ne.s32.totalorder %s7170_s6, %s7043_s15  ;;  %s7048_s22 = sshll.u32 %s7094_s21, 4  ;;  %s7049_s22 = int_to_ptr.vmem [resolvable:$false] %s7048_s22 }
  0x1b   : > { %s7050_s25 = scalar_lea.vmem %s7049_s22, 8192  ;;  %p7051_p9 = scmp.lt.s32.totalorder %s7170_s6, %s7049_s22 }
  0x1c   : > { %p7046_p10 = pnand %p7044_p6, %p7030_p11  ;;  %p7052_p0 = scmp.lt.s32.totalorder %s7050_s25, %s7043_s15 }
  0x1e   : > { %p7047_p12 = pneg %p7046_p10  ;;  %p7053_p1 = por %p7052_p0, %p7051_p9 }
  0x20   : > { %p7054_p2 = pnand %p7053_p1, %p7047_p12 }
  0x22   : > { %7057 = shalt.err (!%p7054_p2)
}
  0x23   : > { %s7095_s26 = smov 128   ;;  %s7096_s27 = smov 8  }
  0x24   : > { %6952 = dma.hbm_to_vmem [thread:$0]  (!%p7172_p8), %s7168_s30, 4096, %s7170_s6, %s7177_s8, %s7095_s26, %s7095_s26, %s7096_s27  }
  0x25   : > { %p178_p11 = scmp.lt.s32.totalorder %s7092_s18, 3  ;;  %p9484_p13 = scmp.ge.s32.totalorder %s7092_s18, 1 }
  0x27   : > { %p179_p3 = pnand %p9484_p13, %p178_p11 }
  0x29   : > { %182 = sbr.rel (%p179_p3) target bundleno = 1360 (0x550), region = 36 }
  0x30   : > { %s184_s28 = sand.u32 1, %s7084_s16  }
  0x31   : > { %s5392_s29 = sshll.u32 %s184_s28, 8  ;;  %s185_s5 = scalar_lea.sflag [#allocation4], %s184_s28 }
  0x32   : > { %s7209_s9 = scalar_lea.vmem [#allocation3], %s5392_s29 }
  0x33   : > { %7075 = dma.done.wait (%p7159_p7), %s185_s5, 4096  }
  0x34   : > { %7077 = vsyncadd (%p7159_p7), %s185_s5, 4294963200  ;;  %vm252_vm0 = vcmask 130048   ;;  %v250_v0 = vld [vmem:[%s9448_s1] sm:$0xff]  ;;  %v251_v1 = vld [vmem:[%s9448_s1 + $0x8] sm:$0xff]  ;;  %vm574_vm1 = vcmask 31744   ;;  %vm850_vm2 = vcmask 25600  }
  0x35   : > { %v218_v2 = vld [vmem:[%s7209_s9] sm:$0xff]  ;;  %v6685_v3 = vpack.c.bf16 %v251_v1, %v250_v0  ;;  %v219_v4 = vld [vmem:[%s7209_s9 + $0x8] sm:$0xff]  ;;  %v220_v5 = vld [vmem:[%s7209_s9 + $0x10] sm:$0xff]  ;;  %v7097_v35 = vmov 0.0   ;;  %vm1099_vm3 = vcmask 1043456   ;;  %p213_p7 = scmp.lt.s32.totalorder %s7142_s19, 1 }
  0x36   : > { %6137 = vmatprep.mubr.msk.f32.mxu0 %vm252_vm0, %v218_v2  ;;  %v221_v6 = vld [vmem:[%s7209_s9 + $0x18] sm:$0xff]  ;;  %v222_v7 = vld [vmem:[%s7209_s9 + $0x20] sm:$0xff]  ;;  %v223_v8 = vld [vmem:[%s7209_s9 + $0x28] sm:$0xff]  ;;  %853 = vst.msk [vmem:[#allocation2 + $0x20] sm:$0xff] %vm574_vm1, %v7097_v35 }
  0x37   : > { %6686 = vmatprep.subr.bf16.mxu0 %v6685_v3  ;;  %v224_v9 = vld [vmem:[%s7209_s9 + $0x30] sm:$0xff]  ;;  %v225_v10 = vld [vmem:[%s7209_s9 + $0x38] sm:$0xff]  ;;  %v226_v11 = vld [vmem:[%s7209_s9 + $0x40] sm:$0xff]  ;;  %854 = vst.msk [vmem:[#allocation2 + $0x28] sm:$0x3] %vm850_vm2, %v7097_v35  ;;  %s9550_s19 = smov (!%p213_p7, %s7142_s19), 1 }
  0x38   : > { %6688 = vmatpush3.bf16.msra.mxu0 %v6685_v3  ;;  %v227_v12 = vld [vmem:[%s7209_s9 + $0x48] sm:$0xff]  ;;  %v228_v13 = vld [vmem:[%s7209_s9 + $0x50] sm:$0xff]  ;;  %v229_v14 = vld [vmem:[%s7209_s9 + $0x58] sm:$0xff]  ;;  %848 = vst.msk [vmem:[#allocation2] sm:$0xff] %vm574_vm1, %v7097_v35  ;;  %s5768_s10 = sshll.u32 %s9550_s19, 8 }
  0x39   : > { %v230_v15 = vld [vmem:[%s7209_s9 + $0x60] sm:$0xff]  ;;  %v231_v16 = vld [vmem:[%s7209_s9 + $0x68] sm:$0xff]  ;;  %v232_v17 = vld [vmem:[%s7209_s9 + $0x70] sm:$0xff]  ;;  %849 = vst.msk [vmem:[#allocation2 + $0x8] sm:$0xff] %vm574_vm1, %v7097_v35  ;;  %s9320_s12 = scalar_lea.vmem %s9451_s4, %s5768_s10 }
  0x3a   : > { %v233_v18 = vld [vmem:[%s7209_s9 + $0x78] sm:$0xff]  ;;  %v234_v19 = vld [vmem:[%s7209_s9 + $0x80] sm:$0xff]  ;;  %v235_v20 = vld [vmem:[%s7209_s9 + $0x88] sm:$0xff]  ;;  %851 = vst.msk [vmem:[#allocation2 + $0x10] sm:$0x3] %vm850_vm2, %v7097_v35 }
  0x3b   : > { %6138 = vmatmul.mubr.msk.f32.vlgmr.msra.gmra.mrb[0].mxu0 %vm252_vm0, %v219_v4  ;;  %v236_v21 = vld [vmem:[%s7209_s9 + $0x90] sm:$0xff]  ;;  %v237_v22 = vld [vmem:[%s7209_s9 + $0x98] sm:$0xff]  ;;  %v238_v23 = vld [vmem:[%s7209_s9 + $0xa0] sm:$0xff]  ;;  %852 = vst.msk [vmem:[#allocation2 + $0x18] sm:$0xff] %vm574_vm1, %v7097_v35 }
  0x3c   : > { %6140 = vmatprep.mubr.msk.f32.mxu0 %vm252_vm0, %v220_v5  ;;  %v239_v24 = vld [vmem:[%s7209_s9 + $0xa8] sm:$0xff]  ;;  %v240_v25 = vld [vmem:[%s7209_s9 + $0xb0] sm:$0xff]  ;;  %v241_v26 = vld [vmem:[%s7209_s9 + $0xb8] sm:$0xff]  ;;  %855 = vst.msk [vmem:[#allocation2 + $0x30] sm:$0xff] %vm574_vm1, %v7097_v35 }
  0x3d   : > { %v242_v27 = vld [vmem:[%s7209_s9 + $0xc0] sm:$0xff]  ;;  %v243_v28 = vld [vmem:[%s7209_s9 + $0xc8] sm:$0xff]  ;;  %v244_v29 = vld [vmem:[%s7209_s9 + $0xd0] sm:$0xff]  ;;  %856 = vst.msk [vmem:[#allocation2 + $0x38] sm:$0xff] %vm574_vm1, %v7097_v35 }
  0x3e   : > { %v245_v30 = vld [vmem:[%s7209_s9 + $0xd8] sm:$0xff]  ;;  %v246_v31 = vld [vmem:[%s7209_s9 + $0xe0] sm:$0xff]  ;;  %v247_v32 = vld [vmem:[%s7209_s9 + $0xe8] sm:$0xff]  ;;  %857 = vst.msk [vmem:[#allocation2 + $0x40] sm:$0x3] %vm850_vm2, %v7097_v35 }
  0x3f   : > { %6141 = vmatmul.mubr.msk.f32.gmra.mrb[2].mxu0 %vm252_vm0, %v221_v6  ;;  %v248_v33 = vld [vmem:[%s7209_s9 + $0xf0] sm:$0xff]  ;;  %v249_v34 = vld [vmem:[%s7209_s9 + $0xf8] sm:$0xff]  ;;  %858 = vst.msk [vmem:[#allocation2 + $0x48] sm:$0xff] %vm574_vm1, %v7097_v35  ;;  %859 = vst.msk [vmem:[#allocation2 + $0x50] sm:$0xff] %vm574_vm1, %v7097_v35 }
  0x40   : > { %6143 = vmatprep.mubr.msk.f32.mxu0 %vm252_vm0, %v222_v7  ;;  %860 = vst.msk [vmem:[#allocation2 + $0x58] sm:$0x3] %vm850_vm2, %v7097_v35  ;;  %863 = vst.msk [vmem:[#allocation2 + $0x70] sm:$0x3] %vm850_vm2, %v7097_v35  ;;  %v5427_v36 = vld [vmem:[%s9449_s2 + $0x4] sm:$0xf] }
  0x41   : > { %861 = vst.msk [vmem:[#allocation2 + $0x60] sm:$0xff] %vm574_vm1, %v7097_v35  ;;  %862 = vst.msk [vmem:[#allocation2 + $0x68] sm:$0xff] %vm574_vm1, %v7097_v35  ;;  %v969_v37 = vld [vmem:[#allocation2 + $0x1] sm:$0xff]  ;;  %v970_v38 = vld [vmem:[#allocation2 + $0x9] sm:$0xff]  ;;  %6185 = vmatprep.subr.msk.mxu0 %vm1099_vm3, %v5427_v36 }
  0x42   : > { %864 = vst.msk [vmem:[#allocation2 + $0x78] sm:$0xff] %vm574_vm1, %v7097_v35  ;;  %865 = vst.msk [vmem:[#allocation2 + $0x80] sm:$0xff] %vm574_vm1, %v7097_v35  ;;  %v7347_v39 = vld [vmem:[%s9449_s2 + $0xc] sm:$0xf]  ;;  %6186 = vmatpush3.msk.msra.mxu0 %vm1099_vm3, %v5427_v36  ;;  %v7358_v40 = vld [vmem:[%s9449_s2 + $0x10] sm:$0xf] }
  0x43   : > { %6144 = vmatmul.mubr.msk.f32.gmra.mrb[4].mxu0 %vm252_vm0, %v223_v8  ;;  %866 = vst.msk [vmem:[#allocation2 + $0x88] sm:$0x3] %vm850_vm2, %v7097_v35  ;;  %869 = vst.msk [vmem:[#allocation2 + $0xa0] sm:$0x3] %vm850_vm2, %v7097_v35  ;;  %6689 = vmatprep.subr.msk.mxu1 %vm1099_vm3, %v7347_v39 }
  0x44   : > { %6146 = vmatprep.mubr.msk.f32.mxu0 %vm252_vm0, %v224_v9  ;;  %867 = vst.msk [vmem:[#allocation2 + $0x90] sm:$0xff] %vm574_vm1, %v7097_v35  ;;  %868 = vst.msk [vmem:[#allocation2 + $0x98] sm:$0xff] %vm574_vm1, %v7097_v35  ;;  %6690 = vmatpush3.msk.msra.mxu1 %vm1099_vm3, %v7347_v39 }
  0x45   : > { %870 = vst.msk [vmem:[#allocation2 + $0xa8] sm:$0xff] %vm574_vm1, %v7097_v35  ;;  %871 = vst.msk [vmem:[#allocation2 + $0xb0] sm:$0xff] %vm574_vm1, %v7097_v35  ;;  %6385 = vmatprep.subr.msk.mxu1 %vm1099_vm3, %v7358_v40 }
  0x46   : > { %872 = vst.msk [vmem:[#allocation2 + $0xb8] sm:$0x3] %vm850_vm2, %v7097_v35  ;;  %875 = vst.msk [vmem:[#allocation2 + $0xd0] sm:$0x3] %vm850_vm2, %v7097_v35 }
  0x47   : > { %6147 = vmatmul.mubr.msk.f32.gmra.mrb[6].mxu0 %vm252_vm0, %v225_v10  ;;  %873 = vst.msk [vmem:[#allocation2 + $0xc0] sm:$0xff] %vm574_vm1, %v7097_v35  ;;  %874 = vst.msk [vmem:[#allocation2 + $0xc8] sm:$0xff] %vm574_vm1, %v7097_v35 }
  0x48   : > { %6149 = vmatprep.mubr.msk.f32.mxu0 %vm252_vm0, %v226_v11  ;;  %876 = vst.msk [vmem:[#allocation2 + $0xd8] sm:$0xff] %vm574_vm1, %v7097_v35  ;;  %877 = vst.msk [vmem:[#allocation2 + $0xe0] sm:$0xff] %vm574_vm1, %v7097_v35 }
  0x49   : > { %878 = vst.msk [vmem:[#allocation2 + $0xe8] sm:$0x3] %vm850_vm2, %v7097_v35  ;;  %881 = vst.msk [vmem:[#allocation2 + $0x100] sm:$0x3] %vm850_vm2, %v7097_v35 }
  0x4a   : > { %879 = vst.msk [vmem:[#allocation2 + $0xf0] sm:$0xff] %vm574_vm1, %v7097_v35  ;;  %880 = vst.msk [vmem:[#allocation2 + $0xf8] sm:$0xff] %vm574_vm1, %v7097_v35 }
  0x4b   : > { %6150 = vmatmul.mubr.msk.f32.gmra.mrb[8].mxu0 %vm252_vm0, %v227_v12  ;;  %882 = vst.msk [vmem:[#allocation2 + $0x108] sm:$0xff] %vm574_vm1, %v7097_v35  ;;  %883 = vst.msk [vmem:[#allocation2 + $0x110] sm:$0xff] %vm574_vm1, %v7097_v35 }
  0x4c   : > { %6152 = vmatprep.mubr.msk.f32.mxu0 %vm252_vm0, %v228_v13  ;;  %884 = vst.msk [vmem:[#allocation2 + $0x118] sm:$0x3] %vm850_vm2, %v7097_v35  ;;  %887 = vst.msk [vmem:[#allocation2 + $0x130] sm:$0x3] %vm850_vm2, %v7097_v35 }
  0x4d   : > { %885 = vst.msk [vmem:[#allocation2 + $0x120] sm:$0xff] %vm574_vm1, %v7097_v35  ;;  %886 = vst.msk [vmem:[#allocation2 + $0x128] sm:$0xff] %vm574_vm1, %v7097_v35 }
  0x4e   : > { %888 = vst.msk [vmem:[#allocation2 + $0x138] sm:$0xff] %vm574_vm1, %v7097_v35  ;;  %889 = vst.msk [vmem:[#allocation2 + $0x140] sm:$0xff] %vm574_vm1, %v7097_v35 }
  0x4f   : > { %6153 = vmatmul.mubr.msk.f32.gmra.mrb[10].mxu0 %vm252_vm0, %v229_v14  ;;  %890 = vst.msk [vmem:[#allocation2 + $0x148] sm:$0x3] %vm850_vm2, %v7097_v35  ;;  %893 = vst.msk [vmem:[#allocation2 + $0x160] sm:$0x3] %vm850_vm2, %v7097_v35 }
  0x50   : > { %6155 = vmatprep.mubr.msk.f32.mxu0 %vm252_vm0, %v230_v15  ;;  %891 = vst.msk [vmem:[#allocation2 + $0x150] sm:$0xff] %vm574_vm1, %v7097_v35  ;;  %892 = vst.msk [vmem:[#allocation2 + $0x158] sm:$0xff] %vm574_vm1, %v7097_v35 }
  0x51   : > { %894 = vst.msk [vmem:[#allocation2 + $0x168] sm:$0xff] %vm574_vm1, %v7097_v35  ;;  %895 = vst.msk [vmem:[#allocation2 + $0x170] sm:$0xff] %vm574_vm1, %v7097_v35 }
  0x52   : > { %896 = vst.msk [vmem:[#allocation2 + $0x178] sm:$0x3] %vm850_vm2, %v7097_v35  ;;  %899 = vst.msk [vmem:[#allocation2 + $0x190] sm:$0x3] %vm850_vm2, %v7097_v35 }
  0x53   : > { %6156 = vmatmul.mubr.msk.f32.gmra.mrb[12].mxu0 %vm252_vm0, %v231_v16  ;;  %897 = vst.msk [vmem:[#allocation2 + $0x180] sm:$0xff] %vm574_vm1, %v7097_v35  ;;  %898 = vst.msk [vmem:[#allocation2 + $0x188] sm:$0xff] %vm574_vm1, %v7097_v35 }
  0x54   : > { %6158 = vmatprep.mubr.msk.f32.mxu0 %vm252_vm0, %v232_v17  ;;  %900 = vst.msk [vmem:[#allocation2 + $0x198] sm:$0xff] %vm574_vm1, %v7097_v35  ;;  %901 = vst.msk [vmem:[#allocation2 + $0x1a0] sm:$0xff] %vm574_vm1, %v7097_v35 }
  0x55   : > { %902 = vst.msk [vmem:[#allocation2 + $0x1a8] sm:$0x3] %vm850_vm2, %v7097_v35 }
  0x57   : > { %6159 = vmatmul.mubr.msk.f32.gmra.mrb[14].mxu0 %vm252_vm0, %v233_v18 }
  0x58   : > { %6161 = vmatprep.mubr.msk.f32.mxu0 %vm252_vm0, %v234_v19 }
  0x5b   : > { %6162 = vmatmul.mubr.msk.f32.gmra.mrb[16].mxu0 %vm252_vm0, %v235_v20 }
  0x5c   : > { %6164 = vmatprep.mubr.msk.f32.mxu0 %vm252_vm0, %v236_v21 }
  0x5f   : > { %6165 = vmatmul.mubr.msk.f32.gmra.mrb[18].mxu0 %vm252_vm0, %v237_v22 }
  0x60   : > { %6167 = vmatprep.mubr.msk.f32.mxu0 %vm252_vm0, %v238_v23 }
  0x63   : > { %6168 = vmatmul.mubr.msk.f32.gmra.mrb[20].mxu0 %vm252_vm0, %v239_v24 }
  0x64   : > { %6170 = vmatprep.mubr.msk.f32.mxu0 %vm252_vm0, %v240_v25 }
  0x67   : > { %6171 = vmatmul.mubr.msk.f32.gmra.mrb[22].mxu0 %vm252_vm0, %v241_v26 }
  0x68   : > { %6173 = vmatprep.mubr.msk.f32.mxu0 %vm252_vm0, %v242_v27 }
  0x6b   : > { %6174 = vmatmul.mubr.msk.f32.gmra.mrb[24].mxu0 %vm252_vm0, %v243_v28 }
  0x6c   : > { %6176 = vmatprep.mubr.msk.f32.mxu0 %vm252_vm0, %v244_v29 }
  0x6f   : > { %6177 = vmatmul.mubr.msk.f32.gmra.mrb[26].mxu0 %vm252_vm0, %v245_v30 }
  0x70   : > { %6179 = vmatprep.mubr.msk.f32.mxu0 %vm252_vm0, %v246_v31 }
  0x73   : > { %6180 = vmatmul.mubr.msk.f32.gmra.mrb[28].mxu0 %vm252_vm0, %v247_v32 }
  0x74   : > { %6182 = vmatprep.mubr.msk.f32.mxu0 %vm252_vm0, %v248_v33 }
  0x77   : > { %6183 = vmatmul.mubr.msk.f32.gmra.mrb[30].mxu0 %vm252_vm0, %v249_v34 }
  0x78   : > { %6187 = vmatprep.mubr.msk.f32.mxu0 %vm574_vm1, %v969_v37 }
  0x7b   : > { %6188 = vmatmul.mubr.msk.f32.vlgmr.msra.gmra.mrb[32].mxu0 %vm574_vm1, %v970_v38 }
 0x10e   : > { %v7362_v41 = vpop.f32.mrb[0].mxu0 }
 0x10f   : > { %v576_v42 = vsel %vm574_vm1, %v7362_v41, 0.0  ;;  %v645_v43 = vmul.f32 %v7362_v41, %v7362_v41  ;;  %v7368_v44 = vpop.f32.mrb[1].mxu0 }
 0x110   : > { %v575_v45 = vsel %vm574_vm1, %v7368_v44, 0.0  ;;  %v644_v46 = vmul.f32 %v7368_v44, %v7368_v44 }
 0x111   : > { %v677_v47 = vsel %vm574_vm1, %v645_v43, 0.0  ;;  %v577_v48 = vadd.f32 %v576_v42, %v575_v45 }
 0x112   : > { %v676_v49 = vsel %vm574_vm1, %v644_v46, 0.0  ;;  %v7376_v50 = vpop.f32.mrb[2].mxu0 }
 0x113   : > { %v678_v51 = vadd.f32 %v677_v47, %v676_v49  ;;  %v7378_v52 = vpop.f32.mrb[3].mxu0  ;;  %v647_v53 = vmul.f32 %v7376_v50, %v7376_v50  ;;  %v580_v57 = vsel %vm574_vm1, %v7376_v50, 0.0 }
 0x114   : > { %v578_v54 = vsel %vm574_vm1, %v7378_v52, 0.0  ;;  %v646_v55 = vmul.f32 %v7378_v52, %v7378_v52 }
 0x115   : > { %v579_v56 = vadd.f32 %v578_v54, %v577_v48  ;;  %v681_v63 = vsel %vm574_vm1, %v647_v53, 0.0 }
 0x116   : > { %v679_v58 = vsel %vm574_vm1, %v646_v55, 0.0  ;;  %v7389_v59 = vpop.f32.mrb[4].mxu0 }
 0x117   : > { %v680_v60 = vadd.f32 %v679_v58, %v678_v51  ;;  %v7391_v61 = vpop.f32.mrb[5].mxu0  ;;  %v581_v62 = vadd.f32 %v580_v57, %v579_v56  ;;  %v649_v0 = vmul.f32 %v7389_v59, %v7389_v59  ;;  %v584_v5 = vsel %vm574_vm1, %v7389_v59, 0.0 }
 0x118   : > { %v582_v1 = vsel %vm574_vm1, %v7391_v61, 0.0  ;;  %v648_v2 = vmul.f32 %v7391_v61, %v7391_v61 }
 0x119   : > { %v583_v3 = vadd.f32 %v582_v1, %v581_v62  ;;  %v682_v4 = vadd.f32 %v681_v63, %v680_v60  ;;  %v685_v11 = vsel %vm574_vm1, %v649_v0, 0.0 }
 0x11a   : > { %v683_v6 = vsel %vm574_vm1, %v648_v2, 0.0  ;;  %v7403_v7 = vpop.f32.mrb[6].mxu0 }
 0x11b   : > { %v684_v8 = vadd.f32 %v683_v6, %v682_v4  ;;  %v7405_v9 = vpop.f32.mrb[7].mxu0  ;;  %v585_v10 = vadd.f32 %v584_v5, %v583_v3  ;;  %v651_v12 = vmul.f32 %v7403_v7, %v7403_v7  ;;  %v588_v17 = vsel %vm574_vm1, %v7403_v7, 0.0 }
 0x11c   : > { %v586_v13 = vsel %vm574_vm1, %v7405_v9, 0.0  ;;  %v650_v14 = vmul.f32 %v7405_v9, %v7405_v9 }
 0x11d   : > { %v587_v15 = vadd.f32 %v586_v13, %v585_v10  ;;  %v686_v16 = vadd.f32 %v685_v11, %v684_v8  ;;  %v689_v23 = vsel %vm574_vm1, %v651_v12, 0.0 }
 0x11e   : > { %v687_v18 = vsel %vm574_vm1, %v650_v14, 0.0  ;;  %v7417_v19 = vpop.f32.mrb[8].mxu0 }
 0x11f   : > { %v688_v20 = vadd.f32 %v687_v18, %v686_v16  ;;  %v7419_v21 = vpop.f32.mrb[9].mxu0  ;;  %v589_v22 = vadd.f32 %v588_v17, %v587_v15  ;;  %v653_v24 = vmul.f32 %v7417_v19, %v7417_v19  ;;  %v592_v29 = vsel %vm574_vm1, %v7417_v19, 0.0 }
 0x120   : > { %v590_v25 = vsel %vm574_vm1, %v7419_v21, 0.0  ;;  %v652_v26 = vmul.f32 %v7419_v21, %v7419_v21 }
 0x121   : > { %v591_v27 = vadd.f32 %v590_v25, %v589_v22  ;;  %v690_v28 = vadd.f32 %v689_v23, %v688_v20  ;;  %v693_v35 = vsel %vm574_vm1, %v653_v24, 0.0 }
 0x122   : > { %v691_v30 = vsel %vm574_vm1, %v652_v26, 0.0  ;;  %v7431_v31 = vpop.f32.mrb[10].mxu0 }
 0x123   : > { %v692_v32 = vadd.f32 %v691_v30, %v690_v28  ;;  %v7433_v33 = vpop.f32.mrb[11].mxu0  ;;  %v593_v34 = vadd.f32 %v592_v29, %v591_v27  ;;  %v655_v36 = vmul.f32 %v7431_v31, %v7431_v31  ;;  %v596_v45 = vsel %vm574_vm1, %v7431_v31, 0.0 }
 0x124   : > { %v594_v37 = vsel %vm574_vm1, %v7433_v33, 0.0  ;;  %v654_v38 = vmul.f32 %v7433_v33, %v7433_v33 }
 0x125   : > { %v595_v42 = vadd.f32 %v594_v37, %v593_v34  ;;  %v694_v43 = vadd.f32 %v693_v35, %v692_v32  ;;  %v697_v53 = vsel %vm574_vm1, %v655_v36, 0.0 }
 0x126   : > { %v695_v46 = vsel %vm574_vm1, %v654_v38, 0.0  ;;  %v7445_v47 = vpop.f32.mrb[12].mxu0 }
 0x127   : > { %v696_v48 = vadd.f32 %v695_v46, %v694_v43  ;;  %v7447_v49 = vpop.f32.mrb[13].mxu0  ;;  %v597_v51 = vadd.f32 %v596_v45, %v595_v42  ;;  %v657_v54 = vmul.f32 %v7445_v47, %v7445_v47  ;;  %v600_v60 = vsel %vm574_vm1, %v7445_v47, 0.0 }
 0x128   : > { %v598_v55 = vsel %vm574_vm1, %v7447_v49, 0.0  ;;  %v656_v56 = vmul.f32 %v7447_v49, %v7447_v49 }
 0x129   : > { %v599_v57 = vadd.f32 %v598_v55, %v597_v51  ;;  %v698_v58 = vadd.f32 %v697_v53, %v696_v48  ;;  %v701_v3 = vsel %vm574_vm1, %v657_v54, 0.0 }
 0x12a   : > { %v699_v62 = vsel %vm574_vm1, %v656_v56, 0.0  ;;  %v7459_v63 = vpop.f32.mrb[14].mxu0 }
 0x12b   : > { %v700_v0 = vadd.f32 %v699_v62, %v698_v58  ;;  %v7461_v1 = vpop.f32.mrb[15].mxu0  ;;  %v601_v2 = vadd.f32 %v600_v60, %v599_v57  ;;  %v659_v4 = vmul.f32 %v7459_v63, %v7459_v63  ;;  %v604_v11 = vsel %vm574_vm1, %v7459_v63, 0.0 }
 0x12c   : > { %v602_v5 = vsel %vm574_vm1, %v7461_v1, 0.0  ;;  %v658_v6 = vmul.f32 %v7461_v1, %v7461_v1 }
 0x12d   : > { %v603_v8 = vadd.f32 %v602_v5, %v601_v2  ;;  %v702_v10 = vadd.f32 %v701_v3, %v700_v0  ;;  %v705_v17 = vsel %vm574_vm1, %v659_v4, 0.0 }
 0x12e   : > { %v703_v12 = vsel %vm574_vm1, %v658_v6, 0.0  ;;  %v7473_v13 = vpop.f32.mrb[16].mxu0 }
 0x12f   : > { %v704_v14 = vadd.f32 %v703_v12, %v702_v10  ;;  %v7475_v15 = vpop.f32.mrb[17].mxu0  ;;  %v605_v16 = vadd.f32 %v604_v11, %v603_v8  ;;  %v661_v18 = vmul.f32 %v7473_v13, %v7473_v13  ;;  %v608_v25 = vsel %vm574_vm1, %v7473_v13, 0.0 }
 0x130   : > { %v606_v20 = vsel %vm574_vm1, %v7475_v15, 0.0  ;;  %v660_v22 = vmul.f32 %v7475_v15, %v7475_v15 }
 0x131   : > { %v607_v23 = vadd.f32 %v606_v20, %v605_v16  ;;  %v706_v24 = vadd.f32 %v705_v17, %v704_v14  ;;  %v709_v32 = vsel %vm574_vm1, %v661_v18, 0.0 }
 0x132   : > { %v707_v26 = vsel %vm574_vm1, %v660_v22, 0.0  ;;  %v7487_v27 = vpop.f32.mrb[18].mxu0 }
 0x133   : > { %v708_v28 = vadd.f32 %v707_v26, %v706_v24  ;;  %v7489_v29 = vpop.f32.mrb[19].mxu0  ;;  %v609_v30 = vadd.f32 %v608_v25, %v607_v23  ;;  %v663_v34 = vmul.f32 %v7487_v27, %v7487_v27  ;;  %v612_v42 = vsel %vm574_vm1, %v7487_v27, 0.0 }
 0x134   : > { %v610_v35 = vsel %vm574_vm1, %v7489_v29, 0.0  ;;  %v662_v36 = vmul.f32 %v7489_v29, %v7489_v29 }
 0x135   : > { %v611_v37 = vadd.f32 %v610_v35, %v609_v30  ;;  %v710_v38 = vadd.f32 %v709_v32, %v708_v28  ;;  %v713_v53 = vsel %vm574_vm1, %v663_v34, 0.0  ;;  %v968_v32 = vld [vmem:[%s9449_s2] sm:$0xf] }
 0x136   : > { %v711_v43 = vsel %vm574_vm1, %v662_v36, 0.0  ;;  %v7501_v45 = vpop.f32.mrb[20].mxu0  ;;  %6235 = vmatprep.subr.msk.mxu0 %vm1099_vm3, %v968_v32 }
 0x137   : > { %v712_v46 = vadd.f32 %v711_v43, %v710_v38  ;;  %v7503_v48 = vpop.f32.mrb[21].mxu0  ;;  %v613_v51 = vadd.f32 %v612_v42, %v611_v37  ;;  %v665_v54 = vmul.f32 %v7501_v45, %v7501_v45  ;;  %v616_v60 = vsel %vm574_vm1, %v7501_v45, 0.0  ;;  %6236 = vmatpush3.msk.msra.mxu0 %vm1099_vm3, %v968_v32 }
 0x138   : > { %v614_v55 = vsel %vm574_vm1, %v7503_v48, 0.0  ;;  %v664_v56 = vmul.f32 %v7503_v48, %v7503_v48 }
 0x139   : > { %v615_v57 = vadd.f32 %v614_v55, %v613_v51  ;;  %v714_v58 = vadd.f32 %v713_v53, %v712_v46  ;;  %v717_v5 = vsel %vm574_vm1, %v665_v54, 0.0 }
 0x13a   : > { %v715_v62 = vsel %vm574_vm1, %v664_v56, 0.0  ;;  %v7515_v0 = vpop.f32.mrb[22].mxu0 }
 0x13b   : > { %v716_v2 = vadd.f32 %v715_v62, %v714_v58  ;;  %v7517_v3 = vpop.f32.mrb[23].mxu0  ;;  %v617_v4 = vadd.f32 %v616_v60, %v615_v57  ;;  %v667_v6 = vmul.f32 %v7515_v0, %v7515_v0  ;;  %v620_v14 = vsel %vm574_vm1, %v7515_v0, 0.0 }
 0x13c   : > { %v618_v8 = vsel %vm574_vm1, %v7517_v3, 0.0  ;;  %v666_v10 = vmul.f32 %v7517_v3, %v7517_v3 }
 0x13d   : > { %v619_v11 = vadd.f32 %v618_v8, %v617_v4  ;;  %v718_v12 = vadd.f32 %v717_v5, %v716_v2  ;;  %v721_v23 = vsel %vm574_vm1, %v667_v6, 0.0 }
 0x13e   : > { %v719_v16 = vsel %vm574_vm1, %v666_v10, 0.0  ;;  %v7529_v17 = vpop.f32.mrb[24].mxu0 }
 0x13f   : > { %v720_v18 = vadd.f32 %v719_v16, %v718_v12  ;;  %v7531_v20 = vpop.f32.mrb[25].mxu0  ;;  %v621_v22 = vadd.f32 %v620_v14, %v619_v11  ;;  %v669_v24 = vmul.f32 %v7529_v17, %v7529_v17  ;;  %v624_v34 = vsel %vm574_vm1, %v7529_v17, 0.0 }
 0x140   : > { %v622_v25 = vsel %vm574_vm1, %v7531_v20, 0.0  ;;  %v668_v26 = vmul.f32 %v7531_v20, %v7531_v20 }
 0x141   : > { %v623_v28 = vadd.f32 %v622_v25, %v621_v22  ;;  %v722_v30 = vadd.f32 %v721_v23, %v720_v18  ;;  %v725_v43 = vsel %vm574_vm1, %v669_v24, 0.0 }
 0x142   : > { %v723_v35 = vsel %vm574_vm1, %v668_v26, 0.0  ;;  %v7546_v36 = vpop.f32.mrb[26].mxu0 }
 0x143   : > { %v724_v37 = vadd.f32 %v723_v35, %v722_v30  ;;  %v7549_v38 = vpop.f32.mrb[27].mxu0  ;;  %v625_v42 = vadd.f32 %v624_v34, %v623_v28  ;;  %v671_v46 = vmul.f32 %v7546_v36, %v7546_v36  ;;  %v628_v56 = vsel %vm574_vm1, %v7546_v36, 0.0 }
 0x144   : > { %v626_v51 = vsel %vm574_vm1, %v7549_v38, 0.0  ;;  %v670_v53 = vmul.f32 %v7549_v38, %v7549_v38 }
 0x145   : > { %v627_v54 = vadd.f32 %v626_v51, %v625_v42  ;;  %v726_v55 = vadd.f32 %v725_v43, %v724_v37  ;;  %v729_v4 = vsel %vm574_vm1, %v671_v46, 0.0 }
 0x146   : > { %v727_v57 = vsel %vm574_vm1, %v670_v53, 0.0  ;;  %v7562_v58 = vpop.f32.mrb[28].mxu0 }
 0x147   : > { %v728_v60 = vadd.f32 %v727_v57, %v726_v55  ;;  %v7564_v62 = vpop.f32.mrb[29].mxu0  ;;  %v629_v2 = vadd.f32 %v628_v56, %v627_v54  ;;  %v673_v5 = vmul.f32 %v7562_v58, %v7562_v58  ;;  %v632_v12 = vsel %vm574_vm1, %v7562_v58, 0.0 }
 0x148   : > { %v630_v6 = vsel %vm574_vm1, %v7564_v62, 0.0  ;;  %v672_v8 = vmul.f32 %v7564_v62, %v7564_v62 }
 0x149   : > { %v631_v10 = vadd.f32 %v630_v6, %v629_v2  ;;  %v730_v11 = vadd.f32 %v729_v4, %v728_v60  ;;  %v733_v24 = vsel %vm574_vm1, %v673_v5, 0.0 }
 0x14a   : > { %v731_v14 = vsel %vm574_vm1, %v672_v8, 0.0  ;;  %v7576_v16 = vpop.f32.mrb[30].mxu0 }
 0x14b   : > { %v732_v18 = vadd.f32 %v731_v14, %v730_v11  ;;  %v7578_v22 = vpop.f32.mrb[31].mxu0  ;;  %v633_v23 = vadd.f32 %v632_v12, %v631_v10  ;;  %v675_v25 = vmul.f32 %v7576_v16, %v7576_v16  ;;  %v636_v34 = vsel %vm574_vm1, %v7576_v16, 0.0 }
 0x14c   : > { %v634_v26 = vsel %vm574_vm1, %v7578_v22, 0.0  ;;  %v674_v28 = vmul.f32 %v7578_v22, %v7578_v22 }
 0x14d   : > { %v635_v30 = vadd.f32 %v634_v26, %v633_v23  ;;  %v734_v32 = vadd.f32 %v733_v24, %v732_v18  ;;  %v737_v43 = vsel %vm574_vm1, %v675_v25, 0.0 }
 0x14e   : > { %v735_v35 = vsel %vm574_vm1, %v674_v28, 0.0 }
 0x14f   : > { %v637_v37 = vadd.f32 %v636_v34, %v635_v30  ;;  %v736_v42 = vadd.f32 %v735_v35, %v734_v32 }
 0x151   : > { %v638_v46 = vrot.slane %v637_v37, 4  ;;  %v738_v51 = vadd.f32 %v737_v43, %v736_v42 }
 0x153   : > { %v639_v53 = vadd.f32 %v638_v46, %v637_v37  ;;  %v739_v54 = vrot.slane %v738_v51, 4 }
 0x155   : > { %v640_v55 = vrot.slane %v639_v53, 2  ;;  %v740_v56 = vadd.f32 %v739_v54, %v738_v51 }
 0x157   : > { %v641_v57 = vadd.f32 %v640_v55, %v639_v53  ;;  %v741_v60 = vrot.slane %v740_v56, 2 }
 0x159   : > { %v642_v2 = vrot.slane %v641_v57, 1  ;;  %v742_v4 = vadd.f32 %v741_v60, %v740_v56 }
 0x15b   : > { %v643_v5 = vadd.f32 %v642_v2, %v641_v57  ;;  %v743_v6 = vrot.slane %v742_v4, 1 }
 0x15d   : > { %v744_v8 = vadd.f32 %v743_v6, %v742_v4  ;;  %v7591_v10 = vmul.f32 0.00390625, %v643_v5 }
 0x15f   : > { %v746_v11 = vmul.f32 0.00390625, %v744_v8  ;;  %v747_v12 = vmul.f32 %v7591_v10, %v7591_v10  ;;  %v780_v14 = vsub.f32 %v7578_v22, %v7591_v10  ;;  %v750_v18 = vsub.f32 %v7368_v44, %v7591_v10 }
 0x160   : > { %v751_v23 = vsub.f32 %v7362_v41, %v7591_v10  ;;  %v752_v24 = vsub.f32 %v7378_v52, %v7591_v10  ;;  %v753_v25 = vsub.f32 %v7376_v50, %v7591_v10  ;;  %v754_v26 = vsub.f32 %v7391_v61, %v7591_v10 }
 0x161   : > { %v748_v28 = vsub.f32 %v746_v11, %v747_v12  ;;  %v755_v30 = vsub.f32 %v7389_v59, %v7591_v10  ;;  %v756_v22 = vsub.f32 %v7405_v9, %v7591_v10  ;;  %v757_v44 = vsub.f32 %v7403_v7, %v7591_v10 }
 0x162   : > { %v758_v41 = vsub.f32 %v7419_v21, %v7591_v10  ;;  %v759_v52 = vsub.f32 %v7417_v19, %v7591_v10  ;;  %v760_v50 = vsub.f32 %v7433_v33, %v7591_v10  ;;  %v761_v61 = vsub.f32 %v7431_v31, %v7591_v10 }
 0x163   : > { %v749_v32 = vmax.f32 %v748_v28, 0.0  ;;  %v762_v59 = vsub.f32 %v7447_v49, %v7591_v10  ;;  %v763_v9 = vsub.f32 %v7445_v47, %v7591_v10  ;;  %v764_v7 = vsub.f32 %v7461_v1, %v7591_v10 }
 0x164   : > { %v765_v21 = vsub.f32 %v7459_v63, %v7591_v10  ;;  %v766_v19 = vsub.f32 %v7475_v15, %v7591_v10  ;;  %v767_v33 = vsub.f32 %v7473_v13, %v7591_v10  ;;  %v768_v31 = vsub.f32 %v7489_v29, %v7591_v10 }
 0x165   : > { %v782_v34 = vadd.f32 1e-05, %v749_v32  ;;  %v769_v49 = vsub.f32 %v7487_v27, %v7591_v10  ;;  %v770_v47 = vsub.f32 %v7503_v48, %v7591_v10  ;;  %v771_v1 = vsub.f32 %v7501_v45, %v7591_v10 }
 0x166   : > { %v772_v63 = vsub.f32 %v7517_v3, %v7591_v10  ;;  %v773_v15 = vsub.f32 %v7515_v0, %v7591_v10  ;;  %v774_v13 = vsub.f32 %v7531_v20, %v7591_v10  ;;  %v775_v29 = vsub.f32 %v7529_v17, %v7591_v10 }
 0x167   : > { %6989 = vrsqrt.f32 %v782_v34  ;;  %v776_v27 = vsub.f32 %v7549_v38, %v7591_v10  ;;  %v777_v48 = vsub.f32 %v7546_v36, %v7591_v10  ;;  %v778_v45 = vsub.f32 %v7564_v62, %v7591_v10 }
 0x168   : > { %v779_v3 = vsub.f32 %v7562_v58, %v7591_v10  ;;  %v781_v0 = vsub.f32 %v7576_v16, %v7591_v10 }
 0x171   : > { %v6990_v20 = vpop.eup %6989 }
 0x172   : > { %v814_v35 = vmul.f32 %v6990_v20, %v780_v14  ;;  %v784_v37 = vmul.f32 %v6990_v20, %v750_v18  ;;  %v785_v17 = vmul.f32 %v6990_v20, %v751_v23  ;;  %v786_v42 = vmul.f32 %v6990_v20, %v752_v24 }
 0x173   : > { %v787_v43 = vmul.f32 %v6990_v20, %v753_v25  ;;  %v788_v46 = vmul.f32 %v6990_v20, %v754_v26  ;;  %v789_v38 = vmul.f32 %v6990_v20, %v755_v30  ;;  %v790_v51 = vmul.f32 %v6990_v20, %v756_v22 }
 0x174   : > { %v846_v53 = vmax.f32 %v814_v35, 0.0  ;;  %v791_v36 = vmul.f32 %v6990_v20, %v757_v44  ;;  %v792_v54 = vmul.f32 %v6990_v20, %v758_v41  ;;  %v793_v55 = vmul.f32 %v6990_v20, %v759_v52 }
 0x175   : > { %v794_v62 = vmul.f32 %v6990_v20, %v760_v50  ;;  %v795_v56 = vmul.f32 %v6990_v20, %v761_v61  ;;  %v796_v57 = vmul.f32 %v6990_v20, %v762_v59  ;;  %v797_v58 = vmul.f32 %v6990_v20, %v763_v9 }
 0x176   : > { %934 = vst.msk [vmem:[#allocation2 + $0x181] sm:$0xff] %vm574_vm1, %v846_v53  ;;  %v798_v16 = vmul.f32 %v6990_v20, %v764_v7  ;;  %v799_v60 = vmul.f32 %v6990_v20, %v765_v21  ;;  %v800_v2 = vmul.f32 %v6990_v20, %v766_v19  ;;  %v801_v4 = vmul.f32 %v6990_v20, %v767_v33  ;;  %v7755_v53 = vld [vmem:[%s9449_s2 + $0x14] sm:$0xf] }
 0x177   : > { %v802_v5 = vmul.f32 %v6990_v20, %v768_v31  ;;  %v7660_v6 = vmul.f32 %v6990_v20, %v769_v49  ;;  %v7662_v8 = vmul.f32 %v6990_v20, %v770_v47  ;;  %v7664_v10 = vmul.f32 %v6990_v20, %v771_v1 }
 0x178   : > { %v7666_v11 = vmul.f32 %v6990_v20, %v772_v63  ;;  %v7668_v12 = vmul.f32 %v6990_v20, %v773_v15  ;;  %v7670_v14 = vmul.f32 %v6990_v20, %v774_v13  ;;  %v7672_v18 = vmul.f32 %v6990_v20, %v775_v29 }
 0x179   : > { %v7674_v23 = vmul.f32 %v6990_v20, %v776_v27  ;;  %v7676_v24 = vmul.f32 %v6990_v20, %v777_v48  ;;  %v7678_v25 = vmul.f32 %v6990_v20, %v778_v45  ;;  %v7680_v26 = vmul.f32 %v6990_v20, %v779_v3 }
 0x17a   : > { %v7682_v28 = vmul.f32 %v6990_v20, %v781_v0  ;;  %v816_v30 = vmax.f32 %v784_v37, 0.0  ;;  %v817_v22 = vmax.f32 %v785_v17, 0.0  ;;  %v818_v44 = vmax.f32 %v786_v42, 0.0  ;;  %v7722_v17 = vld [vmem:[%s9449_s2 + $0x8] sm:$0xf] }
 0x17b   : > { %v819_v41 = vmax.f32 %v787_v43, 0.0  ;;  %v820_v52 = vmax.f32 %v788_v46, 0.0  ;;  %v821_v50 = vmax.f32 %v789_v38, 0.0  ;;  %v822_v61 = vmax.f32 %v790_v51, 0.0  ;;  %6285 = vmatprep.subr.msk.mxu0 %vm1099_vm3, %v7722_v17 }
 0x17c   : > { %v823_v32 = vmax.f32 %v791_v36, 0.0  ;;  %v824_v59 = vmax.f32 %v792_v54, 0.0  ;;  %v825_v9 = vmax.f32 %v793_v55, 0.0  ;;  %v826_v7 = vmax.f32 %v794_v62, 0.0  ;;  %904 = vst.msk [vmem:[#allocation2 + $0x19] sm:$0xff] %vm574_vm1, %v816_v30  ;;  %905 = vst.msk [vmem:[#allocation2 + $0x21] sm:$0xff] %vm574_vm1, %v817_v22 }
 0x17d   : > { %906 = vst.msk [vmem:[#allocation2 + $0x31] sm:$0xff] %vm574_vm1, %v818_v44  ;;  %v827_v21 = vmax.f32 %v795_v56, 0.0  ;;  %v828_v19 = vmax.f32 %v796_v57, 0.0  ;;  %v829_v33 = vmax.f32 %v797_v58, 0.0  ;;  %v830_v31 = vmax.f32 %v798_v16, 0.0  ;;  %907 = vst.msk [vmem:[#allocation2 + $0x39] sm:$0xff] %vm574_vm1, %v819_v41 }
 0x17e   : > { %908 = vst.msk [vmem:[#allocation2 + $0x49] sm:$0xff] %vm574_vm1, %v820_v52  ;;  %909 = vst.msk [vmem:[#allocation2 + $0x51] sm:$0xff] %vm574_vm1, %v821_v50  ;;  %v831_v34 = vmax.f32 %v799_v60, 0.0  ;;  %v832_v49 = vmax.f32 %v800_v2, 0.0  ;;  %v833_v47 = vmax.f32 %v801_v4, 0.0  ;;  %v834_v1 = vmax.f32 %v802_v5, 0.0 }
 0x17f   : > { %910 = vst.msk [vmem:[#allocation2 + $0x61] sm:$0xff] %vm574_vm1, %v822_v61  ;;  %911 = vst.msk [vmem:[#allocation2 + $0x69] sm:$0xff] %vm574_vm1, %v823_v32  ;;  %v835_v63 = vmax.f32 %v7660_v6, 0.0  ;;  %v836_v15 = vmax.f32 %v7662_v8, 0.0  ;;  %v837_v13 = vmax.f32 %v7664_v10, 0.0  ;;  %v838_v29 = vmax.f32 %v7666_v11, 0.0 }
 0x180   : > { %912 = vst.msk [vmem:[#allocation2 + $0x79] sm:$0xff] %vm574_vm1, %v824_v59  ;;  %913 = vst.msk [vmem:[#allocation2 + $0x81] sm:$0xff] %vm574_vm1, %v825_v9  ;;  %v839_v27 = vmax.f32 %v7668_v12, 0.0  ;;  %v840_v48 = vmax.f32 %v7670_v14, 0.0  ;;  %v841_v45 = vmax.f32 %v7672_v18, 0.0  ;;  %v842_v3 = vmax.f32 %v7674_v23, 0.0 }
 0x181   : > { %914 = vst.msk [vmem:[#allocation2 + $0x91] sm:$0xff] %vm574_vm1, %v826_v7  ;;  %915 = vst.msk [vmem:[#allocation2 + $0x99] sm:$0xff] %vm574_vm1, %v827_v21  ;;  %v843_v0 = vmax.f32 %v7676_v24, 0.0  ;;  %v844_v20 = vmax.f32 %v7678_v25, 0.0  ;;  %v845_v35 = vmax.f32 %v7680_v26, 0.0  ;;  %v847_v37 = vmax.f32 %v7682_v28, 0.0 }
 0x182   : > { %916 = vst.msk [vmem:[#allocation2 + $0xa9] sm:$0xff] %vm574_vm1, %v828_v19  ;;  %917 = vst.msk [vmem:[#allocation2 + $0xb1] sm:$0xff] %vm574_vm1, %v829_v33  ;;  %v7875_v41 = vld [vmem:[#allocation2 + $0x180] sm:$0xff]  ;;  %v7904_v9 = vld [vmem:[%s9449_s2 + $0x18] sm:$0xf] }
 0x183   : > { %918 = vst.msk [vmem:[#allocation2 + $0xc1] sm:$0xff] %vm574_vm1, %v830_v31  ;;  %919 = vst.msk [vmem:[#allocation2 + $0xc9] sm:$0xff] %vm574_vm1, %v831_v34  ;;  %v7734_v42 = vld [vmem:[#allocation2 + $0x19] sm:$0xff]  ;;  %v7736_v43 = vld [vmem:[#allocation2 + $0x21] sm:$0xff] }
 0x184   : > { %920 = vst.msk [vmem:[#allocation2 + $0xd9] sm:$0xff] %vm574_vm1, %v832_v49  ;;  %921 = vst.msk [vmem:[#allocation2 + $0xe1] sm:$0xff] %vm574_vm1, %v833_v47  ;;  %6190 = vmatprep.mubr.msk.f32.mxu0 %vm574_vm1, %v7734_v42  ;;  %v7742_v46 = vld [vmem:[#allocation2 + $0x31] sm:$0xff]  ;;  %v7765_v54 = vld [vmem:[#allocation2 + $0x39] sm:$0xff] }
 0x185   : > { %922 = vst.msk [vmem:[#allocation2 + $0xf1] sm:$0xff] %vm574_vm1, %v834_v1  ;;  %923 = vst.msk [vmem:[#allocation2 + $0xf9] sm:$0xff] %vm574_vm1, %v835_v63  ;;  %6191 = vmatmul.mubr.msk.f32.gmra.mrb[34].mxu0 %vm574_vm1, %v7736_v43  ;;  %v7769_v55 = vld [vmem:[#allocation2 + $0x49] sm:$0xff]  ;;  %v7783_v56 = vld [vmem:[#allocation2 + $0x51] sm:$0xff] }
 0x186   : > { %924 = vst.msk [vmem:[#allocation2 + $0x109] sm:$0xff] %vm574_vm1, %v836_v15  ;;  %925 = vst.msk [vmem:[#allocation2 + $0x111] sm:$0xff] %vm574_vm1, %v837_v13  ;;  %6193 = vmatprep.mubr.msk.f32.mxu0 %vm574_vm1, %v7742_v46  ;;  %v7787_v57 = vld [vmem:[#allocation2 + $0x61] sm:$0xff]  ;;  %v7799_v60 = vld [vmem:[#allocation2 + $0x69] sm:$0xff] }
 0x187   : > { %926 = vst.msk [vmem:[#allocation2 + $0x121] sm:$0xff] %vm574_vm1, %v838_v29  ;;  %927 = vst.msk [vmem:[#allocation2 + $0x129] sm:$0xff] %vm574_vm1, %v839_v27  ;;  %v7803_v2 = vld [vmem:[#allocation2 + $0x79] sm:$0xff]  ;;  %v7815_v6 = vld [vmem:[#allocation2 + $0x81] sm:$0xff] }
 0x188   : > { %928 = vst.msk [vmem:[#allocation2 + $0x139] sm:$0xff] %vm574_vm1, %v840_v48  ;;  %929 = vst.msk [vmem:[#allocation2 + $0x141] sm:$0xff] %vm574_vm1, %v841_v45  ;;  %v7819_v8 = vld [vmem:[#allocation2 + $0x91] sm:$0xff]  ;;  %v7831_v12 = vld [vmem:[#allocation2 + $0x99] sm:$0xff] }
 0x189   : > { %930 = vst.msk [vmem:[#allocation2 + $0x151] sm:$0xff] %vm574_vm1, %v842_v3  ;;  %931 = vst.msk [vmem:[#allocation2 + $0x159] sm:$0xff] %vm574_vm1, %v843_v0  ;;  %6194 = vmatmul.mubr.msk.f32.gmra.mrb[36].mxu0 %vm574_vm1, %v7765_v54  ;;  %v7835_v14 = vld [vmem:[#allocation2 + $0xa9] sm:$0xff]  ;;  %v7847_v24 = vld [vmem:[#allocation2 + $0xb1] sm:$0xff] }
 0x18a   : > { %932 = vst.msk [vmem:[#allocation2 + $0x169] sm:$0xff] %vm574_vm1, %v844_v20  ;;  %933 = vst.msk [vmem:[#allocation2 + $0x171] sm:$0xff] %vm574_vm1, %v845_v35  ;;  %v7744_v38 = vld [vmem:[#allocation2 + $0xc0] sm:$0xff]  ;;  %v7750_v51 = vld [vmem:[#allocation2 + $0xc8] sm:$0xff]  ;;  %6196 = vmatprep.mubr.msk.f32.mxu0 %vm574_vm1, %v7769_v55 }
 0x18b   : > { %935 = vst.msk [vmem:[#allocation2 + $0x189] sm:$0xff] %vm574_vm1, %v847_v37  ;;  %6358 = vmatprep.mubr.msk.f32.mxu1 %vm574_vm1, %v7744_v38  ;;  %v7759_v36 = vld [vmem:[#allocation2 + $0xd8] sm:$0xff]  ;;  %v7773_v62 = vld [vmem:[#allocation2 + $0xe0] sm:$0xff]  ;;  %v7863_v30 = vld [vmem:[#allocation2 + $0xc9] sm:$0xff] }
 0x18c   : > { %6359 = vmatmul.mubr.msk.f32.vlgmr.msra.gmra.mrb[0].mxu1 %vm574_vm1, %v7750_v51  ;;  %v7789_v58 = vld [vmem:[#allocation2 + $0xf8] sm:$0xff]  ;;  %v7851_v25 = vld [vmem:[#allocation2 + $0xc1] sm:$0xff]  ;;  %v7988_v27 = vld [vmem:[#allocation2 + $0x30] sm:$0xff] }
 0x18d   : > { %6386 = vmatpush3.msk.msra.mxu1 %vm1099_vm3, %v7358_v40  ;;  %6361 = vmatprep.mubr.msk.f32.mxu1 %vm574_vm1, %v7759_v36  ;;  %v7779_v40 = vld [vmem:[#allocation2 + $0xf0] sm:$0xff]  ;;  %v7795_v16 = vld [vmem:[#allocation2 + $0x108] sm:$0xff]  ;;  %v7867_v22 = vld [vmem:[#allocation2 + $0xd9] sm:$0xff] }
 0x18e   : > { %6435 = vmatprep.subr.msk.mxu1 %vm1099_vm3, %v7755_v53  ;;  %6197 = vmatmul.mubr.msk.f32.gmra.mrb[38].mxu0 %vm574_vm1, %v7783_v56  ;;  %v7805_v4 = vld [vmem:[#allocation2 + $0x110] sm:$0xff]  ;;  %v7811_v5 = vld [vmem:[#allocation2 + $0x120] sm:$0xff]  ;;  %v7821_v10 = vld [vmem:[#allocation2 + $0x128] sm:$0xff]  ;;  %9485 = vst [vmem:[#allocation6_spill] sm:$0xff] %v7867_v22 }
 0x18f   : > { %6199 = vmatprep.mubr.msk.f32.mxu0 %vm574_vm1, %v7787_v57  ;;  %v7827_v11 = vld [vmem:[#allocation2 + $0x138] sm:$0xff]  ;;  %v7837_v18 = vld [vmem:[#allocation2 + $0x140] sm:$0xff]  ;;  %v7897_v59 = vld [vmem:[#allocation2 + $0x109] sm:$0xff] }
 0x190   : > { %6362 = vmatmul.mubr.msk.f32.gmra.mrb[2].mxu1 %vm574_vm1, %v7773_v62  ;;  %v7843_v23 = vld [vmem:[#allocation2 + $0x150] sm:$0xff]  ;;  %v7853_v26 = vld [vmem:[#allocation2 + $0x158] sm:$0xff]  ;;  %v7879_v52 = vld [vmem:[#allocation2 + $0xe1] sm:$0xff]  ;;  %9489 = vst [vmem:[#allocation10_spill] sm:$0xff] %v7897_v59 }
 0x191   : > { %6364 = vmatprep.mubr.msk.f32.mxu1 %vm574_vm1, %v7779_v40  ;;  %v7859_v28 = vld [vmem:[#allocation2 + $0x168] sm:$0xff]  ;;  %v7869_v44 = vld [vmem:[#allocation2 + $0x170] sm:$0xff]  ;;  %9486 = vst [vmem:[#allocation7_spill] sm:$0xff] %v7879_v52  ;;  %v7893_v32 = vld [vmem:[#allocation2 + $0xf9] sm:$0xff] }
 0x192   : > { %6200 = vmatmul.mubr.msk.f32.gmra.mrb[40].mxu0 %vm574_vm1, %v7799_v60  ;;  %v7883_v50 = vld [vmem:[#allocation2 + $0xf1] sm:$0xff]  ;;  %v7885_v61 = vld [vmem:[#allocation2 + $0x188] sm:$0xff]  ;;  %9488 = vst [vmem:[#allocation9_spill] sm:$0xff] %v7893_v32  ;;  %v7930_v33 = vld [vmem:[#allocation2 + $0x139] sm:$0xff] }
 0x193   : > { %6202 = vmatprep.mubr.msk.f32.mxu0 %vm574_vm1, %v7803_v2  ;;  %9487 = vst [vmem:[#allocation8_spill] sm:$0xff] %v7883_v50  ;;  %v7912_v7 = vld [vmem:[#allocation2 + $0x111] sm:$0xff]  ;;  %v7916_v21 = vld [vmem:[#allocation2 + $0x121] sm:$0xff]  ;;  %v7926_v19 = vld [vmem:[#allocation2 + $0x129] sm:$0xff] }
 0x194   : > { %6365 = vmatmul.mubr.msk.f32.gmra.mrb[4].mxu1 %vm574_vm1, %v7789_v58  ;;  %9490 = vst [vmem:[#allocation11_spill] sm:$0xff] %v7912_v7  ;;  %9491 = vst [vmem:[#allocation12_spill] sm:$0xff] %v7916_v21  ;;  %v7938_v31 = vld [vmem:[#allocation2 + $0x141] sm:$0xff]  ;;  %v7942_v34 = vld [vmem:[#allocation2 + $0x151] sm:$0xff] }
 0x195   : > { %6367 = vmatprep.mubr.msk.f32.mxu1 %vm574_vm1, %v7795_v16  ;;  %9492 = vst [vmem:[#allocation13_spill] sm:$0xff] %v7926_v19  ;;  %9493 = vst [vmem:[#allocation14_spill] sm:$0xff] %v7930_v33  ;;  %v7950_v49 = vld [vmem:[#allocation2 + $0x159] sm:$0xff]  ;;  %v7954_v47 = vld [vmem:[#allocation2 + $0x169] sm:$0xff] }
 0x196   : > { %6203 = vmatmul.mubr.msk.f32.gmra.mrb[42].mxu0 %vm574_vm1, %v7815_v6  ;;  %9494 = vst [vmem:[#allocation15_spill] sm:$0xff] %v7938_v31  ;;  %9495 = vst [vmem:[#allocation16_spill] sm:$0xff] %v7942_v34  ;;  %v936_v1 = vld [vmem:[#allocation2] sm:$0xff]  ;;  %v7962_v63 = vld [vmem:[#allocation2 + $0x171] sm:$0xff] }
 0x197   : > { %6205 = vmatprep.mubr.msk.f32.mxu0 %vm574_vm1, %v7819_v8  ;;  %9496 = vst [vmem:[#allocation17_spill] sm:$0xff] %v7950_v49  ;;  %9497 = vst [vmem:[#allocation18_spill] sm:$0xff] %v7954_v47  ;;  %v937_v15 = vld [vmem:[#allocation2 + $0x8] sm:$0xff]  ;;  %v7972_v13 = vld [vmem:[#allocation2 + $0x18] sm:$0xff] }
 0x198   : > { %6368 = vmatmul.mubr.msk.f32.gmra.mrb[6].mxu1 %vm574_vm1, %v7805_v4  ;;  %9498 = vst [vmem:[#allocation19_spill] sm:$0xff] %v7962_v63  ;;  %v7984_v29 = vld [vmem:[#allocation2 + $0x20] sm:$0xff]  ;;  %v8000_v48 = vld [vmem:[#allocation2 + $0x48] sm:$0xff]  ;;  %v8008_v45 = vld [vmem:[#allocation2 + $0x50] sm:$0xff] }
 0x199   : > { %6370 = vmatprep.mubr.msk.f32.mxu1 %vm574_vm1, %v7811_v5  ;;  %v8012_v3 = vld [vmem:[#allocation2 + $0x60] sm:$0xff]  ;;  %v8020_v0 = vld [vmem:[#allocation2 + $0x68] sm:$0xff]  ;;  %v8024_v20 = vld [vmem:[#allocation2 + $0x78] sm:$0xff] }
 0x19a   : > { %6206 = vmatmul.mubr.msk.f32.gmra.mrb[44].mxu0 %vm574_vm1, %v7831_v12  ;;  %v8032_v35 = vld [vmem:[#allocation2 + $0x80] sm:$0xff]  ;;  %v8036_v37 = vld [vmem:[#allocation2 + $0x90] sm:$0xff] }
 0x19b   : > { %6208 = vmatprep.mubr.msk.f32.mxu0 %vm574_vm1, %v7835_v14 }
 0x19c   : > { %6371 = vmatmul.mubr.msk.f32.gmra.mrb[8].mxu1 %vm574_vm1, %v7821_v10 }
 0x19d   : > { %6373 = vmatprep.mubr.msk.f32.mxu1 %vm574_vm1, %v7827_v11 }
 0x19e   : > { %6209 = vmatmul.mubr.msk.f32.gmra.mrb[46].mxu0 %vm574_vm1, %v7847_v24 }
 0x19f   : > { %6211 = vmatprep.mubr.msk.f32.mxu0 %vm574_vm1, %v7851_v25 }
 0x1a0   : > { %6374 = vmatmul.mubr.msk.f32.gmra.mrb[10].mxu1 %vm574_vm1, %v7837_v18 }
 0x1a1   : > { %6376 = vmatprep.mubr.msk.f32.mxu1 %vm574_vm1, %v7843_v23 }
 0x1a2   : > { %6212 = vmatmul.mubr.msk.f32.gmra.mrb[48].mxu0 %vm574_vm1, %v7863_v30 }
 0x1a3   : > { %6214 = vmatprep.mubr.msk.f32.mxu0 %vm574_vm1, %v7867_v22 }
 0x1a4   : > { %6377 = vmatmul.mubr.msk.f32.gmra.mrb[12].mxu1 %vm574_vm1, %v7853_v26 }
 0x1a5   : > { %6379 = vmatprep.mubr.msk.f32.mxu1 %vm574_vm1, %v7859_v28 }
 0x1a6   : > { %6215 = vmatmul.mubr.msk.f32.gmra.mrb[50].mxu0 %vm574_vm1, %v7879_v52 }
 0x1a7   : > { %6217 = vmatprep.mubr.msk.f32.mxu0 %vm574_vm1, %v7883_v50 }
 0x1a8   : > { %6380 = vmatmul.mubr.msk.f32.gmra.mrb[14].mxu1 %vm574_vm1, %v7869_v44 }
 0x1a9   : > { %6382 = vmatprep.mubr.msk.f32.mxu1 %vm574_vm1, %v7875_v41 }
 0x1aa   : > { %6218 = vmatmul.mubr.msk.f32.gmra.mrb[52].mxu0 %vm574_vm1, %v7893_v32 }
 0x1ab   : > { %6220 = vmatprep.mubr.msk.f32.mxu0 %vm574_vm1, %v7897_v59 }
 0x1ac   : > { %6383 = vmatmul.mubr.msk.f32.gmra.mrb[16].mxu1 %vm574_vm1, %v7885_v61 }
 0x1ad   : > { %6387 = vmatprep.mubr.msk.f32.mxu1 %vm574_vm1, %v7734_v42  ;;  %v8048_v42 = vld [vmem:[#allocation2 + $0xa8] sm:$0xff] }
 0x1ae   : > { %6221 = vmatmul.mubr.msk.f32.gmra.mrb[54].mxu0 %vm574_vm1, %v7912_v7 }
 0x1af   : > { %6223 = vmatprep.mubr.msk.f32.mxu0 %vm574_vm1, %v7916_v21 }
 0x1b0   : > { %6388 = vmatmul.mubr.msk.f32.vlgmr.msra.gmra.mrb[18].mxu1 %vm574_vm1, %v7736_v43  ;;  %v8056_v43 = vld [vmem:[#allocation2 + $0xb0] sm:$0xff] }
 0x1b1   : > { %6436 = vmatpush3.msk.msra.mxu1 %vm1099_vm3, %v7755_v53  ;;  %6390 = vmatprep.mubr.msk.f32.mxu1 %vm574_vm1, %v7742_v46  ;;  %v8072_v53 = vld [vmem:[#allocation2 + $0x181] sm:$0xff] }
 0x1b2   : > { %6485 = vmatprep.subr.msk.mxu1 %vm1099_vm3, %v7904_v9  ;;  %6224 = vmatmul.mubr.msk.f32.gmra.mrb[56].mxu0 %vm574_vm1, %v7926_v19  ;;  %9499 = vst [vmem:[#allocation20_spill] sm:$0xff] %v8072_v53 }
 0x1b3   : > { %6226 = vmatprep.mubr.msk.f32.mxu0 %vm574_vm1, %v7930_v33 }
 0x1b4   : > { %6391 = vmatmul.mubr.msk.f32.gmra.mrb[20].mxu1 %vm574_vm1, %v7765_v54 }
 0x1b5   : > { %6393 = vmatprep.mubr.msk.f32.mxu1 %vm574_vm1, %v7769_v55 }
 0x1b6   : > { %6227 = vmatmul.mubr.msk.f32.gmra.mrb[58].mxu0 %vm574_vm1, %v7938_v31 }
 0x1b7   : > { %6229 = vmatprep.mubr.msk.f32.mxu0 %vm574_vm1, %v7942_v34 }
 0x1b8   : > { %6394 = vmatmul.mubr.msk.f32.gmra.mrb[22].mxu1 %vm574_vm1, %v7783_v56 }
 0x1b9   : > { %6396 = vmatprep.mubr.msk.f32.mxu1 %vm574_vm1, %v7787_v57 }
 0x1ba   : > { %6230 = vmatmul.mubr.msk.f32.gmra.mrb[60].mxu0 %vm574_vm1, %v7950_v49 }
 0x1bb   : > { %6232 = vmatprep.mubr.msk.f32.mxu0 %vm574_vm1, %v7954_v47 }
 0x1bc   : > { %6397 = vmatmul.mubr.msk.f32.gmra.mrb[24].mxu1 %vm574_vm1, %v7799_v60 }
 0x1bd   : > { %6399 = vmatprep.mubr.msk.f32.mxu1 %vm574_vm1, %v7803_v2 }
 0x1be   : > { %6233 = vmatmul.mubr.msk.f32.gmra.mrb[62].mxu0 %vm574_vm1, %v7962_v63 }
 0x1bf   : > { %6237 = vmatprep.mubr.msk.f32.mxu0 %vm574_vm1, %v936_v1  ;;  %v8078_v1 = vld [vmem:[#allocation2 + $0x189] sm:$0xff] }
 0x1c0   : > { %6400 = vmatmul.mubr.msk.f32.gmra.mrb[26].mxu1 %vm574_vm1, %v7815_v6  ;;  %9500 = vst [vmem:[#allocation21_spill] sm:$0xff] %v8078_v1 }
 0x1c1   : > { %6402 = vmatprep.mubr.msk.f32.mxu1 %vm574_vm1, %v7819_v8 }
 0x1c2   : > { %6238 = vmatmul.mubr.msk.f32.vlgmr.msra.gmra.mrb[32].mxu0 %vm574_vm1, %v937_v15  ;;  %v2822_v15 = vld [vmem:[#allocation2 + $0x1a] sm:$0xff] }
 0x1c3   : > { %6240 = vmatprep.mubr.msk.f32.mxu0 %vm574_vm1, %v7972_v13  ;;  %6286 = vmatpush3.msk.msra.mxu0 %vm1099_vm3, %v7722_v17  ;;  %v8044_v17 = vld [vmem:[#allocation2 + $0x98] sm:$0xff] }
 0x1c4   : > { %6403 = vmatmul.mubr.msk.f32.gmra.mrb[28].mxu1 %vm574_vm1, %v7831_v12  ;;  %6335 = vmatprep.subr.msk.mxu0 %vm1099_vm3, %v7347_v39  ;;  %v7996_v39 = vld [vmem:[#allocation2 + $0x38] sm:$0xff] }
 0x1c5   : > { %6405 = vmatprep.mubr.msk.f32.mxu1 %vm574_vm1, %v7835_v14 }
 0x1c6   : > { %6241 = vmatmul.mubr.msk.f32.gmra.mrb[34].mxu0 %vm574_vm1, %v7984_v29 }
 0x1c7   : > { %6243 = vmatprep.mubr.msk.f32.mxu0 %vm574_vm1, %v7988_v27 }
 0x1c8   : > { %6406 = vmatmul.mubr.msk.f32.gmra.mrb[30].mxu1 %vm574_vm1, %v7847_v24 }
 0x1c9   : > { %6408 = vmatprep.mubr.msk.f32.mxu1 %vm574_vm1, %v7851_v25 }
 0x1ca   : > { %6244 = vmatmul.mubr.msk.f32.gmra.mrb[36].mxu0 %vm574_vm1, %v7996_v39 }
 0x1cb   : > { %6246 = vmatprep.mubr.msk.f32.mxu0 %vm574_vm1, %v8000_v48 }
 0x1cc   : > { %6409 = vmatmul.mubr.msk.f32.gmra.mrb[0].mxu1 %vm574_vm1, %v7863_v30 }
 0x1cd   : > { %6411 = vmatprep.mubr.msk.f32.mxu1 %vm574_vm1, %v7867_v22  ;;  %v6995_v22 = vld [vmem:[%s9449_s2 + $0xc] sm:$0xf] }
 0x1ce   : > { %6247 = vmatmul.mubr.msk.f32.gmra.mrb[38].mxu0 %vm574_vm1, %v8008_v45 }
 0x1cf   : > { %6249 = vmatprep.mubr.msk.f32.mxu0 %vm574_vm1, %v8012_v3 }
 0x1d0   : > { %6412 = vmatmul.mubr.msk.f32.gmra.mrb[2].mxu1 %vm574_vm1, %v7879_v52  ;;  %v8163_v52 = vld [vmem:[#allocation2 + $0xb2] sm:$0xff] }
 0x1d1   : > { %6414 = vmatprep.mubr.msk.f32.mxu1 %vm574_vm1, %v7883_v50  ;;  %v8158_v50 = vld [vmem:[#allocation2 + $0xaa] sm:$0xff]  ;;  %9512 = vst [vmem:[#allocation33_spill] sm:$0xff] %v8163_v52 }
 0x1d2   : > { %6250 = vmatmul.mubr.msk.f32.gmra.mrb[40].mxu0 %vm574_vm1, %v8020_v0  ;;  %9511 = vst [vmem:[#allocation32_spill] sm:$0xff] %v8158_v50 }
 0x1d3   : > { %6252 = vmatprep.mubr.msk.f32.mxu0 %vm574_vm1, %v8024_v20 }
 0x1d4   : > { %6415 = vmatmul.mubr.msk.f32.gmra.mrb[4].mxu1 %vm574_vm1, %v7893_v32  ;;  %v1653_v32 = vld [vmem:[#allocation2 + $0xa] sm:$0xff] }
 0x1d5   : > { %6417 = vmatprep.mubr.msk.f32.mxu1 %vm574_vm1, %v7897_v59  ;;  %v8153_v59 = vld [vmem:[#allocation2 + $0x9a] sm:$0xff] }
 0x1d6   : > { %6253 = vmatmul.mubr.msk.f32.gmra.mrb[42].mxu0 %vm574_vm1, %v8032_v35  ;;  %9510 = vst [vmem:[#allocation31_spill] sm:$0xff] %v8153_v59 }
 0x1d7   : > { %6255 = vmatprep.mubr.msk.f32.mxu0 %vm574_vm1, %v8036_v37 }
 0x1d8   : > { %6418 = vmatmul.mubr.msk.f32.gmra.mrb[6].mxu1 %vm574_vm1, %v7912_v7  ;;  %v1652_v7 = vld [vmem:[#allocation2 + $0x2] sm:$0xff] }
 0x1d9   : > { %6420 = vmatprep.mubr.msk.f32.mxu1 %vm574_vm1, %v7916_v21  ;;  %v8147_v21 = vld [vmem:[#allocation2 + $0x92] sm:$0xff] }
 0x1da   : > { %6256 = vmatmul.mubr.msk.f32.gmra.mrb[44].mxu0 %vm574_vm1, %v8044_v17  ;;  %9509 = vst [vmem:[#allocation30_spill] sm:$0xff] %v8147_v21 }
 0x1db   : > { %6258 = vmatprep.mubr.msk.f32.mxu0 %vm574_vm1, %v8048_v42 }
 0x1dc   : > { %6421 = vmatmul.mubr.msk.f32.gmra.mrb[8].mxu1 %vm574_vm1, %v7926_v19  ;;  %v8141_v19 = vld [vmem:[#allocation2 + $0x82] sm:$0xff] }
 0x1dd   : > { %6423 = vmatprep.mubr.msk.f32.mxu1 %vm574_vm1, %v7930_v33  ;;  %v8135_v33 = vld [vmem:[#allocation2 + $0x7a] sm:$0xff]  ;;  %9508 = vst [vmem:[#allocation29_spill] sm:$0xff] %v8141_v19 }
 0x1de   : > { %6259 = vmatmul.mubr.msk.f32.gmra.mrb[46].mxu0 %vm574_vm1, %v8056_v43  ;;  %9507 = vst [vmem:[#allocation28_spill] sm:$0xff] %v8135_v33 }
 0x1df   : > { %6261 = vmatprep.mubr.msk.f32.mxu0 %vm574_vm1, %v7744_v38 }
 0x1e0   : > { %6424 = vmatmul.mubr.msk.f32.gmra.mrb[10].mxu1 %vm574_vm1, %v7938_v31  ;;  %v8129_v31 = vld [vmem:[#allocation2 + $0x6a] sm:$0xff] }
 0x1e1   : > { %6426 = vmatprep.mubr.msk.f32.mxu1 %vm574_vm1, %v7942_v34  ;;  %v8123_v34 = vld [vmem:[#allocation2 + $0x62] sm:$0xff]  ;;  %9506 = vst [vmem:[#allocation27_spill] sm:$0xff] %v8129_v31 }
 0x1e2   : > { %6262 = vmatmul.mubr.msk.f32.gmra.mrb[48].mxu0 %vm574_vm1, %v7750_v51  ;;  %9505 = vst [vmem:[#allocation26_spill] sm:$0xff] %v8123_v34 }
 0x1e3   : > { %6264 = vmatprep.mubr.msk.f32.mxu0 %vm574_vm1, %v7759_v36 }
 0x1e4   : > { %6427 = vmatmul.mubr.msk.f32.gmra.mrb[12].mxu1 %vm574_vm1, %v7950_v49  ;;  %v8111_v49 = vld [vmem:[#allocation2 + $0x4a] sm:$0xff] }
 0x1e5   : > { %6429 = vmatprep.mubr.msk.f32.mxu1 %vm574_vm1, %v7954_v47  ;;  %v8095_v47 = vld [vmem:[#allocation2 + $0x32] sm:$0xff]  ;;  %9503 = vst [vmem:[#allocation24_spill] sm:$0xff] %v8111_v49 }
 0x1e6   : > { %6265 = vmatmul.mubr.msk.f32.gmra.mrb[50].mxu0 %vm574_vm1, %v7773_v62  ;;  %9501 = vst [vmem:[#allocation22_spill] sm:$0xff] %v8095_v47 }
 0x1e7   : > { %6267 = vmatprep.mubr.msk.f32.mxu0 %vm574_vm1, %v7779_v40 }
 0x1e8   : > { %6430 = vmatmul.mubr.msk.f32.gmra.mrb[14].mxu1 %vm574_vm1, %v7962_v63  ;;  %v2823_v63 = vld [vmem:[#allocation2 + $0x22] sm:$0xff] }
 0x1e9   : > { %6432 = vmatprep.mubr.msk.f32.mxu1 %vm574_vm1, %v8072_v53  ;;  %v8092_v53 = vld [vmem:[%s9449_s2 + $0x1c] sm:$0xf] }
 0x1ea   : > { %6268 = vmatmul.mubr.msk.f32.gmra.mrb[52].mxu0 %vm574_vm1, %v7789_v58 }
 0x1eb   : > { %6270 = vmatprep.mubr.msk.f32.mxu0 %vm574_vm1, %v7795_v16 }
 0x1ec   : > { %6433 = vmatmul.mubr.msk.f32.gmra.mrb[16].mxu1 %vm574_vm1, %v8078_v1  ;;  %v8105_v1 = vld [vmem:[#allocation2 + $0x3a] sm:$0xff] }
 0x1ed   : > { %6437 = vmatprep.mubr.msk.f32.mxu1 %vm574_vm1, %v2822_v15  ;;  %9502 = vst [vmem:[#allocation23_spill] sm:$0xff] %v8105_v1 }
 0x1ee   : > { %6271 = vmatmul.mubr.msk.f32.gmra.mrb[54].mxu0 %vm574_vm1, %v7805_v4 }
 0x1ef   : > { %6273 = vmatprep.mubr.msk.f32.mxu0 %vm574_vm1, %v7811_v5 }
 0x1f0   : > { %6438 = vmatmul.mubr.msk.f32.vlgmr.msra.gmra.mrb[18].mxu1 %vm574_vm1, %v2823_v63 }
 0x1f1   : > { %6486 = vmatpush3.msk.msra.mxu1 %vm1099_vm3, %v7904_v9  ;;  %6440 = vmatprep.mubr.msk.f32.mxu1 %vm574_vm1, %v8095_v47  ;;  %v8117_v9 = vld [vmem:[#allocation2 + $0x52] sm:$0xff] }
 0x1f2   : > { %6535 = vmatprep.subr.msk.mxu1 %vm1099_vm3, %v8092_v53  ;;  %6274 = vmatmul.mubr.msk.f32.gmra.mrb[56].mxu0 %vm574_vm1, %v7821_v10  ;;  %9504 = vst [vmem:[#allocation25_spill] sm:$0xff] %v8117_v9 }
 0x1f3   : > { %6276 = vmatprep.mubr.msk.f32.mxu0 %vm574_vm1, %v7827_v11 }
 0x1f4   : > { %6441 = vmatmul.mubr.msk.f32.gmra.mrb[20].mxu1 %vm574_vm1, %v8105_v1 }
 0x1f5   : > { %6443 = vmatprep.mubr.msk.f32.mxu1 %vm574_vm1, %v8111_v49 }
 0x1f6   : > { %6277 = vmatmul.mubr.msk.f32.gmra.mrb[58].mxu0 %vm574_vm1, %v7837_v18 }
 0x1f7   : > { %6279 = vmatprep.mubr.msk.f32.mxu0 %vm574_vm1, %v7843_v23 }
 0x1f8   : > { %6444 = vmatmul.mubr.msk.f32.gmra.mrb[22].mxu1 %vm574_vm1, %v8117_v9 }
 0x1f9   : > { %6446 = vmatprep.mubr.msk.f32.mxu1 %vm574_vm1, %v8123_v34 }
 0x1fa   : > { %6280 = vmatmul.mubr.msk.f32.gmra.mrb[60].mxu0 %vm574_vm1, %v7853_v26 }
 0x1fb   : > { %6282 = vmatprep.mubr.msk.f32.mxu0 %vm574_vm1, %v7859_v28 }
 0x1fc   : > { %6447 = vmatmul.mubr.msk.f32.gmra.mrb[24].mxu1 %vm574_vm1, %v8129_v31 }
 0x1fd   : > { %6449 = vmatprep.mubr.msk.f32.mxu1 %vm574_vm1, %v8135_v33 }
 0x1fe   : > { %6283 = vmatmul.mubr.msk.f32.gmra.mrb[62].mxu0 %vm574_vm1, %v7869_v44 }
 0x1ff   : > { %6287 = vmatprep.mubr.msk.f32.mxu0 %vm574_vm1, %v1652_v7  ;;  %v8172_v7 = vld [vmem:[#allocation2 + $0xc2] sm:$0xff] }
 0x200   : > { %6450 = vmatmul.mubr.msk.f32.gmra.mrb[26].mxu1 %vm574_vm1, %v8141_v19  ;;  %9513 = vst [vmem:[#allocation34_spill] sm:$0xff] %v8172_v7 }
 0x201   : > { %6452 = vmatprep.mubr.msk.f32.mxu1 %vm574_vm1, %v8147_v21 }
 0x202   : > { %6288 = vmatmul.mubr.msk.f32.vlgmr.msra.gmra.mrb[32].mxu0 %vm574_vm1, %v1653_v32  ;;  %v8177_v32 = vld [vmem:[#allocation2 + $0xca] sm:$0xff] }
 0x203   : > { %6290 = vmatprep.mubr.msk.f32.mxu0 %vm574_vm1, %v2822_v15  ;;  %6336 = vmatpush3.msk.msra.mxu0 %vm1099_vm3, %v6995_v22  ;;  %v8183_v15 = vld [vmem:[#allocation2 + $0xda] sm:$0xff]  ;;  %v8189_v22 = vld [vmem:[#allocation2 + $0xe2] sm:$0xff] }
 0x204   : > { %6453 = vmatmul.mubr.msk.f32.gmra.mrb[28].mxu1 %vm574_vm1, %v8153_v59 }
 0x205   : > { %6455 = vmatprep.mubr.msk.f32.mxu1 %vm574_vm1, %v8158_v50 }
 0x206   : > { %6291 = vmatmul.mubr.msk.f32.gmra.mrb[34].mxu0 %vm574_vm1, %v2823_v63  ;;  %v8195_v63 = vld [vmem:[#allocation2 + $0xf2] sm:$0xff] }
 0x207   : > { %6293 = vmatprep.mubr.msk.f32.mxu0 %vm574_vm1, %v8095_v47  ;;  %v8201_v47 = vld [vmem:[#allocation2 + $0xfa] sm:$0xff] }
 0x208   : > { %6456 = vmatmul.mubr.msk.f32.gmra.mrb[30].mxu1 %vm574_vm1, %v8163_v52 }
 0x209   : > { %6458 = vmatprep.mubr.msk.f32.mxu1 %vm574_vm1, %v8172_v7 }
 0x20a   : > { %6294 = vmatmul.mubr.msk.f32.gmra.mrb[36].mxu0 %vm574_vm1, %v8105_v1  ;;  %v8213_v1 = vld [vmem:[#allocation2 + $0x112] sm:$0xff] }
 0x20b   : > { %6296 = vmatprep.mubr.msk.f32.mxu0 %vm574_vm1, %v8111_v49  ;;  %v8207_v49 = vld [vmem:[#allocation2 + $0x10a] sm:$0xff] }
 0x20c   : > { %6459 = vmatmul.mubr.msk.f32.gmra.mrb[0].mxu1 %vm574_vm1, %v8177_v32 }
 0x20d   : > { %6461 = vmatprep.mubr.msk.f32.mxu1 %vm574_vm1, %v8183_v15 }
 0x20e   : > { %6297 = vmatmul.mubr.msk.f32.gmra.mrb[38].mxu0 %vm574_vm1, %v8117_v9  ;;  %v8225_v9 = vld [vmem:[#allocation2 + $0x12a] sm:$0xff] }
 0x20f   : > { %6299 = vmatprep.mubr.msk.f32.mxu0 %vm574_vm1, %v8123_v34  ;;  %v8219_v34 = vld [vmem:[#allocation2 + $0x122] sm:$0xff] }
 0x210   : > { %6462 = vmatmul.mubr.msk.f32.gmra.mrb[2].mxu1 %vm574_vm1, %v8189_v22 }
 0x211   : > { %6464 = vmatprep.mubr.msk.f32.mxu1 %vm574_vm1, %v8195_v63 }
 0x212   : > { %6300 = vmatmul.mubr.msk.f32.gmra.mrb[40].mxu0 %vm574_vm1, %v8129_v31  ;;  %v8237_v31 = vld [vmem:[#allocation2 + $0x142] sm:$0xff] }
 0x213   : > { %6302 = vmatprep.mubr.msk.f32.mxu0 %vm574_vm1, %v8135_v33  ;;  %v8231_v33 = vld [vmem:[#allocation2 + $0x13a] sm:$0xff] }
 0x214   : > { %6465 = vmatmul.mubr.msk.f32.gmra.mrb[4].mxu1 %vm574_vm1, %v8201_v47 }
 0x215   : > { %6467 = vmatprep.mubr.msk.f32.mxu1 %vm574_vm1, %v8207_v49 }
 0x216   : > { %6303 = vmatmul.mubr.msk.f32.gmra.mrb[42].mxu0 %vm574_vm1, %v8141_v19  ;;  %v8249_v19 = vld [vmem:[#allocation2 + $0x15a] sm:$0xff] }
 0x217   : > { %6305 = vmatprep.mubr.msk.f32.mxu0 %vm574_vm1, %v8147_v21  ;;  %v8243_v21 = vld [vmem:[#allocation2 + $0x152] sm:$0xff] }
 0x218   : > { %6468 = vmatmul.mubr.msk.f32.gmra.mrb[6].mxu1 %vm574_vm1, %v8213_v1 }
 0x219   : > { %6470 = vmatprep.mubr.msk.f32.mxu1 %vm574_vm1, %v8219_v34 }
 0x21a   : > { %6306 = vmatmul.mubr.msk.f32.gmra.mrb[44].mxu0 %vm574_vm1, %v8153_v59  ;;  %v8261_v59 = vld [vmem:[#allocation2 + $0x172] sm:$0xff] }
 0x21b   : > { %6308 = vmatprep.mubr.msk.f32.mxu0 %vm574_vm1, %v8158_v50  ;;  %v8255_v50 = vld [vmem:[#allocation2 + $0x16a] sm:$0xff] }
 0x21c   : > { %6471 = vmatmul.mubr.msk.f32.gmra.mrb[8].mxu1 %vm574_vm1, %v8225_v9 }
 0x21d   : > { %6473 = vmatprep.mubr.msk.f32.mxu1 %vm574_vm1, %v8231_v33 }
 0x21e   : > { %6309 = vmatmul.mubr.msk.f32.gmra.mrb[46].mxu0 %vm574_vm1, %v8163_v52  ;;  %v8273_v52 = vld [vmem:[#allocation2 + $0x18a] sm:$0xff] }
 0x21f   : > { %6311 = vmatprep.mubr.msk.f32.mxu0 %vm574_vm1, %v8172_v7  ;;  %v8267_v7 = vld [vmem:[#allocation2 + $0x182] sm:$0xff] }
 0x220   : > { %6474 = vmatmul.mubr.msk.f32.gmra.mrb[10].mxu1 %vm574_vm1, %v8237_v31  ;;  %9514 = vst [vmem:[#allocation35_spill] sm:$0xff] %v8267_v7 }
 0x221   : > { %6476 = vmatprep.mubr.msk.f32.mxu1 %vm574_vm1, %v8243_v21 }
 0x222   : > { %6312 = vmatmul.mubr.msk.f32.gmra.mrb[48].mxu0 %vm574_vm1, %v8177_v32 }
 0x223   : > { %6314 = vmatprep.mubr.msk.f32.mxu0 %vm574_vm1, %v8183_v15 }
 0x224   : > { %6477 = vmatmul.mubr.msk.f32.gmra.mrb[12].mxu1 %vm574_vm1, %v8249_v19 }
 0x225   : > { %6479 = vmatprep.mubr.msk.f32.mxu1 %vm574_vm1, %v8255_v50 }
 0x226   : > { %6315 = vmatmul.mubr.msk.f32.gmra.mrb[50].mxu0 %vm574_vm1, %v8189_v22 }
 0x227   : > { %6317 = vmatprep.mubr.msk.f32.mxu0 %vm574_vm1, %v8195_v63 }
 0x228   : > { %6480 = vmatmul.mubr.msk.f32.gmra.mrb[14].mxu1 %vm574_vm1, %v8261_v59 }
 0x229   : > { %6482 = vmatprep.mubr.msk.f32.mxu1 %vm574_vm1, %v8267_v7  ;;  %v5698_v7 = vld [vmem:[%s9449_s2 + $0x20] sm:$0xf] }
 0x22a   : > { %6318 = vmatmul.mubr.msk.f32.gmra.mrb[52].mxu0 %vm574_vm1, %v8201_v47 }
 0x22b   : > { %6320 = vmatprep.mubr.msk.f32.mxu0 %vm574_vm1, %v8207_v49 }
 0x22c   : > { %6483 = vmatmul.mubr.msk.f32.gmra.mrb[16].mxu1 %vm574_vm1, %v8273_v52 }
 0x22d   : > { %6487 = vmatprep.mubr.msk.f32.mxu1 %vm574_vm1, %v7988_v27 }
 0x22e   : > { %6321 = vmatmul.mubr.msk.f32.gmra.mrb[54].mxu0 %vm574_vm1, %v8213_v1 }
 0x22f   : > { %6323 = vmatprep.mubr.msk.f32.mxu0 %vm574_vm1, %v8219_v34 }
 0x230   : > { %6488 = vmatmul.mubr.msk.f32.vlgmr.msra.gmra.mrb[18].mxu1 %vm574_vm1, %v7996_v39 }
 0x231   : > { %6536 = vmatpush3.msk.msra.mxu1 %vm1099_vm3, %v8092_v53  ;;  %6490 = vmatprep.mubr.msk.f32.mxu1 %vm574_vm1, %v8000_v48 }
 0x232   : > { %6585 = vmatprep.subr.msk.mxu1 %vm1099_vm3, %v5698_v7  ;;  %6324 = vmatmul.mubr.msk.f32.gmra.mrb[56].mxu0 %vm574_vm1, %v8225_v9 }
 0x233   : > { %6326 = vmatprep.mubr.msk.f32.mxu0 %vm574_vm1, %v8231_v33 }
 0x234   : > { %6491 = vmatmul.mubr.msk.f32.gmra.mrb[20].mxu1 %vm574_vm1, %v8008_v45 }
 0x235   : > { %6493 = vmatprep.mubr.msk.f32.mxu1 %vm574_vm1, %v8012_v3 }
 0x236   : > { %6327 = vmatmul.mubr.msk.f32.gmra.mrb[58].mxu0 %vm574_vm1, %v8237_v31 }
 0x237   : > { %6329 = vmatprep.mubr.msk.f32.mxu0 %vm574_vm1, %v8243_v21 }
 0x238   : > { %6494 = vmatmul.mubr.msk.f32.gmra.mrb[22].mxu1 %vm574_vm1, %v8020_v0 }
 0x239   : > { %6496 = vmatprep.mubr.msk.f32.mxu1 %vm574_vm1, %v8024_v20 }
 0x23a   : > { %6330 = vmatmul.mubr.msk.f32.gmra.mrb[60].mxu0 %vm574_vm1, %v8249_v19 }
 0x23b   : > { %6332 = vmatprep.mubr.msk.f32.mxu0 %vm574_vm1, %v8255_v50 }
 0x23c   : > { %6497 = vmatmul.mubr.msk.f32.gmra.mrb[24].mxu1 %vm574_vm1, %v8032_v35 }
 0x23d   : > { %6499 = vmatprep.mubr.msk.f32.mxu1 %vm574_vm1, %v8036_v37 }
 0x23e   : > { %6333 = vmatmul.mubr.msk.f32.gmra.mrb[62].mxu0 %vm574_vm1, %v8261_v59 }
 0x23f   : > { %6337 = vmatprep.mubr.msk.f32.mxu0 %vm574_vm1, %v7972_v13  ;;  %v9543_v13 = vld [vmem:[#allocation34_spill] sm:$0xff] }
 0x240   : > { %6500 = vmatmul.mubr.msk.f32.gmra.mrb[26].mxu1 %vm574_vm1, %v8044_v17 }
 0x241   : > { %6502 = vmatprep.mubr.msk.f32.mxu1 %vm574_vm1, %v8048_v42 }
 0x242   : > { %6338 = vmatmul.mubr.msk.f32.vlgmr.msra.gmra.mrb[32].mxu0 %vm574_vm1, %v7984_v29 }
 0x243   : > { %6340 = vmatprep.mubr.msk.f32.mxu0 %vm574_vm1, %v7988_v27 }
 0x244   : > { %6503 = vmatmul.mubr.msk.f32.gmra.mrb[28].mxu1 %vm574_vm1, %v8056_v43 }
 0x245   : > { %6505 = vmatprep.mubr.msk.f32.mxu1 %vm574_vm1, %v7744_v38  ;;  %v3243_v38 = vld [vmem:[#allocation2 + $0x198] sm:$0xff] }
 0x246   : > { %6341 = vmatmul.mubr.msk.f32.gmra.mrb[34].mxu0 %vm574_vm1, %v7996_v39 }
 0x247   : > { %6343 = vmatprep.mubr.msk.f32.mxu0 %vm574_vm1, %v8000_v48 }
 0x248   : > { %6506 = vmatmul.mubr.msk.f32.gmra.mrb[30].mxu1 %vm574_vm1, %v7750_v51  ;;  %v3244_v51 = vld [vmem:[#allocation2 + $0x1a0] sm:$0xff] }
 0x249   : > { %6508 = vmatprep.mubr.msk.f32.mxu1 %vm574_vm1, %v7759_v36  ;;  %v9516_v36 = vld [vmem:[#allocation7_spill] sm:$0xff] }
 0x24a   : > { %6344 = vmatmul.mubr.msk.f32.gmra.mrb[36].mxu0 %vm574_vm1, %v8008_v45 }
 0x24b   : > { %6346 = vmatprep.mubr.msk.f32.mxu0 %vm574_vm1, %v8012_v3 }
 0x24c   : > { %6509 = vmatmul.mubr.msk.f32.gmra.mrb[0].mxu1 %vm574_vm1, %v7773_v62  ;;  %v9519_v62 = vld [vmem:[#allocation10_spill] sm:$0xff] }
 0x24d   : > { %6511 = vmatprep.mubr.msk.f32.mxu1 %vm574_vm1, %v7779_v40  ;;  %v9520_v40 = vld [vmem:[#allocation11_spill] sm:$0xff] }
 0x24e   : > { %6347 = vmatmul.mubr.msk.f32.gmra.mrb[38].mxu0 %vm574_vm1, %v8020_v0 }
 0x24f   : > { %6349 = vmatprep.mubr.msk.f32.mxu0 %vm574_vm1, %v8024_v20 }
 0x250   : > { %6512 = vmatmul.mubr.msk.f32.gmra.mrb[2].mxu1 %vm574_vm1, %v7789_v58  ;;  %v9523_v58 = vld [vmem:[#allocation14_spill] sm:$0xff] }
 0x251   : > { %6514 = vmatprep.mubr.msk.f32.mxu1 %vm574_vm1, %v7795_v16  ;;  %v9524_v16 = vld [vmem:[#allocation15_spill] sm:$0xff] }
 0x252   : > { %6350 = vmatmul.mubr.msk.f32.gmra.mrb[40].mxu0 %vm574_vm1, %v8032_v35 }
 0x253   : > { %6352 = vmatprep.mubr.msk.f32.mxu0 %vm574_vm1, %v8036_v37 }
 0x254   : > { %6515 = vmatmul.mubr.msk.f32.gmra.mrb[4].mxu1 %vm574_vm1, %v7805_v4  ;;  %v9527_v4 = vld [vmem:[#allocation18_spill] sm:$0xff] }
 0x255   : > { %6517 = vmatprep.mubr.msk.f32.mxu1 %vm574_vm1, %v7811_v5  ;;  %v9528_v5 = vld [vmem:[#allocation19_spill] sm:$0xff] }
 0x256   : > { %6353 = vmatmul.mubr.msk.f32.gmra.mrb[42].mxu0 %vm574_vm1, %v8044_v17 }
 0x257   : > { %6355 = vmatprep.mubr.msk.f32.mxu0 %vm574_vm1, %v8048_v42 }
 0x258   : > { %6518 = vmatmul.mubr.msk.f32.gmra.mrb[6].mxu1 %vm574_vm1, %v7821_v10  ;;  %v9530_v10 = vld [vmem:[#allocation21_spill] sm:$0xff] }
 0x259   : > { %6520 = vmatprep.mubr.msk.f32.mxu1 %vm574_vm1, %v7827_v11  ;;  %v3634_v11 = vld [vmem:[#allocation2 + $0x1a1] sm:$0xff] }
 0x25a   : > { %6356 = vmatmul.mubr.msk.f32.gmra.mrb[44].mxu0 %vm574_vm1, %v8056_v43 }
 0x25c   : > { %6521 = vmatmul.mubr.msk.f32.gmra.mrb[8].mxu1 %vm574_vm1, %v7837_v18  ;;  %v9533_v18 = vld [vmem:[#allocation24_spill] sm:$0xff] }
 0x25d   : > { %6523 = vmatprep.mubr.msk.f32.mxu1 %vm574_vm1, %v7843_v23  ;;  %v9534_v23 = vld [vmem:[#allocation25_spill] sm:$0xff] }
 0x260   : > { %6524 = vmatmul.mubr.msk.f32.gmra.mrb[10].mxu1 %vm574_vm1, %v7853_v26  ;;  %v9537_v26 = vld [vmem:[#allocation28_spill] sm:$0xff] }
 0x261   : > { %6526 = vmatprep.mubr.msk.f32.mxu1 %vm574_vm1, %v7859_v28  ;;  %v9538_v28 = vld [vmem:[#allocation29_spill] sm:$0xff] }
 0x264   : > { %6527 = vmatmul.mubr.msk.f32.gmra.mrb[12].mxu1 %vm574_vm1, %v7869_v44  ;;  %v9540_v44 = vld [vmem:[#allocation31_spill] sm:$0xff] }
 0x265   : > { %6529 = vmatprep.mubr.msk.f32.mxu1 %vm574_vm1, %v7875_v41  ;;  %v9541_v41 = vld [vmem:[#allocation32_spill] sm:$0xff] }
 0x268   : > { %6530 = vmatmul.mubr.msk.f32.gmra.mrb[14].mxu1 %vm574_vm1, %v7885_v61  ;;  %v9542_v61 = vld [vmem:[#allocation33_spill] sm:$0xff] }
 0x269   : > { %6532 = vmatprep.mubr.msk.f32.mxu1 %vm574_vm1, %v3243_v38 }
 0x26c   : > { %6533 = vmatmul.mubr.msk.f32.gmra.mrb[16].mxu1 %vm574_vm1, %v3244_v51 }
 0x26d   : > { %6537 = vmatprep.mubr.msk.f32.mxu1 %vm574_vm1, %v7742_v46  ;;  %v9515_v46 = vld [vmem:[#allocation6_spill] sm:$0xff] }
 0x270   : > { %6538 = vmatmul.mubr.msk.f32.vlgmr.msra.gmra.mrb[18].mxu1 %vm574_vm1, %v7765_v54  ;;  %v9517_v54 = vld [vmem:[#allocation8_spill] sm:$0xff] }
 0x271   : > { %6586 = vmatpush3.msk.msra.mxu1 %vm1099_vm3, %v5698_v7  ;;  %6540 = vmatprep.mubr.msk.f32.mxu1 %vm574_vm1, %v7769_v55  ;;  %v9518_v55 = vld [vmem:[#allocation9_spill] sm:$0xff] }
 0x274   : > { %6541 = vmatmul.mubr.msk.f32.gmra.mrb[20].mxu1 %vm574_vm1, %v7783_v56  ;;  %v9521_v56 = vld [vmem:[#allocation12_spill] sm:$0xff] }
 0x275   : > { %6543 = vmatprep.mubr.msk.f32.mxu1 %vm574_vm1, %v7787_v57  ;;  %v9522_v57 = vld [vmem:[#allocation13_spill] sm:$0xff] }
 0x278   : > { %6544 = vmatmul.mubr.msk.f32.gmra.mrb[22].mxu1 %vm574_vm1, %v7799_v60  ;;  %v9525_v60 = vld [vmem:[#allocation16_spill] sm:$0xff] }
 0x279   : > { %6546 = vmatprep.mubr.msk.f32.mxu1 %vm574_vm1, %v7803_v2  ;;  %v9526_v2 = vld [vmem:[#allocation17_spill] sm:$0xff] }
 0x27c   : > { %6547 = vmatmul.mubr.msk.f32.gmra.mrb[24].mxu1 %vm574_vm1, %v7815_v6  ;;  %v9529_v6 = vld [vmem:[#allocation20_spill] sm:$0xff] }
 0x27d   : > { %6549 = vmatprep.mubr.msk.f32.mxu1 %vm574_vm1, %v7819_v8  ;;  %v3633_v8 = vld [vmem:[#allocation2 + $0x199] sm:$0xff] }
 0x280   : > { %6550 = vmatmul.mubr.msk.f32.gmra.mrb[26].mxu1 %vm574_vm1, %v7831_v12  ;;  %v9531_v12 = vld [vmem:[#allocation22_spill] sm:$0xff] }
 0x281   : > { %6552 = vmatprep.mubr.msk.f32.mxu1 %vm574_vm1, %v7835_v14  ;;  %v9532_v14 = vld [vmem:[#allocation23_spill] sm:$0xff] }
 0x284   : > { %6553 = vmatmul.mubr.msk.f32.gmra.mrb[28].mxu1 %vm574_vm1, %v7847_v24  ;;  %v9535_v24 = vld [vmem:[#allocation26_spill] sm:$0xff] }
 0x285   : > { %6555 = vmatprep.mubr.msk.f32.mxu1 %vm574_vm1, %v7851_v25  ;;  %v9536_v25 = vld [vmem:[#allocation27_spill] sm:$0xff] }
 0x288   : > { %6556 = vmatmul.mubr.msk.f32.gmra.mrb[30].mxu1 %vm574_vm1, %v7863_v30  ;;  %v9539_v30 = vld [vmem:[#allocation30_spill] sm:$0xff] }
 0x289   : > { %6558 = vmatprep.mubr.msk.f32.mxu1 %vm574_vm1, %v9515_v46 }
 0x28c   : > { %6559 = vmatmul.mubr.msk.f32.gmra.mrb[0].mxu1 %vm574_vm1, %v9516_v36 }
 0x28d   : > { %6561 = vmatprep.mubr.msk.f32.mxu1 %vm574_vm1, %v9517_v54  ;;  %v4656_v54 = vld [vmem:[%s9450_s3] sm:$0xf] }
 0x28e   : > { %6635 = vmatprep.subr.msk.mxu0 %vm1099_vm3, %v4656_v54 }
 0x28f   : > { %6636 = vmatpush3.msk.msra.mxu0 %vm1099_vm3, %v4656_v54 }
 0x290   : > { %6562 = vmatmul.mubr.msk.f32.gmra.mrb[2].mxu1 %vm574_vm1, %v9518_v55 }
 0x291   : > { %6564 = vmatprep.mubr.msk.f32.mxu1 %vm574_vm1, %v9519_v62 }
 0x294   : > { %6565 = vmatmul.mubr.msk.f32.gmra.mrb[4].mxu1 %vm574_vm1, %v9520_v40 }
 0x295   : > { %6567 = vmatprep.mubr.msk.f32.mxu1 %vm574_vm1, %v9521_v56 }
 0x298   : > { %6568 = vmatmul.mubr.msk.f32.gmra.mrb[6].mxu1 %vm574_vm1, %v9522_v57 }
 0x299   : > { %6570 = vmatprep.mubr.msk.f32.mxu1 %vm574_vm1, %v9523_v58 }
 0x29c   : > { %6571 = vmatmul.mubr.msk.f32.gmra.mrb[8].mxu1 %vm574_vm1, %v9524_v16 }
 0x29d   : > { %6573 = vmatprep.mubr.msk.f32.mxu1 %vm574_vm1, %v9525_v60 }
 0x2a0   : > { %6574 = vmatmul.mubr.msk.f32.gmra.mrb[10].mxu1 %vm574_vm1, %v9526_v2 }
 0x2a1   : > { %6576 = vmatprep.mubr.msk.f32.mxu1 %vm574_vm1, %v9527_v4 }
 0x2a4   : > { %6577 = vmatmul.mubr.msk.f32.gmra.mrb[12].mxu1 %vm574_vm1, %v9528_v5 }
 0x2a5   : > { %6579 = vmatprep.mubr.msk.f32.mxu1 %vm574_vm1, %v9529_v6 }
 0x2a8   : > { %6580 = vmatmul.mubr.msk.f32.gmra.mrb[14].mxu1 %vm574_vm1, %v9530_v10 }
 0x2a9   : > { %6582 = vmatprep.mubr.msk.f32.mxu1 %vm574_vm1, %v3633_v8 }
 0x2ac   : > { %6583 = vmatmul.mubr.msk.f32.gmra.mrb[16].mxu1 %vm574_vm1, %v3634_v11 }
 0x2ad   : > { %6587 = vmatprep.mubr.msk.f32.mxu1 %vm574_vm1, %v9531_v12 }
 0x2b0   : > { %6588 = vmatmul.mubr.msk.f32.vlgmr.msra.gmra.mrb[18].mxu1 %vm574_vm1, %v9532_v14 }
 0x2b1   : > { %6590 = vmatprep.mubr.msk.f32.mxu1 %vm574_vm1, %v9533_v18 }
 0x2b4   : > { %6591 = vmatmul.mubr.msk.f32.gmra.mrb[20].mxu1 %vm574_vm1, %v9534_v23 }
 0x2b5   : > { %6593 = vmatprep.mubr.msk.f32.mxu1 %vm574_vm1, %v9535_v24 }
 0x2b8   : > { %6594 = vmatmul.mubr.msk.f32.gmra.mrb[22].mxu1 %vm574_vm1, %v9536_v25 }
 0x2b9   : > { %6596 = vmatprep.mubr.msk.f32.mxu1 %vm574_vm1, %v9537_v26 }
 0x2bc   : > { %6597 = vmatmul.mubr.msk.f32.gmra.mrb[24].mxu1 %vm574_vm1, %v9538_v28 }
 0x2bd   : > { %6599 = vmatprep.mubr.msk.f32.mxu1 %vm574_vm1, %v9539_v30 }
 0x2c0   : > { %6600 = vmatmul.mubr.msk.f32.gmra.mrb[26].mxu1 %vm574_vm1, %v9540_v44 }
 0x2c1   : > { %6602 = vmatprep.mubr.msk.f32.mxu1 %vm574_vm1, %v9541_v41 }
 0x2c4   : > { %6603 = vmatmul.mubr.msk.f32.gmra.mrb[28].mxu1 %vm574_vm1, %v9542_v61 }
 0x2c5   : > { %6605 = vmatprep.mubr.msk.f32.mxu1 %vm574_vm1, %v9543_v13 }
 0x2c8   : > { %6606 = vmatmul.mubr.msk.f32.gmra.mrb[30].mxu1 %vm574_vm1, %v8177_v32 }
 0x2c9   : > { %6608 = vmatprep.mubr.msk.f32.mxu1 %vm574_vm1, %v8183_v15 }
 0x2cc   : > { %6609 = vmatmul.mubr.msk.f32.gmra.mrb[0].mxu1 %vm574_vm1, %v8189_v22 }
 0x2cd   : > { %6611 = vmatprep.mubr.msk.f32.mxu1 %vm574_vm1, %v8195_v63 }
 0x2d0   : > { %6612 = vmatmul.mubr.msk.f32.gmra.mrb[2].mxu1 %vm574_vm1, %v8201_v47 }
 0x2d1   : > { %6614 = vmatprep.mubr.msk.f32.mxu1 %vm574_vm1, %v8207_v49  ;;  %v4023_v49 = vld [vmem:[#allocation2 + $0x19a] sm:$0xff] }
 0x2d4   : > { %6615 = vmatmul.mubr.msk.f32.gmra.mrb[4].mxu1 %vm574_vm1, %v8213_v1 }
 0x2d5   : > { %6617 = vmatprep.mubr.msk.f32.mxu1 %vm574_vm1, %v8219_v34  ;;  %v9544_v34 = vld [vmem:[#allocation35_spill] sm:$0xff] }
 0x2d8   : > { %6618 = vmatmul.mubr.msk.f32.gmra.mrb[6].mxu1 %vm574_vm1, %v8225_v9 }
 0x2d9   : > { %6620 = vmatprep.mubr.msk.f32.mxu1 %vm574_vm1, %v8231_v33  ;;  %v4024_v33 = vld [vmem:[#allocation2 + $0x1a2] sm:$0xff] }
 0x2dc   : > { %6621 = vmatmul.mubr.msk.f32.gmra.mrb[8].mxu1 %vm574_vm1, %v8237_v31 }
 0x2dd   : > { %6623 = vmatprep.mubr.msk.f32.mxu1 %vm574_vm1, %v8243_v21 }
 0x2e0   : > { %6624 = vmatmul.mubr.msk.f32.gmra.mrb[10].mxu1 %vm574_vm1, %v8249_v19 }
 0x2e1   : > { %6626 = vmatprep.mubr.msk.f32.mxu1 %vm574_vm1, %v8255_v50 }
 0x2e4   : > { %6627 = vmatmul.mubr.msk.f32.gmra.mrb[12].mxu1 %vm574_vm1, %v8261_v59 }
 0x2e5   : > { %6629 = vmatprep.mubr.msk.f32.mxu1 %vm574_vm1, %v9544_v34 }
 0x2e8   : > { %6630 = vmatmul.mubr.msk.f32.gmra.mrb[14].mxu1 %vm574_vm1, %v8273_v52 }
 0x2e9   : > { %6632 = vmatprep.mubr.msk.f32.mxu1 %vm574_vm1, %v4023_v49 }
 0x2ec   : > { %6633 = vmatmul.mubr.msk.f32.gmra.mrb[16].mxu1 %vm574_vm1, %v4024_v33 }
 0x2f1   : > { %v8522_v21 = vpop.f32.mrb[46].mxu0 }
 0x2f2   : > { %v8524_v19 = vpop.f32.mrb[47].mxu0 }
 0x2f5   : > { %v8526_v50 = vpop.f32.mrb[48].mxu0 }
 0x2f6   : > { %v8528_v31 = vpop.f32.mrb[49].mxu0 }
 0x2f9   : > { %v8530_v59 = vpop.f32.mrb[50].mxu0 }
 0x2fa   : > { %v8532_v47 = vpop.f32.mrb[51].mxu0 }
 0x2fd   : > { %v8534_v29 = vpop.f32.mrb[52].mxu0 }
 0x2fe   : > { %v8536_v52 = vpop.f32.mrb[53].mxu0 }
 0x301   : > { %v8538_v27 = vpop.f32.mrb[54].mxu0 }
 0x302   : > { %v8540_v39 = vpop.f32.mrb[55].mxu0 }
 0x305   : > { %v8542_v48 = vpop.f32.mrb[56].mxu0 }
 0x306   : > { %v8544_v45 = vpop.f32.mrb[57].mxu0 }
 0x309   : > { %v8546_v3 = vpop.f32.mrb[58].mxu0 }
 0x30a   : > { %v8548_v0 = vpop.f32.mrb[59].mxu0 }
 0x30d   : > { %v8550_v20 = vpop.f32.mrb[60].mxu0 }
 0x30e   : > { %v8552_v35 = vpop.f32.mrb[61].mxu0 }
 0x311   : > { %v8554_v37 = vpop.f32.mrb[62].mxu0 }
 0x312   : > { %v8556_v17 = vpop.f32.mrb[63].mxu0 }
 0x315   : > { %v6339_v42 = vpop.f32.mrb[32].mxu0 }
 0x316   : > { %v2241_v43 = vpop.f32.mrb[33].mxu0 }
 0x319   : > { %v6342_v53 = vpop.f32.mrb[34].mxu0 }
 0x31a   : > { %v2251_v1 = vpop.f32.mrb[35].mxu0 }
 0x31d   : > { %v6345_v9 = vpop.f32.mrb[36].mxu0 }
 0x31e   : > { %v2261_v7 = vpop.f32.mrb[37].mxu0 }
 0x321   : > { %v6348_v32 = vpop.f32.mrb[38].mxu0 }
 0x322   : > { %v2271_v15 = vpop.f32.mrb[39].mxu0 }
 0x325   : > { %v6351_v22 = vpop.f32.mrb[40].mxu0 }
 0x326   : > { %v2281_v63 = vpop.f32.mrb[41].mxu0 }
 0x329   : > { %v8558_v38 = vpop.f32.mrb[42].mxu0 }
 0x32a   : > { %v8560_v51 = vpop.f32.mrb[43].mxu0 }
 0x32d   : > { %v8562_v46 = vpop.f32.mrb[44].mxu0 }
 0x32e   : > { %v8564_v36 = vpop.f32.mrb[45].mxu0 }
 0x383   : > { %v6589_v55 = vpop.f32.mrb[18].mxu1 }
 0x384   : > { %v8571_v62 = vadd.f32 %v6589_v55, %v6339_v42  ;;  %v4192_v40 = vpop.f32.mrb[19].mxu1 }
 0x385   : > { %v8573_v56 = vadd.f32 %v4192_v40, %v2241_v43 }
 0x386   : > { %v4453_v57 = vmul.f32 %v8571_v62, %v8571_v62  ;;  %v4384_v58 = vsel %vm574_vm1, %v8571_v62, 0.0 }
 0x387   : > { %v4383_v16 = vsel %vm574_vm1, %v8573_v56, 0.0  ;;  %v4452_v60 = vmul.f32 %v8573_v56, %v8573_v56  ;;  %v6592_v2 = vpop.f32.mrb[20].mxu1 }
 0x388   : > { %v8583_v4 = vadd.f32 %v6592_v2, %v6342_v53  ;;  %v4202_v5 = vpop.f32.mrb[21].mxu1  ;;  %v4485_v6 = vsel %vm574_vm1, %v4453_v57, 0.0  ;;  %v4385_v11 = vadd.f32 %v4384_v58, %v4383_v16 }
 0x389   : > { %v4484_v8 = vsel %vm574_vm1, %v4452_v60, 0.0  ;;  %v8587_v10 = vadd.f32 %v4202_v5, %v2251_v1 }
 0x38a   : > { %v4455_v12 = vmul.f32 %v8583_v4, %v8583_v4  ;;  %v4486_v24 = vadd.f32 %v4485_v6, %v4484_v8  ;;  %v4388_v30 = vsel %vm574_vm1, %v8583_v4, 0.0 }
 0x38b   : > { %v4386_v14 = vsel %vm574_vm1, %v8587_v10, 0.0  ;;  %v4454_v18 = vmul.f32 %v8587_v10, %v8587_v10  ;;  %v6595_v23 = vpop.f32.mrb[22].mxu1 }
 0x38c   : > { %v4387_v25 = vadd.f32 %v4386_v14, %v4385_v11  ;;  %v8595_v26 = vadd.f32 %v6595_v23, %v6345_v9  ;;  %v4212_v28 = vpop.f32.mrb[23].mxu1  ;;  %v4489_v34 = vsel %vm574_vm1, %v4455_v12, 0.0 }
 0x38d   : > { %v4487_v44 = vsel %vm574_vm1, %v4454_v18, 0.0  ;;  %v8600_v41 = vadd.f32 %v4212_v28, %v2261_v7 }
 0x38e   : > { %v4488_v61 = vadd.f32 %v4487_v44, %v4486_v24  ;;  %v4389_v13 = vadd.f32 %v4388_v30, %v4387_v25  ;;  %v4457_v49 = vmul.f32 %v8595_v26, %v8595_v26  ;;  %v4392_v54 = vsel %vm574_vm1, %v8595_v26, 0.0 }
 0x38f   : > { %v4390_v33 = vsel %vm574_vm1, %v8600_v41, 0.0  ;;  %v4456_v42 = vmul.f32 %v8600_v41, %v8600_v41  ;;  %v6598_v43 = vpop.f32.mrb[24].mxu1 }
 0x390   : > { %v4391_v53 = vadd.f32 %v4390_v33, %v4389_v13  ;;  %v4490_v1 = vadd.f32 %v4489_v34, %v4488_v61  ;;  %v8609_v9 = vadd.f32 %v6598_v43, %v6348_v32  ;;  %v4222_v7 = vpop.f32.mrb[25].mxu1  ;;  %v4493_v16 = vsel %vm574_vm1, %v4457_v49, 0.0 }
 0x391   : > { %v4491_v55 = vsel %vm574_vm1, %v4456_v42, 0.0  ;;  %v8614_v40 = vadd.f32 %v4222_v7, %v2271_v15 }
 0x392   : > { %v4492_v57 = vadd.f32 %v4491_v55, %v4490_v1  ;;  %v4393_v58 = vadd.f32 %v4392_v54, %v4391_v53  ;;  %v4459_v60 = vmul.f32 %v8609_v9, %v8609_v9  ;;  %v4396_v12 = vsel %vm574_vm1, %v8609_v9, 0.0 }
 0x393   : > { %v4394_v2 = vsel %vm574_vm1, %v8614_v40, 0.0  ;;  %v4458_v32 = vmul.f32 %v8614_v40, %v8614_v40  ;;  %v6601_v5 = vpop.f32.mrb[26].mxu1 }
 0x394   : > { %v4395_v6 = vadd.f32 %v4394_v2, %v4393_v58  ;;  %v4494_v8 = vadd.f32 %v4493_v16, %v4492_v57  ;;  %v8623_v11 = vadd.f32 %v6601_v5, %v6351_v22  ;;  %v4232_v15 = vpop.f32.mrb[27].mxu1  ;;  %v4497_v25 = vsel %vm574_vm1, %v4459_v60, 0.0 }
 0x395   : > { %v4495_v14 = vsel %vm574_vm1, %v4458_v32, 0.0  ;;  %v8628_v18 = vadd.f32 %v4232_v15, %v2281_v63 }
 0x396   : > { %v4496_v23 = vadd.f32 %v4495_v14, %v4494_v8  ;;  %v4397_v24 = vadd.f32 %v4396_v12, %v4395_v6  ;;  %v4461_v28 = vmul.f32 %v8623_v11, %v8623_v11  ;;  %v4400_v49 = vsel %vm574_vm1, %v8623_v11, 0.0 }
 0x397   : > { %v4398_v30 = vsel %vm574_vm1, %v8628_v18, 0.0  ;;  %v4460_v22 = vmul.f32 %v8628_v18, %v8628_v18  ;;  %v6604_v44 = vpop.f32.mrb[28].mxu1 }
 0x398   : > { %v4399_v61 = vadd.f32 %v4398_v30, %v4397_v24  ;;  %v4498_v13 = vadd.f32 %v4497_v25, %v4496_v23  ;;  %v8638_v34 = vadd.f32 %v6604_v44, %v8558_v38  ;;  %v4242_v63 = vpop.f32.mrb[29].mxu1  ;;  %v4501_v1 = vsel %vm574_vm1, %v4461_v28, 0.0 }
 0x399   : > { %v4499_v33 = vsel %vm574_vm1, %v4460_v22, 0.0  ;;  %v8644_v42 = vadd.f32 %v4242_v63, %v8560_v51 }
 0x39a   : > { %v4500_v43 = vadd.f32 %v4499_v33, %v4498_v13  ;;  %v4401_v53 = vadd.f32 %v4400_v49, %v4399_v61  ;;  %v4463_v7 = vmul.f32 %v8638_v34, %v8638_v34  ;;  %v4404_v60 = vsel %vm574_vm1, %v8638_v34, 0.0 }
 0x39b   : > { %v4402_v38 = vsel %vm574_vm1, %v8644_v42, 0.0  ;;  %v4462_v54 = vmul.f32 %v8644_v42, %v8644_v42  ;;  %v6607_v55 = vpop.f32.mrb[30].mxu1 }
 0x39c   : > { %v4403_v57 = vadd.f32 %v4402_v38, %v4401_v53  ;;  %v4502_v58 = vadd.f32 %v4501_v1, %v4500_v43  ;;  %v8654_v16 = vadd.f32 %v6607_v55, %v8562_v46  ;;  %v4252_v51 = vpop.f32.mrb[31].mxu1  ;;  %v4505_v8 = vsel %vm574_vm1, %v4463_v7, 0.0 }
 0x39d   : > { %v4503_v2 = vsel %vm574_vm1, %v4462_v54, 0.0  ;;  %v8660_v32 = vadd.f32 %v4252_v51, %v8564_v36 }
 0x39e   : > { %v4504_v5 = vadd.f32 %v4503_v2, %v4502_v58  ;;  %v4405_v6 = vadd.f32 %v4404_v60, %v4403_v57  ;;  %v4465_v15 = vmul.f32 %v8654_v16, %v8654_v16  ;;  %v4408_v28 = vsel %vm574_vm1, %v8654_v16, 0.0 }
 0x39f   : > { %v4406_v46 = vsel %vm574_vm1, %v8660_v32, 0.0  ;;  %v4464_v12 = vmul.f32 %v8660_v32, %v8660_v32  ;;  %v6610_v14 = vpop.f32.mrb[0].mxu1 }
 0x3a0   : > { %v4407_v23 = vadd.f32 %v4406_v46, %v4405_v6  ;;  %v4506_v24 = vadd.f32 %v4505_v8, %v4504_v5  ;;  %v8670_v25 = vadd.f32 %v6610_v14, %v8522_v21  ;;  %v4262_v36 = vpop.f32.mrb[1].mxu1  ;;  %v4509_v13 = vsel %vm574_vm1, %v4465_v15, 0.0 }
 0x3a1   : > { %v4507_v30 = vsel %vm574_vm1, %v4464_v12, 0.0  ;;  %v8676_v22 = vadd.f32 %v4262_v36, %v8524_v19 }
 0x3a2   : > { %v4508_v44 = vadd.f32 %v4507_v30, %v4506_v24  ;;  %v4409_v61 = vadd.f32 %v4408_v28, %v4407_v23  ;;  %v4467_v63 = vmul.f32 %v8670_v25, %v8670_v25  ;;  %v4412_v7 = vsel %vm574_vm1, %v8670_v25, 0.0 }
 0x3a3   : > { %v4410_v21 = vsel %vm574_vm1, %v8676_v22, 0.0  ;;  %v4466_v49 = vmul.f32 %v8676_v22, %v8676_v22  ;;  %v6613_v33 = vpop.f32.mrb[2].mxu1 }
 0x3a4   : > { %v4411_v43 = vadd.f32 %v4410_v21, %v4409_v61  ;;  %v4510_v53 = vadd.f32 %v4509_v13, %v4508_v44  ;;  %v8686_v1 = vadd.f32 %v6613_v33, %v8526_v50  ;;  %v4272_v19 = vpop.f32.mrb[3].mxu1  ;;  %v4513_v58 = vsel %vm574_vm1, %v4467_v63, 0.0 }
 0x3a5   : > { %v4511_v38 = vsel %vm574_vm1, %v4466_v49, 0.0  ;;  %v8692_v54 = vadd.f32 %v4272_v19, %v8528_v31 }
 0x3a6   : > { %v4512_v55 = vadd.f32 %v4511_v38, %v4510_v53  ;;  %v4413_v57 = vadd.f32 %v4412_v7, %v4411_v43  ;;  %v4469_v51 = vmul.f32 %v8686_v1, %v8686_v1  ;;  %v4416_v15 = vsel %vm574_vm1, %v8686_v1, 0.0 }
 0x3a7   : > { %v4414_v50 = vsel %vm574_vm1, %v8692_v54, 0.0  ;;  %v4468_v60 = vmul.f32 %v8692_v54, %v8692_v54  ;;  %v6616_v2 = vpop.f32.mrb[4].mxu1 }
 0x3a8   : > { %v4415_v5 = vadd.f32 %v4414_v50, %v4413_v57  ;;  %v4514_v6 = vadd.f32 %v4513_v58, %v4512_v55  ;;  %v8702_v8 = vadd.f32 %v6616_v2, %v8530_v59  ;;  %v4282_v31 = vpop.f32.mrb[5].mxu1  ;;  %v4517_v24 = vsel %vm574_vm1, %v4469_v51, 0.0 }
 0x3a9   : > { %v4515_v46 = vsel %vm574_vm1, %v4468_v60, 0.0  ;;  %v8708_v12 = vadd.f32 %v4282_v31, %v8532_v47 }
 0x3aa   : > { %v4516_v14 = vadd.f32 %v4515_v46, %v4514_v6  ;;  %v4417_v23 = vadd.f32 %v4416_v15, %v4415_v5  ;;  %v4471_v36 = vmul.f32 %v8702_v8, %v8702_v8  ;;  %v4420_v63 = vsel %vm574_vm1, %v8702_v8, 0.0 }
 0x3ab   : > { %v4418_v59 = vsel %vm574_vm1, %v8708_v12, 0.0  ;;  %v4470_v28 = vmul.f32 %v8708_v12, %v8708_v12  ;;  %v6619_v30 = vpop.f32.mrb[6].mxu1 }
 0x3ac   : > { %v4419_v44 = vadd.f32 %v4418_v59, %v4417_v23  ;;  %v4518_v61 = vadd.f32 %v4517_v24, %v4516_v14  ;;  %v8718_v13 = vadd.f32 %v6619_v30, %v8534_v29  ;;  %v4292_v47 = vpop.f32.mrb[7].mxu1  ;;  %v4521_v53 = vsel %vm574_vm1, %v4471_v36, 0.0 }
 0x3ad   : > { %v4519_v21 = vsel %vm574_vm1, %v4470_v28, 0.0  ;;  %v8724_v49 = vadd.f32 %v4292_v47, %v8536_v52 }
 0x3ae   : > { %v4520_v33 = vadd.f32 %v4519_v21, %v4518_v61  ;;  %v4421_v43 = vadd.f32 %v4420_v63, %v4419_v44  ;;  %v4473_v19 = vmul.f32 %v8718_v13, %v8718_v13  ;;  %v4424_v51 = vsel %vm574_vm1, %v8718_v13, 0.0 }
 0x3af   : > { %v4422_v29 = vsel %vm574_vm1, %v8724_v49, 0.0  ;;  %v4472_v7 = vmul.f32 %v8724_v49, %v8724_v49  ;;  %v6622_v38 = vpop.f32.mrb[8].mxu1 }
 0x3b0   : > { %v4423_v55 = vadd.f32 %v4422_v29, %v4421_v43  ;;  %v4522_v57 = vadd.f32 %v4521_v53, %v4520_v33  ;;  %v8734_v58 = vadd.f32 %v6622_v38, %v8538_v27  ;;  %v4302_v52 = vpop.f32.mrb[9].mxu1  ;;  %v4525_v6 = vsel %vm574_vm1, %v4473_v19, 0.0 }
 0x3b1   : > { %v4523_v50 = vsel %vm574_vm1, %v4472_v7, 0.0  ;;  %v8740_v60 = vadd.f32 %v4302_v52, %v8540_v39 }
 0x3b2   : > { %v4524_v2 = vadd.f32 %v4523_v50, %v4522_v57  ;;  %v4425_v5 = vadd.f32 %v4424_v51, %v4423_v55  ;;  %v4475_v31 = vmul.f32 %v8734_v58, %v8734_v58  ;;  %v4428_v36 = vsel %vm574_vm1, %v8734_v58, 0.0 }
 0x3b3   : > { %v4426_v27 = vsel %vm574_vm1, %v8740_v60, 0.0  ;;  %v4474_v15 = vmul.f32 %v8740_v60, %v8740_v60  ;;  %v6625_v46 = vpop.f32.mrb[10].mxu1 }
 0x3b4   : > { %v4427_v14 = vadd.f32 %v4426_v27, %v4425_v5  ;;  %v4526_v23 = vadd.f32 %v4525_v6, %v4524_v2  ;;  %v8750_v24 = vadd.f32 %v6625_v46, %v8542_v48  ;;  %v4312_v39 = vpop.f32.mrb[11].mxu1  ;;  %v4529_v61 = vsel %vm574_vm1, %v4475_v31, 0.0 }
 0x3b5   : > { %v4527_v59 = vsel %vm574_vm1, %v4474_v15, 0.0  ;;  %v8756_v28 = vadd.f32 %v4312_v39, %v8544_v45 }
 0x3b6   : > { %v4528_v30 = vadd.f32 %v4527_v59, %v4526_v23  ;;  %v4429_v44 = vadd.f32 %v4428_v36, %v4427_v14  ;;  %v4477_v47 = vmul.f32 %v8750_v24, %v8750_v24  ;;  %v4432_v19 = vsel %vm574_vm1, %v8750_v24, 0.0 }
 0x3b7   : > { %v4430_v48 = vsel %vm574_vm1, %v8756_v28, 0.0  ;;  %v4476_v63 = vmul.f32 %v8756_v28, %v8756_v28  ;;  %v6628_v21 = vpop.f32.mrb[12].mxu1 }
 0x3b8   : > { %v4431_v33 = vadd.f32 %v4430_v48, %v4429_v44  ;;  %v4530_v43 = vadd.f32 %v4529_v61, %v4528_v30  ;;  %v8766_v53 = vadd.f32 %v6628_v21, %v8546_v3  ;;  %v4322_v45 = vpop.f32.mrb[13].mxu1  ;;  %v4533_v57 = vsel %vm574_vm1, %v4477_v47, 0.0 }
 0x3b9   : > { %v4531_v29 = vsel %vm574_vm1, %v4476_v63, 0.0  ;;  %v8772_v7 = vadd.f32 %v4322_v45, %v8548_v0 }
 0x3ba   : > { %v4532_v38 = vadd.f32 %v4531_v29, %v4530_v43  ;;  %v4433_v55 = vadd.f32 %v4432_v19, %v4431_v33  ;;  %v4479_v52 = vmul.f32 %v8766_v53, %v8766_v53  ;;  %v4436_v31 = vsel %vm574_vm1, %v8766_v53, 0.0 }
 0x3bb   : > { %v4434_v3 = vsel %vm574_vm1, %v8772_v7, 0.0  ;;  %v4478_v51 = vmul.f32 %v8772_v7, %v8772_v7  ;;  %v6631_v50 = vpop.f32.mrb[14].mxu1 }
 0x3bc   : > { %v4435_v2 = vadd.f32 %v4434_v3, %v4433_v55  ;;  %v4534_v5 = vadd.f32 %v4533_v57, %v4532_v38  ;;  %v8782_v6 = vadd.f32 %v6631_v50, %v8550_v20  ;;  %v4332_v0 = vpop.f32.mrb[15].mxu1  ;;  %v4537_v23 = vsel %vm574_vm1, %v4479_v52, 0.0 }
 0x3bd   : > { %v4535_v27 = vsel %vm574_vm1, %v4478_v51, 0.0  ;;  %v8788_v15 = vadd.f32 %v4332_v0, %v8552_v35 }
 0x3be   : > { %v4536_v46 = vadd.f32 %v4535_v27, %v4534_v5  ;;  %v4437_v14 = vadd.f32 %v4436_v31, %v4435_v2  ;;  %v4481_v39 = vmul.f32 %v8782_v6, %v8782_v6  ;;  %v4440_v47 = vsel %vm574_vm1, %v8782_v6, 0.0 }
 0x3bf   : > { %v4438_v20 = vsel %vm574_vm1, %v8788_v15, 0.0  ;;  %v4480_v36 = vmul.f32 %v8788_v15, %v8788_v15  ;;  %v6634_v59 = vpop.f32.mrb[16].mxu1 }
 0x3c0   : > { %v4439_v30 = vadd.f32 %v4438_v20, %v4437_v14  ;;  %v4538_v44 = vadd.f32 %v4537_v23, %v4536_v46  ;;  %v8798_v61 = vadd.f32 %v6634_v59, %v8554_v37  ;;  %v4342_v35 = vpop.f32.mrb[17].mxu1  ;;  %v4541_v43 = vsel %vm574_vm1, %v4481_v39, 0.0 }
 0x3c1   : > { %v4539_v48 = vsel %vm574_vm1, %v4480_v36, 0.0  ;;  %v8804_v63 = vadd.f32 %v4342_v35, %v8556_v17 }
 0x3c2   : > { %v4540_v21 = vadd.f32 %v4539_v48, %v4538_v44  ;;  %v4441_v33 = vadd.f32 %v4440_v47, %v4439_v30  ;;  %v4483_v45 = vmul.f32 %v8798_v61, %v8798_v61  ;;  %v4444_v55 = vsel %vm574_vm1, %v8798_v61, 0.0 }
 0x3c3   : > { %v4442_v37 = vsel %vm574_vm1, %v8804_v63, 0.0  ;;  %v4482_v19 = vmul.f32 %v8804_v63, %v8804_v63 }
 0x3c4   : > { %v4443_v29 = vadd.f32 %v4442_v37, %v4441_v33  ;;  %v4542_v38 = vadd.f32 %v4541_v43, %v4540_v21  ;;  %v4545_v3 = vsel %vm574_vm1, %v4483_v45, 0.0 }
 0x3c5   : > { %v4543_v17 = vsel %vm574_vm1, %v4482_v19, 0.0 }
 0x3c6   : > { %v4445_v57 = vadd.f32 %v4444_v55, %v4443_v29  ;;  %v4544_v52 = vadd.f32 %v4543_v17, %v4542_v38 }
 0x3c8   : > { %v4446_v51 = vrot.slane %v4445_v57, 4  ;;  %v4546_v50 = vadd.f32 %v4545_v3, %v4544_v52 }
 0x3ca   : > { %v4447_v2 = vadd.f32 %v4446_v51, %v4445_v57  ;;  %v4547_v5 = vrot.slane %v4546_v50, 4 }
 0x3cc   : > { %v4448_v0 = vrot.slane %v4447_v2, 2  ;;  %v4548_v31 = vadd.f32 %v4547_v5, %v4546_v50 }
 0x3ce   : > { %v4449_v27 = vadd.f32 %v4448_v0, %v4447_v2  ;;  %v4549_v46 = vrot.slane %v4548_v31, 2 }
 0x3d0   : > { %v4450_v14 = vrot.slane %v4449_v27, 1  ;;  %v4550_v23 = vadd.f32 %v4549_v46, %v4548_v31 }
 0x3d2   : > { %v4451_v39 = vadd.f32 %v4450_v14, %v4449_v27  ;;  %v4551_v20 = vrot.slane %v4550_v23, 1 }
 0x3d4   : > { %v4552_v36 = vadd.f32 %v4551_v20, %v4550_v23  ;;  %v8817_v59 = vmul.f32 0.00390625, %v4451_v39 }
 0x3d6   : > { %v4554_v30 = vmul.f32 0.00390625, %v4552_v36  ;;  %v4555_v44 = vmul.f32 %v8817_v59, %v8817_v59  ;;  %v4588_v35 = vsub.f32 %v8804_v63, %v8817_v59  ;;  %v4568_v48 = vsub.f32 %v8644_v42, %v8817_v59 }
 0x3d7   : > { %v4569_v21 = vsub.f32 %v8638_v34, %v8817_v59  ;;  %v4570_v43 = vsub.f32 %v8660_v32, %v8817_v59  ;;  %v4571_v45 = vsub.f32 %v8654_v16, %v8817_v59  ;;  %v4572_v37 = vsub.f32 %v8676_v22, %v8817_v59 }
 0x3d8   : > { %v4556_v47 = vsub.f32 %v4554_v30, %v4555_v44  ;;  %v4573_v63 = vsub.f32 %v8670_v25, %v8817_v59  ;;  %v4574_v19 = vsub.f32 %v8692_v54, %v8817_v59  ;;  %v4575_v42 = vsub.f32 %v8686_v1, %v8817_v59 }
 0x3d9   : > { %v4576_v34 = vsub.f32 %v8708_v12, %v8817_v59  ;;  %v4577_v32 = vsub.f32 %v8702_v8, %v8817_v59  ;;  %v4578_v16 = vsub.f32 %v8724_v49, %v8817_v59  ;;  %v4579_v22 = vsub.f32 %v8718_v13, %v8817_v59 }
 0x3da   : > { %v4557_v33 = vmax.f32 %v4556_v47, 0.0  ;;  %v4580_v25 = vsub.f32 %v8740_v60, %v8817_v59  ;;  %v4581_v54 = vsub.f32 %v8734_v58, %v8817_v59  ;;  %v4582_v1 = vsub.f32 %v8756_v28, %v8817_v59 }
 0x3db   : > { %v4583_v12 = vsub.f32 %v8750_v24, %v8817_v59  ;;  %v4584_v8 = vsub.f32 %v8772_v7, %v8817_v59  ;;  %v4585_v49 = vsub.f32 %v8766_v53, %v8817_v59  ;;  %v4586_v13 = vsub.f32 %v8788_v15, %v8817_v59 }
 0x3dc   : > { %v4590_v29 = vadd.f32 1e-05, %v4557_v33  ;;  %v4587_v60 = vsub.f32 %v8782_v6, %v8817_v59  ;;  %v4589_v58 = vsub.f32 %v8798_v61, %v8817_v59  ;;  %v4558_v28 = vsub.f32 %v8573_v56, %v8817_v59 }
 0x3dd   : > { %v4559_v24 = vsub.f32 %v8571_v62, %v8817_v59  ;;  %v4560_v7 = vsub.f32 %v8587_v10, %v8817_v59  ;;  %v4561_v53 = vsub.f32 %v8583_v4, %v8817_v59  ;;  %v4562_v15 = vsub.f32 %v8600_v41, %v8817_v59 }
 0x3de   : > { %6991 = vrsqrt.f32 %v4590_v29  ;;  %v4563_v6 = vsub.f32 %v8595_v26, %v8817_v59  ;;  %v4564_v61 = vsub.f32 %v8614_v40, %v8817_v59  ;;  %v4565_v56 = vsub.f32 %v8609_v9, %v8817_v59 }
 0x3df   : > { %v4566_v62 = vsub.f32 %v8628_v18, %v8817_v59  ;;  %v4567_v10 = vsub.f32 %v8623_v11, %v8817_v59 }
 0x3e8   : > { %v6992_v38 = vpop.eup %6991 }
 0x3e9   : > { %v8885_v4 = vmul.f32 %v6992_v38, %v4588_v35  ;;  %v4592_v55 = vmul.f32 %v6992_v38, %v4558_v28  ;;  %v4593_v41 = vmul.f32 %v6992_v38, %v4559_v24  ;;  %v4594_v17 = vmul.f32 %v6992_v38, %v4560_v7 }
 0x3ea   : > { %v4595_v57 = vmul.f32 %v6992_v38, %v4561_v53  ;;  %v4596_v26 = vmul.f32 %v6992_v38, %v4562_v15  ;;  %v4597_v52 = vmul.f32 %v6992_v38, %v4563_v6  ;;  %v4598_v3 = vmul.f32 %v6992_v38, %v4564_v61 }
 0x3eb   : > { %v4599_v51 = vmul.f32 %v6992_v38, %v4565_v56  ;;  %v4600_v40 = vmul.f32 %v6992_v38, %v4566_v62  ;;  %v4601_v50 = vmul.f32 %v6992_v38, %v4567_v10  ;;  %v4602_v2 = vmul.f32 %v6992_v38, %v4568_v48 }
 0x3ec   : > { %v4603_v9 = vmul.f32 %v6992_v38, %v4569_v21  ;;  %v4604_v5 = vmul.f32 %v6992_v38, %v4570_v43  ;;  %v4605_v0 = vmul.f32 %v6992_v38, %v4571_v45  ;;  %v4606_v18 = vmul.f32 %v6992_v38, %v4572_v37 }
 0x3ed   : > { %v4607_v31 = vmul.f32 %v6992_v38, %v4573_v63  ;;  %v4608_v27 = vmul.f32 %v6992_v38, %v4574_v19  ;;  %v4609_v11 = vmul.f32 %v6992_v38, %v4575_v42  ;;  %v4610_v46 = vmul.f32 %v6992_v38, %v4576_v34 }
 0x3ee   : > { %v4611_v14 = vmul.f32 %v6992_v38, %v4577_v32  ;;  %v4612_v23 = vmul.f32 %v6992_v38, %v4578_v16  ;;  %v4613_v39 = vmul.f32 %v6992_v38, %v4579_v22  ;;  %v4614_v20 = vmul.f32 %v6992_v38, %v4580_v25 }
 0x3ef   : > { %v4615_v36 = vmul.f32 %v6992_v38, %v4581_v54  ;;  %v4616_v59 = vmul.f32 %v6992_v38, %v4582_v1  ;;  %v4617_v30 = vmul.f32 %v6992_v38, %v4583_v12  ;;  %v4618_v44 = vmul.f32 %v6992_v38, %v4584_v8 }
 0x3f0   : > { %v4619_v35 = vmul.f32 %v6992_v38, %v4585_v49  ;;  %v4620_v47 = vmul.f32 %v6992_v38, %v4586_v13  ;;  %v8887_v33 = vmul.f32 %v6992_v38, %v4587_v60  ;;  %v8889_v48 = vmul.f32 %v6992_v38, %v4589_v58 }
 0x3f1   : > { %v4625_v21 = vmax.f32 %v4593_v41, 0.0  ;;  %v4624_v43 = vmax.f32 %v4592_v55, 0.0  ;;  %v4626_v45 = vmax.f32 %v4594_v17, 0.0  ;;  %v4627_v37 = vmax.f32 %v4595_v57, 0.0 }
 0x3f2   : > { %v4628_v63 = vmax.f32 %v4596_v26, 0.0  ;;  %v4629_v19 = vmax.f32 %v4597_v52, 0.0  ;;  %v4630_v42 = vmax.f32 %v4598_v3, 0.0  ;;  %v4631_v34 = vmax.f32 %v4599_v51, 0.0 }
 0x3f3   : > { %6637 = vmatprep.mubr.msk.f32.mxu0 %vm574_vm1, %v4624_v43  ;;  %v4632_v29 = vmax.f32 %v4600_v40, 0.0  ;;  %v4633_v32 = vmax.f32 %v4601_v50, 0.0  ;;  %v4634_v16 = vmax.f32 %v4602_v2, 0.0  ;;  %v4635_v22 = vmax.f32 %v4603_v9, 0.0 }
 0x3f4   : > { %6638 = vmatmul.mubr.msk.f32.vlgmr.msra.gmra.mrb[64].mxu0 %vm574_vm1, %v4625_v21  ;;  %v4636_v25 = vmax.f32 %v4604_v5, 0.0  ;;  %v4637_v54 = vmax.f32 %v4605_v0, 0.0  ;;  %v4638_v1 = vmax.f32 %v4606_v18, 0.0  ;;  %v4639_v12 = vmax.f32 %v4607_v31, 0.0 }
 0x3f5   : > { %6640 = vmatprep.mubr.msk.f32.mxu0 %vm574_vm1, %v4626_v45  ;;  %v4640_v8 = vmax.f32 %v4608_v27, 0.0  ;;  %v4641_v49 = vmax.f32 %v4609_v11, 0.0  ;;  %v4642_v13 = vmax.f32 %v4610_v46, 0.0  ;;  %v4643_v60 = vmax.f32 %v4611_v14, 0.0 }
 0x3f6   : > { %v4644_v58 = vmax.f32 %v4612_v23, 0.0  ;;  %v4645_v28 = vmax.f32 %v4613_v39, 0.0  ;;  %v4646_v24 = vmax.f32 %v4614_v20, 0.0  ;;  %v4647_v7 = vmax.f32 %v4615_v36, 0.0 }
 0x3f7   : > { %v4648_v53 = vmax.f32 %v4616_v59, 0.0  ;;  %v4649_v15 = vmax.f32 %v4617_v30, 0.0  ;;  %v4650_v6 = vmax.f32 %v4618_v44, 0.0  ;;  %v4651_v38 = vmax.f32 %v4619_v35, 0.0 }
 0x3f8   : > { %6641 = vmatmul.mubr.msk.f32.gmra.mrb[66].mxu0 %vm574_vm1, %v4627_v37  ;;  %v4652_v61 = vmax.f32 %v4620_v47, 0.0  ;;  %v4653_v56 = vmax.f32 %v8887_v33, 0.0  ;;  %v4654_v62 = vmax.f32 %v8885_v4, 0.0  ;;  %v4655_v10 = vmax.f32 %v8889_v48, 0.0 }
 0x3f9   : > { %6643 = vmatprep.mubr.msk.f32.mxu0 %vm574_vm1, %v4628_v63 }
 0x3fc   : > { %6644 = vmatmul.mubr.msk.f32.gmra.mrb[68].mxu0 %vm574_vm1, %v4629_v19 }
 0x3fd   : > { %6646 = vmatprep.mubr.msk.f32.mxu0 %vm574_vm1, %v4630_v42 }
 0x400   : > { %6647 = vmatmul.mubr.msk.f32.gmra.mrb[70].mxu0 %vm574_vm1, %v4631_v34 }
 0x401   : > { %6649 = vmatprep.mubr.msk.f32.mxu0 %vm574_vm1, %v4632_v29 }
 0x404   : > { %6650 = vmatmul.mubr.msk.f32.gmra.mrb[72].mxu0 %vm574_vm1, %v4633_v32 }
 0x405   : > { %6652 = vmatprep.mubr.msk.f32.mxu0 %vm574_vm1, %v4634_v16 }
 0x408   : > { %6653 = vmatmul.mubr.msk.f32.gmra.mrb[74].mxu0 %vm574_vm1, %v4635_v22 }
 0x409   : > { %6655 = vmatprep.mubr.msk.f32.mxu0 %vm574_vm1, %v4636_v25 }
 0x40c   : > { %6656 = vmatmul.mubr.msk.f32.gmra.mrb[76].mxu0 %vm574_vm1, %v4637_v54 }
 0x40d   : > { %6658 = vmatprep.mubr.msk.f32.mxu0 %vm574_vm1, %v4638_v1 }
 0x410   : > { %6659 = vmatmul.mubr.msk.f32.gmra.mrb[78].mxu0 %vm574_vm1, %v4639_v12 }
 0x411   : > { %6661 = vmatprep.mubr.msk.f32.mxu0 %vm574_vm1, %v4640_v8 }
 0x414   : > { %6662 = vmatmul.mubr.msk.f32.gmra.mrb[80].mxu0 %vm574_vm1, %v4641_v49 }
 0x415   : > { %6664 = vmatprep.mubr.msk.f32.mxu0 %vm574_vm1, %v4642_v13 }
 0x418   : > { %6665 = vmatmul.mubr.msk.f32.gmra.mrb[82].mxu0 %vm574_vm1, %v4643_v60 }
 0x419   : > { %6667 = vmatprep.mubr.msk.f32.mxu0 %vm574_vm1, %v4644_v58 }
 0x41c   : > { %6668 = vmatmul.mubr.msk.f32.gmra.mrb[84].mxu0 %vm574_vm1, %v4645_v28 }
 0x41d   : > { %6670 = vmatprep.mubr.msk.f32.mxu0 %vm574_vm1, %v4646_v24 }
 0x420   : > { %6671 = vmatmul.mubr.msk.f32.gmra.mrb[86].mxu0 %vm574_vm1, %v4647_v7 }
 0x421   : > { %6673 = vmatprep.mubr.msk.f32.mxu0 %vm574_vm1, %v4648_v53 }
 0x424   : > { %6674 = vmatmul.mubr.msk.f32.gmra.mrb[88].mxu0 %vm574_vm1, %v4649_v15 }
 0x425   : > { %6676 = vmatprep.mubr.msk.f32.mxu0 %vm574_vm1, %v4650_v6 }
 0x428   : > { %6677 = vmatmul.mubr.msk.f32.gmra.mrb[90].mxu0 %vm574_vm1, %v4651_v38 }
 0x429   : > { %6679 = vmatprep.mubr.msk.f32.mxu0 %vm574_vm1, %v4652_v61 }
 0x42c   : > { %6680 = vmatmul.mubr.msk.f32.gmra.mrb[92].mxu0 %vm574_vm1, %v4653_v56 }
 0x42d   : > { %6682 = vmatprep.mubr.msk.f32.mxu0 %vm574_vm1, %v4654_v62 }
 0x430   : > { %6683 = vmatmul.mubr.msk.f32.gmra.mrb[94].mxu0 %vm574_vm1, %v4655_v10 }
 0x4c7   : > { %v8926_v55 = vpop.f32.mrb[64].mxu0 }
 0x4c8   : > { %v4982_v41 = vsel %vm252_vm0, %v8926_v55, 0.0  ;;  %v5051_v17 = vmul.f32 %v8926_v55, %v8926_v55  ;;  %v8932_v57 = vpop.f32.mrb[65].mxu0 }
 0x4c9   : > { %v4981_v4 = vsel %vm252_vm0, %v8932_v57, 0.0  ;;  %v5050_v26 = vmul.f32 %v8932_v57, %v8932_v57 }
 0x4ca   : > { %v5083_v52 = vsel %vm252_vm0, %v5051_v17, 0.0  ;;  %v4983_v3 = vadd.f32 %v4982_v41, %v4981_v4 }
 0x4cb   : > { %v5082_v51 = vsel %vm252_vm0, %v5050_v26, 0.0  ;;  %v8940_v40 = vpop.f32.mrb[66].mxu0 }
 0x4cc   : > { %v5084_v50 = vadd.f32 %v5083_v52, %v5082_v51  ;;  %v8942_v2 = vpop.f32.mrb[67].mxu0  ;;  %v5053_v9 = vmul.f32 %v8940_v40, %v8940_v40  ;;  %v4986_v31 = vsel %vm252_vm0, %v8940_v40, 0.0 }
 0x4cd   : > { %v4984_v5 = vsel %vm252_vm0, %v8942_v2, 0.0  ;;  %v5052_v0 = vmul.f32 %v8942_v2, %v8942_v2 }
 0x4ce   : > { %v4985_v18 = vadd.f32 %v4984_v5, %v4983_v3  ;;  %v5087_v39 = vsel %vm252_vm0, %v5053_v9, 0.0 }
 0x4cf   : > { %v5085_v27 = vsel %vm252_vm0, %v5052_v0, 0.0  ;;  %v8953_v11 = vpop.f32.mrb[68].mxu0 }
 0x4d0   : > { %v5086_v46 = vadd.f32 %v5085_v27, %v5084_v50  ;;  %v8955_v14 = vpop.f32.mrb[69].mxu0  ;;  %v4987_v23 = vadd.f32 %v4986_v31, %v4985_v18  ;;  %v5055_v20 = vmul.f32 %v8953_v11, %v8953_v11  ;;  %v4990_v35 = vsel %vm252_vm0, %v8953_v11, 0.0 }
 0x4d1   : > { %v4988_v36 = vsel %vm252_vm0, %v8955_v14, 0.0  ;;  %v5054_v59 = vmul.f32 %v8955_v14, %v8955_v14 }
 0x4d2   : > { %v4989_v30 = vadd.f32 %v4988_v36, %v4987_v23  ;;  %v5088_v44 = vadd.f32 %v5087_v39, %v5086_v46  ;;  %v5091_v45 = vsel %vm252_vm0, %v5055_v20, 0.0 }
 0x4d3   : > { %v5089_v47 = vsel %vm252_vm0, %v5054_v59, 0.0  ;;  %v8967_v33 = vpop.f32.mrb[70].mxu0 }
 0x4d4   : > { %v5090_v48 = vadd.f32 %v5089_v47, %v5088_v44  ;;  %v8969_v21 = vpop.f32.mrb[71].mxu0  ;;  %v4991_v43 = vadd.f32 %v4990_v35, %v4989_v30  ;;  %v5057_v37 = vmul.f32 %v8967_v33, %v8967_v33  ;;  %v4994_v29 = vsel %vm252_vm0, %v8967_v33, 0.0 }
 0x4d5   : > { %v4992_v63 = vsel %vm252_vm0, %v8969_v21, 0.0  ;;  %v5056_v19 = vmul.f32 %v8969_v21, %v8969_v21 }
 0x4d6   : > { %v4993_v42 = vadd.f32 %v4992_v63, %v4991_v43  ;;  %v5092_v34 = vadd.f32 %v5091_v45, %v5090_v48  ;;  %v5095_v1 = vsel %vm252_vm0, %v5057_v37, 0.0 }
 0x4d7   : > { %v5093_v32 = vsel %vm252_vm0, %v5056_v19, 0.0  ;;  %v8981_v16 = vpop.f32.mrb[72].mxu0 }
 0x4d8   : > { %v5094_v22 = vadd.f32 %v5093_v32, %v5092_v34  ;;  %v8983_v25 = vpop.f32.mrb[73].mxu0  ;;  %v4995_v54 = vadd.f32 %v4994_v29, %v4993_v42  ;;  %v5059_v12 = vmul.f32 %v8981_v16, %v8981_v16  ;;  %v4998_v58 = vsel %vm252_vm0, %v8981_v16, 0.0 }
 0x4d9   : > { %v4996_v8 = vsel %vm252_vm0, %v8983_v25, 0.0  ;;  %v5058_v49 = vmul.f32 %v8983_v25, %v8983_v25 }
 0x4da   : > { %v4997_v13 = vadd.f32 %v4996_v8, %v4995_v54  ;;  %v5096_v60 = vadd.f32 %v5095_v1, %v5094_v22  ;;  %v5099_v6 = vsel %vm252_vm0, %v5059_v12, 0.0 }
 0x4db   : > { %v5097_v28 = vsel %vm252_vm0, %v5058_v49, 0.0  ;;  %v8995_v24 = vpop.f32.mrb[74].mxu0 }
 0x4dc   : > { %v5098_v7 = vadd.f32 %v5097_v28, %v5096_v60  ;;  %v8997_v53 = vpop.f32.mrb[75].mxu0  ;;  %v4999_v15 = vadd.f32 %v4998_v58, %v4997_v13  ;;  %v5061_v38 = vmul.f32 %v8995_v24, %v8995_v24  ;;  %v5002_v41 = vsel %vm252_vm0, %v8995_v24, 0.0 }
 0x4dd   : > { %v5000_v61 = vsel %vm252_vm0, %v8997_v53, 0.0  ;;  %v5060_v56 = vmul.f32 %v8997_v53, %v8997_v53 }
 0x4de   : > { %v5001_v62 = vadd.f32 %v5000_v61, %v4999_v15  ;;  %v5100_v10 = vadd.f32 %v5099_v6, %v5098_v7  ;;  %v5103_v51 = vsel %vm252_vm0, %v5061_v38, 0.0 }
 0x4df   : > { %v5101_v17 = vsel %vm252_vm0, %v5060_v56, 0.0  ;;  %v9009_v4 = vpop.f32.mrb[76].mxu0 }
 0x4e0   : > { %v5102_v26 = vadd.f32 %v5101_v17, %v5100_v10  ;;  %v9011_v52 = vpop.f32.mrb[77].mxu0  ;;  %v5003_v3 = vadd.f32 %v5002_v41, %v5001_v62  ;;  %v5063_v50 = vmul.f32 %v9009_v4, %v9009_v4  ;;  %v5006_v31 = vsel %vm252_vm0, %v9009_v4, 0.0 }
 0x4e1   : > { %v5004_v9 = vsel %vm252_vm0, %v9011_v52, 0.0  ;;  %v5062_v5 = vmul.f32 %v9011_v52, %v9011_v52 }
 0x4e2   : > { %v5005_v0 = vadd.f32 %v5004_v9, %v5003_v3  ;;  %v5104_v18 = vadd.f32 %v5103_v51, %v5102_v26  ;;  %v5107_v36 = vsel %vm252_vm0, %v5063_v50, 0.0 }
 0x4e3   : > { %v5105_v27 = vsel %vm252_vm0, %v5062_v5, 0.0  ;;  %v9023_v46 = vpop.f32.mrb[78].mxu0 }
 0x4e4   : > { %v5106_v23 = vadd.f32 %v5105_v27, %v5104_v18  ;;  %v9025_v39 = vpop.f32.mrb[79].mxu0  ;;  %v5007_v20 = vadd.f32 %v5006_v31, %v5005_v0  ;;  %v5065_v59 = vmul.f32 %v9023_v46, %v9023_v46  ;;  %v5010_v48 = vsel %vm252_vm0, %v9023_v46, 0.0 }
 0x4e5   : > { %v5008_v30 = vsel %vm252_vm0, %v9025_v39, 0.0  ;;  %v5064_v44 = vmul.f32 %v9025_v39, %v9025_v39 }
 0x4e6   : > { %v5009_v35 = vadd.f32 %v5008_v30, %v5007_v20  ;;  %v5108_v47 = vadd.f32 %v5107_v36, %v5106_v23  ;;  %v5111_v42 = vsel %vm252_vm0, %v5065_v59, 0.0 }
 0x4e7   : > { %v5109_v43 = vsel %vm252_vm0, %v5064_v44, 0.0  ;;  %v9037_v45 = vpop.f32.mrb[80].mxu0 }
 0x4e8   : > { %v5110_v37 = vadd.f32 %v5109_v43, %v5108_v47  ;;  %v9039_v63 = vpop.f32.mrb[81].mxu0  ;;  %v5011_v19 = vadd.f32 %v5010_v48, %v5009_v35  ;;  %v5067_v34 = vmul.f32 %v9037_v45, %v9037_v45  ;;  %v5014_v1 = vsel %vm252_vm0, %v9037_v45, 0.0 }
 0x4e9   : > { %v5012_v29 = vsel %vm252_vm0, %v9039_v63, 0.0  ;;  %v5066_v32 = vmul.f32 %v9039_v63, %v9039_v63 }
 0x4ea   : > { %v5013_v22 = vadd.f32 %v5012_v29, %v5011_v19  ;;  %v5112_v54 = vadd.f32 %v5111_v42, %v5110_v37  ;;  %v5115_v58 = vsel %vm252_vm0, %v5067_v34, 0.0 }
 0x4eb   : > { %v5113_v12 = vsel %vm252_vm0, %v5066_v32, 0.0  ;;  %v9051_v8 = vpop.f32.mrb[82].mxu0 }
 0x4ec   : > { %v5114_v49 = vadd.f32 %v5113_v12, %v5112_v54  ;;  %v9053_v13 = vpop.f32.mrb[83].mxu0  ;;  %v5015_v60 = vadd.f32 %v5014_v1, %v5013_v22  ;;  %v5069_v28 = vmul.f32 %v9051_v8, %v9051_v8  ;;  %v5018_v61 = vsel %vm252_vm0, %v9051_v8, 0.0 }
 0x4ed   : > { %v5016_v7 = vsel %vm252_vm0, %v9053_v13, 0.0  ;;  %v5068_v15 = vmul.f32 %v9053_v13, %v9053_v13 }
 0x4ee   : > { %v5017_v6 = vadd.f32 %v5016_v7, %v5015_v60  ;;  %v5116_v38 = vadd.f32 %v5115_v58, %v5114_v49  ;;  %v5119_v26 = vsel %vm252_vm0, %v5069_v28, 0.0 }
 0x4ef   : > { %v5117_v56 = vsel %vm252_vm0, %v5068_v15, 0.0  ;;  %v9065_v62 = vpop.f32.mrb[84].mxu0 }
 0x4f0   : > { %v5118_v10 = vadd.f32 %v5117_v56, %v5116_v38  ;;  %v9067_v41 = vpop.f32.mrb[85].mxu0  ;;  %v5019_v17 = vadd.f32 %v5018_v61, %v5017_v6  ;;  %v5071_v3 = vmul.f32 %v9065_v62, %v9065_v62  ;;  %v5022_v0 = vsel %vm252_vm0, %v9065_v62, 0.0 }
 0x4f1   : > { %v5020_v51 = vsel %vm252_vm0, %v9067_v41, 0.0  ;;  %v5070_v50 = vmul.f32 %v9067_v41, %v9067_v41 }
 0x4f2   : > { %v5021_v9 = vadd.f32 %v5020_v51, %v5019_v17  ;;  %v5120_v5 = vadd.f32 %v5119_v26, %v5118_v10  ;;  %v5123_v36 = vsel %vm252_vm0, %v5071_v3, 0.0 }
 0x4f3   : > { %v5121_v18 = vsel %vm252_vm0, %v5070_v50, 0.0  ;;  %v9079_v31 = vpop.f32.mrb[86].mxu0 }
 0x4f4   : > { %v5122_v27 = vadd.f32 %v5121_v18, %v5120_v5  ;;  %v9081_v23 = vpop.f32.mrb[87].mxu0  ;;  %v5023_v20 = vadd.f32 %v5022_v0, %v5021_v9  ;;  %v5073_v59 = vmul.f32 %v9079_v31, %v9079_v31  ;;  %v5026_v48 = vsel %vm252_vm0, %v9079_v31, 0.0 }
 0x4f5   : > { %v5024_v30 = vsel %vm252_vm0, %v9081_v23, 0.0  ;;  %v5072_v44 = vmul.f32 %v9081_v23, %v9081_v23 }
 0x4f6   : > { %v5025_v35 = vadd.f32 %v5024_v30, %v5023_v20  ;;  %v5124_v47 = vadd.f32 %v5123_v36, %v5122_v27  ;;  %v5127_v29 = vsel %vm252_vm0, %v5073_v59, 0.0 }
 0x4f7   : > { %v5125_v43 = vsel %vm252_vm0, %v5072_v44, 0.0  ;;  %v9093_v37 = vpop.f32.mrb[88].mxu0 }
 0x4f8   : > { %v5126_v19 = vadd.f32 %v5125_v43, %v5124_v47  ;;  %v9095_v42 = vpop.f32.mrb[89].mxu0  ;;  %v5027_v34 = vadd.f32 %v5026_v48, %v5025_v35  ;;  %v5075_v32 = vmul.f32 %v9093_v37, %v9093_v37  ;;  %v5030_v49 = vsel %vm252_vm0, %v9093_v37, 0.0 }
 0x4f9   : > { %v5028_v22 = vsel %vm252_vm0, %v9095_v42, 0.0  ;;  %v5074_v54 = vmul.f32 %v9095_v42, %v9095_v42 }
 0x4fa   : > { %v5029_v1 = vadd.f32 %v5028_v22, %v5027_v34  ;;  %v5128_v12 = vadd.f32 %v5127_v29, %v5126_v19  ;;  %v5131_v6 = vsel %vm252_vm0, %v5075_v32, 0.0 }
 0x4fb   : > { %v5129_v60 = vsel %vm252_vm0, %v5074_v54, 0.0  ;;  %v9107_v58 = vpop.f32.mrb[90].mxu0 }
 0x4fc   : > { %v5130_v28 = vadd.f32 %v5129_v60, %v5128_v12  ;;  %v9109_v7 = vpop.f32.mrb[91].mxu0  ;;  %v5031_v15 = vadd.f32 %v5030_v49, %v5029_v1  ;;  %v5077_v38 = vmul.f32 %v9107_v58, %v9107_v58  ;;  %v5034_v26 = vsel %vm252_vm0, %v9107_v58, 0.0 }
 0x4fd   : > { %v5032_v61 = vsel %vm252_vm0, %v9109_v7, 0.0  ;;  %v5076_v56 = vmul.f32 %v9109_v7, %v9109_v7 }
 0x4fe   : > { %v5033_v10 = vadd.f32 %v5032_v61, %v5031_v15  ;;  %v5132_v17 = vadd.f32 %v5131_v6, %v5130_v28  ;;  %v5135_v0 = vsel %vm252_vm0, %v5077_v38, 0.0 }
 0x4ff   : > { %v5133_v3 = vsel %vm252_vm0, %v5076_v56, 0.0  ;;  %v9121_v51 = vpop.f32.mrb[92].mxu0 }
 0x500   : > { %v5134_v50 = vadd.f32 %v5133_v3, %v5132_v17  ;;  %v9123_v9 = vpop.f32.mrb[93].mxu0  ;;  %v5035_v5 = vadd.f32 %v5034_v26, %v5033_v10  ;;  %v5079_v18 = vmul.f32 %v9121_v51, %v9121_v51  ;;  %v5038_v30 = vsel %vm252_vm0, %v9121_v51, 0.0 }
 0x501   : > { %v5036_v27 = vsel %vm252_vm0, %v9123_v9, 0.0  ;;  %v5078_v20 = vmul.f32 %v9123_v9, %v9123_v9 }
 0x502   : > { %v5037_v36 = vadd.f32 %v5036_v27, %v5035_v5  ;;  %v5136_v59 = vadd.f32 %v5135_v0, %v5134_v50  ;;  %v5139_v19 = vsel %vm252_vm0, %v5079_v18, 0.0 }
 0x503   : > { %v5137_v44 = vsel %vm252_vm0, %v5078_v20, 0.0  ;;  %v9135_v35 = vpop.f32.mrb[94].mxu0 }
 0x504   : > { %v5138_v47 = vadd.f32 %v5137_v44, %v5136_v59  ;;  %v9137_v48 = vpop.f32.mrb[95].mxu0  ;;  %v5039_v43 = vadd.f32 %v5038_v30, %v5037_v36  ;;  %v5081_v34 = vmul.f32 %v9135_v35, %v9135_v35  ;;  %v5042_v1 = vsel %vm252_vm0, %v9135_v35, 0.0 }
 0x505   : > { %v5040_v29 = vsel %vm252_vm0, %v9137_v48, 0.0  ;;  %v5080_v32 = vmul.f32 %v9137_v48, %v9137_v48 }
 0x506   : > { %v5041_v22 = vadd.f32 %v5040_v29, %v5039_v43  ;;  %v5140_v54 = vadd.f32 %v5139_v19, %v5138_v47  ;;  %v5143_v28 = vsel %vm252_vm0, %v5081_v34, 0.0 }
 0x507   : > { %v5141_v12 = vsel %vm252_vm0, %v5080_v32, 0.0 }
 0x508   : > { %v5043_v49 = vadd.f32 %v5042_v1, %v5041_v22  ;;  %v5142_v60 = vadd.f32 %v5141_v12, %v5140_v54 }
 0x50a   : > { %v5044_v15 = vrot.slane %v5043_v49, 4  ;;  %v5144_v6 = vadd.f32 %v5143_v28, %v5142_v60 }
 0x50c   : > { %v5045_v38 = vadd.f32 %v5044_v15, %v5043_v49  ;;  %v5145_v61 = vrot.slane %v5144_v6, 4 }
 0x50e   : > { %v5046_v56 = vrot.slane %v5045_v38, 2  ;;  %v5146_v10 = vadd.f32 %v5145_v61, %v5144_v6 }
 0x510   : > { %v5047_v17 = vadd.f32 %v5046_v56, %v5045_v38  ;;  %v5147_v26 = vrot.slane %v5146_v10, 2 }
 0x512   : > { %v5048_v3 = vrot.slane %v5047_v17, 1  ;;  %v5148_v50 = vadd.f32 %v5147_v26, %v5146_v10 }
 0x514   : > { %v5049_v5 = vadd.f32 %v5048_v3, %v5047_v17  ;;  %v5149_v0 = vrot.slane %v5148_v50, 1 }
 0x516   : > { %v5150_v18 = vadd.f32 %v5149_v0, %v5148_v50  ;;  %v9150_v27 = vmul.f32 0.00390625, %v5049_v5 }
 0x518   : > { %v5152_v20 = vmul.f32 0.00390625, %v5150_v18  ;;  %v5153_v36 = vmul.f32 %v9150_v27, %v9150_v27  ;;  %v5156_v59 = vsub.f32 %v8932_v57, %v9150_v27  ;;  %v5157_v30 = vsub.f32 %v8926_v55, %v9150_v27 }
 0x519   : > { %v5158_v44 = vsub.f32 %v8942_v2, %v9150_v27  ;;  %v5159_v47 = vsub.f32 %v8940_v40, %v9150_v27  ;;  %v5160_v43 = vsub.f32 %v8955_v14, %v9150_v27  ;;  %v5161_v19 = vsub.f32 %v8953_v11, %v9150_v27 }
 0x51a   : > { %v5154_v34 = vsub.f32 %v5152_v20, %v5153_v36  ;;  %v5162_v29 = vsub.f32 %v8969_v21, %v9150_v27  ;;  %v5163_v57 = vsub.f32 %v8967_v33, %v9150_v27  ;;  %v5164_v55 = vsub.f32 %v8983_v25, %v9150_v27 }
 0x51b   : > { %v5165_v2 = vsub.f32 %v8981_v16, %v9150_v27  ;;  %v5166_v40 = vsub.f32 %v8997_v53, %v9150_v27  ;;  %v5167_v14 = vsub.f32 %v8995_v24, %v9150_v27  ;;  %v5168_v11 = vsub.f32 %v9011_v52, %v9150_v27 }
 0x51c   : > { %v5155_v32 = vmax.f32 %v5154_v34, 0.0  ;;  %v5169_v21 = vsub.f32 %v9009_v4, %v9150_v27  ;;  %v5170_v33 = vsub.f32 %v9025_v39, %v9150_v27  ;;  %v5171_v25 = vsub.f32 %v9023_v46, %v9150_v27  ;;  %v6997_v34 = vld [vmem:[%s7209_s9 + $0x8] sm:$0xff] }
 0x51d   : > { %v5172_v16 = vsub.f32 %v9039_v63, %v9150_v27  ;;  %v5173_v53 = vsub.f32 %v9037_v45, %v9150_v27  ;;  %v5174_v24 = vsub.f32 %v9053_v13, %v9150_v27  ;;  %v5175_v52 = vsub.f32 %v9051_v8, %v9150_v27 }
 0x51e   : > { %v5176_v4 = vsub.f32 %v9067_v41, %v9150_v27  ;;  %v5177_v39 = vsub.f32 %v9065_v62, %v9150_v27  ;;  %v5178_v46 = vsub.f32 %v9081_v23, %v9150_v27  ;;  %v5179_v63 = vsub.f32 %v9079_v31, %v9150_v27 }
 0x51f   : > { %v5180_v45 = vsub.f32 %v9095_v42, %v9150_v27  ;;  %v5181_v13 = vsub.f32 %v9093_v37, %v9150_v27  ;;  %v5182_v8 = vsub.f32 %v9109_v7, %v9150_v27  ;;  %v5183_v41 = vsub.f32 %v9107_v58, %v9150_v27 }
 0x520   : > { %v5184_v62 = vsub.f32 %v9123_v9, %v9150_v27  ;;  %v5185_v23 = vsub.f32 %v9121_v51, %v9150_v27  ;;  %v5186_v31 = vsub.f32 %v9137_v48, %v9150_v27  ;;  %v5187_v42 = vsub.f32 %v9135_v35, %v9150_v27 }
 0x521   : > { %v5188_v22 = vadd.f32 1e-05, %v5155_v32  ;;  %v7001_v32 = vld [vmem:[%s7209_s9 + $0x28] sm:$0xff] }
 0x523   : > { %6993 = vrsqrt.f32 %v5188_v22  ;;  %v7011_v22 = vld [vmem:[%s7209_s9 + $0x78] sm:$0xff] }
 0x52d   : > { %v6994_v37 = vpop.eup %6993 }
 0x52e   : > { %v5190_v54 = vmul.f32 %v6994_v37, %v5156_v59  ;;  %v5191_v7 = vmul.f32 %v6994_v37, %v5157_v30  ;;  %v5192_v1 = vmul.f32 %v6994_v37, %v5158_v44  ;;  %v5193_v58 = vmul.f32 %v6994_v37, %v5159_v47 }
 0x52f   : > { %v5194_v12 = vmul.f32 %v6994_v37, %v5160_v43  ;;  %v5195_v49 = vmul.f32 %v6994_v37, %v5161_v19  ;;  %v5196_v9 = vmul.f32 %v6994_v37, %v5162_v29  ;;  %v5197_v60 = vmul.f32 %v6994_v37, %v5163_v57  ;;  %v6996_v43 = vld [vmem:[%s7209_s9] sm:$0xff]  ;;  %v6998_v57 = vld [vmem:[%s7209_s9 + $0x10] sm:$0xff] }
 0x530   : > { %v5198_v28 = vmul.f32 %v6994_v37, %v5164_v55  ;;  %v5199_v51 = vmul.f32 %v6994_v37, %v5165_v2  ;;  %v5200_v15 = vmul.f32 %v6994_v37, %v5166_v40  ;;  %v5201_v6 = vmul.f32 %v6994_v37, %v5167_v14  ;;  %v6999_v2 = vld [vmem:[%s7209_s9 + $0x18] sm:$0xff]  ;;  %v7000_v14 = vld [vmem:[%s7209_s9 + $0x20] sm:$0xff] }
 0x531   : > { %v5202_v48 = vmul.f32 %v6994_v37, %v5168_v11  ;;  %v5203_v38 = vmul.f32 %v6994_v37, %v5169_v21  ;;  %v5204_v61 = vmul.f32 %v6994_v37, %v5170_v33  ;;  %v5205_v35 = vmul.f32 %v6994_v37, %v5171_v25  ;;  %v7002_v33 = vld [vmem:[%s7209_s9 + $0x30] sm:$0xff] }
 0x532   : > { %v5206_v56 = vmul.f32 %v6994_v37, %v5172_v16  ;;  %v5207_v10 = vmul.f32 %v6994_v37, %v5173_v53  ;;  %v5208_v17 = vmul.f32 %v6994_v37, %v5174_v24  ;;  %v5209_v26 = vmul.f32 %v6994_v37, %v5175_v52  ;;  %v7003_v16 = vld [vmem:[%s7209_s9 + $0x38] sm:$0xff]  ;;  %v7004_v24 = vld [vmem:[%s7209_s9 + $0x40] sm:$0xff] }
 0x533   : > { %v5210_v3 = vmul.f32 %v6994_v37, %v5176_v4  ;;  %v5211_v50 = vmul.f32 %v6994_v37, %v5177_v39  ;;  %v5212_v5 = vmul.f32 %v6994_v37, %v5178_v46  ;;  %v5213_v0 = vmul.f32 %v6994_v37, %v5179_v63  ;;  %v7005_v4 = vld [vmem:[%s7209_s9 + $0x48] sm:$0xff]  ;;  %v7006_v46 = vld [vmem:[%s7209_s9 + $0x50] sm:$0xff] }
 0x534   : > { %v5214_v18 = vmul.f32 %v6994_v37, %v5180_v45  ;;  %v5215_v27 = vmul.f32 %v6994_v37, %v5181_v13  ;;  %v5216_v20 = vmul.f32 %v6994_v37, %v5182_v8  ;;  %v5217_v36 = vmul.f32 %v6994_v37, %v5183_v41  ;;  %v7007_v45 = vld [vmem:[%s7209_s9 + $0x58] sm:$0xff]  ;;  %v7008_v8 = vld [vmem:[%s7209_s9 + $0x60] sm:$0xff] }
 0x535   : > { %v9219_v59 = vmul.f32 %v6994_v37, %v5184_v62  ;;  %v9221_v30 = vmul.f32 %v6994_v37, %v5185_v23  ;;  %v9223_v44 = vmul.f32 %v6994_v37, %v5186_v31  ;;  %v9225_v47 = vmul.f32 %v6994_v37, %v5187_v42  ;;  %v7009_v62 = vld [vmem:[%s7209_s9 + $0x68] sm:$0xff]  ;;  %v7010_v31 = vld [vmem:[%s7209_s9 + $0x70] sm:$0xff] }
 0x536   : > { %v9233_v19 = vadd.f32 %v6996_v43, %v5190_v54  ;;  %v9236_v29 = vadd.f32 %v6997_v34, %v5191_v7  ;;  %v9239_v55 = vadd.f32 %v6998_v57, %v5192_v1  ;;  %v9242_v40 = vadd.f32 %v6999_v2, %v5193_v58  ;;  %v7012_v54 = vld [vmem:[%s7209_s9 + $0x80] sm:$0xff]  ;;  %v7013_v1 = vld [vmem:[%s7209_s9 + $0x88] sm:$0xff] }
 0x537   : > { %v9245_v11 = vadd.f32 %v7000_v14, %v5194_v12  ;;  %v9248_v21 = vadd.f32 %v7001_v32, %v5195_v49  ;;  %v9251_v25 = vadd.f32 %v7002_v33, %v5196_v9  ;;  %v9254_v53 = vadd.f32 %v7003_v16, %v5197_v60  ;;  %v7014_v12 = vld [vmem:[%s7209_s9 + $0x90] sm:$0xff]  ;;  %v7015_v9 = vld [vmem:[%s7209_s9 + $0x98] sm:$0xff] }
 0x538   : > { %v9257_v52 = vadd.f32 %v7004_v24, %v5198_v28  ;;  %v9260_v39 = vadd.f32 %v7005_v4, %v5199_v51  ;;  %v9263_v63 = vadd.f32 %v7006_v46, %v5200_v15  ;;  %v9266_v13 = vadd.f32 %v7007_v45, %v5201_v6  ;;  %v7016_v28 = vld [vmem:[%s7209_s9 + $0xa0] sm:$0xff]  ;;  %v7017_v15 = vld [vmem:[%s7209_s9 + $0xa8] sm:$0xff] }
 0x539   : > { %v9269_v41 = vadd.f32 %v7008_v8, %v5202_v48  ;;  %v9272_v23 = vadd.f32 %v7009_v62, %v5203_v38  ;;  %v9275_v42 = vadd.f32 %v7010_v31, %v5204_v61  ;;  %v9278_v37 = vadd.f32 %v7011_v22, %v5205_v35  ;;  %v7018_v48 = vld [vmem:[%s7209_s9 + $0xb0] sm:$0xff]  ;;  %v7019_v61 = vld [vmem:[%s7209_s9 + $0xb8] sm:$0xff] }
 0x53a   : > { %v9282_v7 = vadd.f32 %v7012_v54, %v5206_v56  ;;  %v9285_v58 = vadd.f32 %v7013_v1, %v5207_v10  ;;  %v9288_v49 = vadd.f32 %v7014_v12, %v5208_v17  ;;  %v9291_v60 = vadd.f32 %v7015_v9, %v5209_v26  ;;  %v7020_v56 = vld [vmem:[%s7209_s9 + $0xc0] sm:$0xff]  ;;  %v7021_v17 = vld [vmem:[%s7209_s9 + $0xc8] sm:$0xff] }
 0x53b   : > { %v9294_v51 = vadd.f32 %v7016_v28, %v5210_v3  ;;  %v9297_v6 = vadd.f32 %v7017_v15, %v5211_v50  ;;  %v9300_v38 = vadd.f32 %v7018_v48, %v5212_v5  ;;  %v9303_v35 = vadd.f32 %v7019_v61, %v5213_v0  ;;  %v7022_v3 = vld [vmem:[%s7209_s9 + $0xd0] sm:$0xff]  ;;  %v7023_v50 = vld [vmem:[%s7209_s9 + $0xd8] sm:$0xff]  ;;  %v7024_v5 = vld [vmem:[%s7209_s9 + $0xe0] sm:$0xff] }
 0x53c   : > { %v9306_v10 = vadd.f32 %v7020_v56, %v5214_v18  ;;  %v9309_v26 = vadd.f32 %v7021_v17, %v5215_v27  ;;  %v9312_v43 = vadd.f32 %v7022_v3, %v5216_v20  ;;  %v9315_v34 = vadd.f32 %v7023_v50, %v5217_v36  ;;  %v7025_v18 = vld [vmem:[%s7209_s9 + $0xe8] sm:$0xff]  ;;  %v7026_v27 = vld [vmem:[%s7209_s9 + $0xf0] sm:$0xff]  ;;  %v7027_v36 = vld [vmem:[%s7209_s9 + $0xf8] sm:$0xff] }
 0x53d   : > { %v9324_v0 = vadd.f32 %v7024_v5, %v9219_v59  ;;  %v9328_v57 = vadd.f32 %v7025_v18, %v9221_v30  ;;  %v9332_v20 = vadd.f32 %v7026_v27, %v9223_v44  ;;  %v9336_v2 = vadd.f32 %v7027_v36, %v9225_v47 }
 0x53e   : > { %v5254_v14 = vmax.f32 %v9233_v19, 0.0  ;;  %v5255_v59 = vmax.f32 %v9236_v29, 0.0  ;;  %v5256_v32 = vmax.f32 %v9239_v55, 0.0  ;;  %v5257_v30 = vmax.f32 %v9242_v40, 0.0 }
 0x53f   : > { %v5258_v33 = vmax.f32 %v9245_v11, 0.0  ;;  %v5259_v44 = vmax.f32 %v9248_v21, 0.0  ;;  %v5260_v16 = vmax.f32 %v9251_v25, 0.0  ;;  %v5261_v47 = vmax.f32 %v9254_v53, 0.0 }
 0x540   : > { %v5262_v19 = vmax.f32 %v9257_v52, 0.0  ;;  %v5263_v29 = vmax.f32 %v9260_v39, 0.0  ;;  %v5264_v55 = vmax.f32 %v9263_v63, 0.0  ;;  %v5265_v40 = vmax.f32 %v9266_v13, 0.0  ;;  %5286 = vst.msk [vmem:[%s9320_s12] sm:$0xff] %vm252_vm0, %v5254_v14  ;;  %5287 = vst.msk [vmem:[%s9320_s12 + $0x8] sm:$0xff] %vm252_vm0, %v5255_v59 }
 0x541   : > { %5288 = vst.msk [vmem:[%s9320_s12 + $0x10] sm:$0xff] %vm252_vm0, %v5256_v32  ;;  %5289 = vst.msk [vmem:[%s9320_s12 + $0x18] sm:$0xff] %vm252_vm0, %v5257_v30  ;;  %v5266_v11 = vmax.f32 %v9269_v41, 0.0  ;;  %v5267_v21 = vmax.f32 %v9272_v23, 0.0  ;;  %v5268_v25 = vmax.f32 %v9275_v42, 0.0  ;;  %v5269_v53 = vmax.f32 %v9278_v37, 0.0 }
 0x542   : > { %5290 = vst.msk [vmem:[%s9320_s12 + $0x20] sm:$0xff] %vm252_vm0, %v5258_v33  ;;  %5291 = vst.msk [vmem:[%s9320_s12 + $0x28] sm:$0xff] %vm252_vm0, %v5259_v44  ;;  %v5270_v24 = vmax.f32 %v9282_v7, 0.0  ;;  %v5271_v52 = vmax.f32 %v9285_v58, 0.0  ;;  %v5272_v4 = vmax.f32 %v9288_v49, 0.0  ;;  %v5273_v39 = vmax.f32 %v9291_v60, 0.0 }
 0x543   : > { %5292 = vst.msk [vmem:[%s9320_s12 + $0x30] sm:$0xff] %vm252_vm0, %v5260_v16  ;;  %5293 = vst.msk [vmem:[%s9320_s12 + $0x38] sm:$0xff] %vm252_vm0, %v5261_v47  ;;  %v5274_v46 = vmax.f32 %v9294_v51, 0.0  ;;  %v5275_v63 = vmax.f32 %v9297_v6, 0.0  ;;  %v5276_v45 = vmax.f32 %v9300_v38, 0.0  ;;  %v5277_v13 = vmax.f32 %v9303_v35, 0.0 }
 0x544   : > { %5294 = vst.msk [vmem:[%s9320_s12 + $0x40] sm:$0xff] %vm252_vm0, %v5262_v19  ;;  %5295 = vst.msk [vmem:[%s9320_s12 + $0x48] sm:$0xff] %vm252_vm0, %v5263_v29  ;;  %v5278_v8 = vmax.f32 %v9306_v10, 0.0  ;;  %v5279_v41 = vmax.f32 %v9309_v26, 0.0  ;;  %v5280_v62 = vmax.f32 %v9312_v43, 0.0  ;;  %v5281_v23 = vmax.f32 %v9315_v34, 0.0 }
 0x545   : > { %5296 = vst.msk [vmem:[%s9320_s12 + $0x50] sm:$0xff] %vm252_vm0, %v5264_v55  ;;  %5297 = vst.msk [vmem:[%s9320_s12 + $0x58] sm:$0xff] %vm252_vm0, %v5265_v40  ;;  %v5282_v31 = vmax.f32 %v9324_v0, 0.0  ;;  %v5283_v42 = vmax.f32 %v9328_v57, 0.0  ;;  %v5284_v22 = vmax.f32 %v9332_v20, 0.0  ;;  %v5285_v37 = vmax.f32 %v9336_v2, 0.0 }
 0x546   : > { %5298 = vst.msk [vmem:[%s9320_s12 + $0x60] sm:$0xff] %vm252_vm0, %v5266_v11  ;;  %5299 = vst.msk [vmem:[%s9320_s12 + $0x68] sm:$0xff] %vm252_vm0, %v5267_v21 }
 0x547   : > { %5300 = vst.msk [vmem:[%s9320_s12 + $0x70] sm:$0xff] %vm252_vm0, %v5268_v25  ;;  %5301 = vst.msk [vmem:[%s9320_s12 + $0x78] sm:$0xff] %vm252_vm0, %v5269_v53 }
 0x548   : > { %5302 = vst.msk [vmem:[%s9320_s12 + $0x80] sm:$0xff] %vm252_vm0, %v5270_v24  ;;  %5303 = vst.msk [vmem:[%s9320_s12 + $0x88] sm:$0xff] %vm252_vm0, %v5271_v52 }
 0x549   : > { %5304 = vst.msk [vmem:[%s9320_s12 + $0x90] sm:$0xff] %vm252_vm0, %v5272_v4  ;;  %5305 = vst.msk [vmem:[%s9320_s12 + $0x98] sm:$0xff] %vm252_vm0, %v5273_v39 }
 0x54a   : > { %5306 = vst.msk [vmem:[%s9320_s12 + $0xa0] sm:$0xff] %vm252_vm0, %v5274_v46  ;;  %5307 = vst.msk [vmem:[%s9320_s12 + $0xa8] sm:$0xff] %vm252_vm0, %v5275_v63 }
 0x54b   : > { %5308 = vst.msk [vmem:[%s9320_s12 + $0xb0] sm:$0xff] %vm252_vm0, %v5276_v45  ;;  %5309 = vst.msk [vmem:[%s9320_s12 + $0xb8] sm:$0xff] %vm252_vm0, %v5277_v13 }
 0x54c   : > { %5310 = vst.msk [vmem:[%s9320_s12 + $0xc0] sm:$0xff] %vm252_vm0, %v5278_v8  ;;  %5311 = vst.msk [vmem:[%s9320_s12 + $0xc8] sm:$0xff] %vm252_vm0, %v5279_v41 }
 0x54d   : > { %5312 = vst.msk [vmem:[%s9320_s12 + $0xd0] sm:$0xff] %vm252_vm0, %v5280_v62  ;;  %5313 = vst.msk [vmem:[%s9320_s12 + $0xd8] sm:$0xff] %vm252_vm0, %v5281_v23 }
 0x54e   : > { %5314 = vst.msk [vmem:[%s9320_s12 + $0xe0] sm:$0xff] %vm252_vm0, %v5282_v31  ;;  %5315 = vst.msk [vmem:[%s9320_s12 + $0xe8] sm:$0xff] %vm252_vm0, %v5283_v42 }
 0x54f   : > { %5316 = vst.msk [vmem:[%s9320_s12 + $0xf0] sm:$0xff] %vm252_vm0, %v5284_v22  ;;  %5317 = vst.msk [vmem:[%s9320_s12 + $0xf8] sm:$0xff] %vm252_vm0, %v5285_v37 }
 0x550 PF: > { %p14_p8 = scmp.ge.s32.totalorder %s7145_s20, 4   ;;  %s9545_s15 = smov %s7084_s16 }
 0x551   : > { %s9546_s16 = smov %s7088_s17  ;;  %s9547_s17 = smov %s7155_s23 }
 0x552   : > { %s9548_s18 = smov %s7145_s20  ;;  %16 = sbr.rel (!%p14_p8) target bundleno = 3 (0x3), region = 86 }
 0x559   :  { %5339 = vsyncpa [#allocation4], 1 }
 0x55a   :  { %5341 = vsyncpa [#allocation4 + $0x1], 1 }

</bundles_post_ra>
